<compile_context>
chip_gen: v5e
topology: v5e:2x2
jax: 0.10.0
libtpu: 0.0.40
codegen_flags: <defaults>
</compile_context>

<pallas_src>
import math

import jax
import jax.numpy as jnp
from jax.experimental import pallas as pl
from jax.experimental.pallas import tpu as pltpu

BN_EPS = 1e-5


# ----------------------------------------------------------------------------
# small helpers
# ----------------------------------------------------------------------------
def _pad_axis(x, axis, mult):
    pad = (-x.shape[axis]) % mult
    if pad == 0:
        return x
    widths = [(0, 0)] * x.ndim
    widths[axis] = (0, pad)
    return jnp.pad(x, widths)


def _tile_size(dim, cap, align):
    """Largest divisor of `dim` that is <= cap and aligned (or `dim` itself)."""
    t = math.gcd(dim, cap)
    if t != dim and t % align != 0:
        t = dim
    return t


def _vmem_limit(*nbytes):
    need = 2 * sum(nbytes) + (4 << 20)          # double-buffer + headroom
    return int(min(max(need, 32 << 20), 100 << 20))


# ----------------------------------------------------------------------------
# Pallas kernels
# ----------------------------------------------------------------------------
def _gemm_stats_kernel(x_ref, w_ref, y_ref, st_ref):
    """(1,TM,K)bf16 @ (1,K,C)bf16 -> f32 tile + per-tile channel sum / sumsq."""
    y = jnp.dot(x_ref[0, :, :], w_ref[0, :, :],
                preferred_element_type=jnp.float32)
    y_ref[0, :, :] = y
    s = jnp.sum(y, axis=0, keepdims=True)
    ss = jnp.sum(y * y, axis=0, keepdims=True)
    st_ref[0, 0, :, :] = jnp.concatenate([s, ss], axis=0)


def _bn_act_kernel(y_ref, sc_ref, sh_ref, o_ref):
    """y*scale + shift, ReLU, cast to bf16 (epilogue math kept in f32)."""
    y = y_ref[:, :] * sc_ref[:, :] + sh_ref[:, :]
    o_ref[:, :] = jnp.maximum(y, 0.0).astype(o_ref.dtype)


def _out_bias_tanh_kernel(x_ref, w_ref, b_ref, y_ref):
    """Final layer, transposed: (1,C,K)bf16 @ (1,K,TM)bf16 + bias, tanh."""
    acc = jnp.dot(w_ref[0, :, :], x_ref[0, :, :],
                  preferred_element_type=jnp.float32)
    y_ref[0, :, :] = jnp.tanh(acc + b_ref[0, :, :])


# ----------------------------------------------------------------------------
# pallas_call wrappers
# ----------------------------------------------------------------------------
def _matmul_stats(x, w, tm):
    g, m, k = x.shape
    c = w.shape[2]
    mt = m // tm
    vmem = _vmem_limit(tm * k * 2, k * c * 2, tm * c * 4, 2 * c * 4)
    return pl.pallas_call(
        _gemm_stats_kernel,
        out_shape=(jax.ShapeDtypeStruct((g, m, c), jnp.float32),
                   jax.ShapeDtypeStruct((g, mt, 2, c), jnp.float32)),
        grid_spec=pltpu.PrefetchScalarGridSpec(
            num_scalar_prefetch=0,
            grid=(g, mt),
            in_specs=[pl.BlockSpec((1, tm, k), lambda gi, mi: (gi, mi, 0)),
                      pl.BlockSpec((1, k, c), lambda gi, mi: (gi, 0, 0))],
            out_specs=[pl.BlockSpec((1, tm, c), lambda gi, mi: (gi, mi, 0)),
                       pl.BlockSpec((1, 1, 2, c),
                                    lambda gi, mi: (gi, mi, 0, 0))]),
        compiler_params=pltpu.CompilerParams(
            dimension_semantics=("parallel", "parallel"),
            vmem_limit_bytes=vmem),
    )(x, w)


def _bn_relu(y2d, scale, shift):
    r, c = y2d.shape
    tr = _tile_size(r, 1024, 8)
    vmem = _vmem_limit(tr * c * 4, c * 4, c * 4, tr * c * 2)
    return pl.pallas_call(
        _bn_act_kernel,
        out_shape=jax.ShapeDtypeStruct((r, c), jnp.bfloat16),
        grid_spec=pltpu.PrefetchScalarGridSpec(
            num_scalar_prefetch=0,
            grid=(r // tr,),
            in_specs=[pl.BlockSpec((tr, c), lambda i: (i, 0)),
                      pl.BlockSpec((1, c), lambda i: (0, 0)),
                      pl.BlockSpec((1, c), lambda i: (0, 0))],
            out_specs=pl.BlockSpec((tr, c), lambda i: (i, 0))),
        compiler_params=pltpu.CompilerParams(
            dimension_semantics=("parallel",),
            vmem_limit_bytes=vmem),
    )(y2d, scale.reshape(1, c).astype(jnp.float32),
      shift.reshape(1, c).astype(jnp.float32))


def _matmul_bias_tanh(xt, wt, bias, tm):
    g, k, m = xt.shape
    c = wt.shape[1]
    vmem = _vmem_limit(k * tm * 2, c * k * 2, c * tm * 4, c * 4)
    return pl.pallas_call(
        _out_bias_tanh_kernel,
        out_shape=jax.ShapeDtypeStruct((g, c, m), jnp.float32),
        grid_spec=pltpu.PrefetchScalarGridSpec(
            num_scalar_prefetch=0,
            grid=(g, m // tm),
            in_specs=[pl.BlockSpec((1, k, tm), lambda gi, mi: (gi, 0, mi)),
                      pl.BlockSpec((1, c, k), lambda gi, mi: (gi, 0, 0)),
                      pl.BlockSpec((1, c, 1), lambda gi, mi: (0, 0, 0))],
            out_specs=pl.BlockSpec((1, c, tm), lambda gi, mi: (gi, 0, mi))),
        compiler_params=pltpu.CompilerParams(
            dimension_semantics=("parallel", "parallel"),
            vmem_limit_bytes=vmem),
    )(xt, wt, bias.reshape(1, c, 1).astype(jnp.float32))


# ----------------------------------------------------------------------------
# ConvTranspose2d(k=4, s=2, p=1) as 4 parity GEMMs
# ----------------------------------------------------------------------------
# out[n, 2m+a, 2q+b, co] = sum_{dy,dx in {0,1}} in[n, m-1+a+dy, q-1+b+dx, :]
#                                              @ W[:, co, 3-a-2dy, 3-b-2dx]
def _parity_weights(w):
    """w: (Cin, Cout, 4, 4) PyTorch ConvTranspose2d layout -> (4, 4*Cin, Cout)."""
    mats = []
    for a in (0, 1):
        for b in (0, 1):
            blocks = [w[:, :, 3 - a - 2 * dy, 3 - b - 2 * dx]
                      for dy in (0, 1) for dx in (0, 1)]
            mats.append(jnp.concatenate(blocks, axis=0))
    return jnp.stack(mats, axis=0)


def _make_parity_patches(x):
    """x: (N,H,W,C) -> (4, N*H*W, 4*C)   (2x2 taps per output parity)."""
    n, h, w, c = x.shape
    xp = jnp.pad(x, ((0, 0), (1, 1), (1, 1), (0, 0)))
    pats = []
    for a in (0, 1):
        for b in (0, 1):
            taps = [xp[:, a + dy:a + dy + h, b + dx:b + dx + w, :]
                    for dy in (0, 1) for dx in (0, 1)]
            pats.append(jnp.concatenate(taps, axis=-1).reshape(n * h * w, 4 * c))
    return jnp.stack(pats, axis=0)


def _make_parity_patches_t(x):
    """Transposed patches for the lane-dense final layer: (4, 4*C, N*H*W)."""
    n, h, w, c = x.shape
    xp = jnp.pad(x, ((0, 0), (1, 1), (1, 1), (0, 0)))
    pats = []
    for a in (0, 1):
        for b in (0, 1):
            taps = [xp[:, a + dy:a + dy + h, b + dx:b + dx + w, :]
                    for dy in (0, 1) for dx in (0, 1)]
            p = jnp.concatenate(taps, axis=-1).reshape(n * h * w, 4 * c)
            pats.append(p.T)
    return jnp.stack(pats, axis=0)


def _bn_affine(stats, gamma, beta, count, cout):
    """Finalize training-mode BN from fused sum/sumsq -> (scale, shift)."""
    s = jnp.sum(stats[:, :, 0, :], axis=(0, 1))
    ss = jnp.sum(stats[:, :, 1, :], axis=(0, 1))
    if s.shape[0] != cout:                       # layer 1: columns are (ky,kx,c)
        s = s.reshape(-1, cout).sum(axis=0)
        ss = ss.reshape(-1, cout).sum(axis=0)
    mean = s / count
    var = jnp.maximum(ss / count - mean * mean, 0.0)
    scale = gamma * jax.lax.rsqrt(var + BN_EPS)
    shift = beta - mean * scale
    return scale, shift


def _deconv_bn_relu(x, w, gamma, beta):
    """ConvTranspose2d(k4,s2,p1) (bias dropped, cancelled by BN) + BN + ReLU."""
    n, h, ww, _ = x.shape
    cout = w.shape[1]
    w4 = _pad_axis(_parity_weights(w), 1, 128).astype(jnp.bfloat16)
    patches = _pad_axis(_make_parity_patches(x.astype(jnp.bfloat16)), 2, 128)
    m = n * h * ww
    tm = _tile_size(m, 512, 8)
    y, stats = _matmul_stats(patches, w4, tm)              # (4, M, Cout) f32
    scale, shift = _bn_affine(stats, gamma, beta, float(4 * m), cout)
    act = _bn_relu(y.reshape(4 * m, cout), scale, shift)   # (4M, Cout) bf16
    return (act.reshape(2, 2, n, h, ww, cout)
               .transpose(2, 3, 0, 4, 1, 5)
               .reshape(n, 2 * h, 2 * ww, cout))           # NHWC


def _deconv_tanh(x, w, bias):
    """Final ConvTranspose2d(k4,s2,p1) + bias + tanh, NCHW f32 output."""
    n, h, ww, _ = x.shape
    cout = w.shape[1]
    w4t = _pad_axis(_parity_weights(w).transpose(0, 2, 1), 2, 128)
    w4t = w4t.astype(jnp.bfloat16)                          # (4, Cout, Kp)
    patches_t = _pad_axis(_make_parity_patches_t(x.astype(jnp.bfloat16)), 1, 128)
    m = n * h * ww
    tm = _tile_size(m, 512, 128)
    y = _matmul_bias_tanh(patches_t, w4t, bias, tm)         # (4, Cout, M) f32
    return (y.reshape(2, 2, cout, n, h, ww)
             .transpose(3, 2, 4, 0, 5, 1)
             .reshape(n, cout, 2 * h, 2 * ww))              # NCHW


# ----------------------------------------------------------------------------
# full generator forward
# ----------------------------------------------------------------------------
def generator_forward(z, params):
    """z: (N, 100, 1, 1) f32 -> images (N, 3, 64, 64) f32 (tanh range)."""
    n = z.shape[0]
    (w1, _b1, g1, be1), (w2, _b2, g2, be2), (w3, _b3, g3, be3), \
        (w4, _b4, g4, be4), (w5, b5, _g5, _be5) = params

    # deconv1 (k4 s1 p0 on a 1x1 input) == dense GEMM; BN + ReLU.
    c1 = w1.shape[1]
    w1f = _pad_axis(w1.transpose(0, 2, 3, 1).reshape(w1.shape[0], 16 * c1), 0, 128)
    w1f = w1f[None].astype(jnp.bfloat16)                        # (1, Kp, 16*c1)
    zin = _pad_axis(z.reshape(n, w1.shape[0]).astype(jnp.bfloat16), 1, 128)[None]
    tm = _tile_size(n, 512, 8)
    y, stats = _matmul_stats(zin, w1f, tm)                      # (1, N, 16*c1)
    scale, shift = _bn_affine(stats, g1, be1, float(n * 16), c1)
    x = _bn_relu(y.reshape(n * 16, c1), scale, shift).reshape(n, 4, 4, c1)

    # deconv2-4: stride-2 transposed convs, BN + ReLU (NHWC bf16 between layers).
    for w, g, be in ((w2, g2, be2), (w3, g3, be3), (w4, g4, be4)):
        x = _deconv_bn_relu(x, w, g, be)

    # deconv5: bias + tanh fused into the GEMM epilogue, NCHW out.
    return _deconv_tanh(x, w5, b5)


# ----------------------------------------------------------------------------
# parameters + pure-JAX reference (PyTorch semantics) for validation
# ----------------------------------------------------------------------------
def init_generator_params(key, d=128):
    """weights ~ N(0, 0.02) (normal_init); small random bias / BN affine."""
    dims = [(100, 8 * d), (8 * d, 4 * d), (4 * d, 2 * d), (2 * d, d), (d, 3)]
    params = []
    for cin, cout in dims:
        key, kw, kb, kg, kbe = jax.random.split(key, 5)
        w = 0.02 * jax.random.normal(kw, (cin, cout, 4, 4), jnp.float32)
        b = 0.01 * jax.random.normal(kb, (cout,), jnp.float32)
        gamma = 1.0 + 0.1 * jax.random.normal(kg, (cout,), jnp.float32)
        beta = 0.1 * jax.random.normal(kbe, (cout,), jnp.float32)
        params.append((w, b, gamma, beta))
    return params


def reference_forward(z, params):
    def deconv(x, w, b, stride, pad):
        y = jax.lax.conv_general_dilated(
            x, jnp.flip(w, (2, 3)),
            window_strides=(1, 1),
            padding=[(3 - pad, 3 - pad)] * 2,
            lhs_dilation=(stride, stride),
            dimension_numbers=("NCHW", "IOHW", "NCHW"),
            precision=jax.lax.Precision.HIGHEST)
        return y + b.reshape(1, -1, 1, 1)

    def bn(x, g, b):
        m = jnp.mean(x, axis=(0, 2, 3), keepdims=True)
        v = jnp.var(x, axis=(0, 2, 3), keepdims=True)
        return ((x - m) * jax.lax.rsqrt(v + BN_EPS)
                * g.reshape(1, -1, 1, 1) + b.reshape(1, -1, 1, 1))

    (w1, b1, g1, be1), (w2, b2, g2, be2), (w3, b3, g3, be3), \
        (w4, b4, g4, be4), (w5, b5, _, _) = params
    x = jax.nn.relu(bn(deconv(z, w1, b1, 1, 0), g1, be1))
    x = jax.nn.relu(bn(deconv(x, w2, b2, 2, 1), g2, be2))
    x = jax.nn.relu(bn(deconv(x, w3, b3, 2, 1), g3, be3))
    x = jax.nn.relu(bn(deconv(x, w4, b4, 2, 1), g4, be4))
    return jnp.tanh(deconv(x, w5, b5, 2, 1))


if __name__ == "__main__":
    key = jax.random.PRNGKey(0)
    kp, kz = jax.random.split(key)

    d = 16                      # module default is 128; shapes scale linearly
    params = init_generator_params(kp, d=d)
    z = jax.random.normal(kz, (2, 100, 1, 1), jnp.float32)

    fwd = jax.jit(generator_forward)
    out = jax.block_until_ready(fwd(z, params))

    assert out.shape == (2, 3, 64, 64), out.shape
    assert bool(jnp.all(jnp.isfinite(out))), "non-finite output"
    assert bool(jnp.all(jnp.abs(out) <= 1.0)), "tanh range violated"

    ref = reference_forward(z, params)
    err = float(jnp.max(jnp.abs(out - ref)))
    assert err < 5e-2, f"mismatch vs reference: {err}"

    print("KERNEL_OK")
</pallas_src>

<mosaic_0001>
module attributes {stable_mosaic.version = 11 : i64} {
  func.func @_gemm_stats_kernel(%arg0: i32, %arg1: i32, %arg2: memref<1x2x128xbf16, #tpu.memory_space<vmem>>, %arg3: memref<1x128x2048xbf16, #tpu.memory_space<vmem>>, %arg4: memref<1x2x2048xf32, #tpu.memory_space<vmem>>, %arg5: memref<1x1x2x2048xf32, #tpu.memory_space<vmem>>) attributes {dimension_semantics = [#tpu.dimension_semantics<parallel>, #tpu.dimension_semantics<parallel>], iteration_bounds = array<i64: 1, 1>, scalar_prefetch = 0 : i64, scratch_operands = 0 : i64, tpu.core_type = #tpu.core_type<tc>, window_params = [{transform_indices = @transform_0, window_bounds = array<i64: 1, 2, 128>}, {transform_indices = @transform_1, window_bounds = array<i64: 1, 128, 2048>}, {transform_indices = @transform_2, window_bounds = array<i64: 1, 2, 2048>}, {transform_indices = @transform_3, window_bounds = array<i64: 1, 1, 2, 2048>}]} {
    %c0 = arith.constant 0 : index
    %c0_0 = arith.constant 0 : index
    %c0_1 = arith.constant 0 : index
    %0 = vector.load %arg2[%c0, %c0_0, %c0_1] : memref<1x2x128xbf16, #tpu.memory_space<vmem>>, vector<1x2x128xbf16>
    %1 = vector.shape_cast %0 : vector<1x2x128xbf16> to vector<2x128xbf16>
    %c0_2 = arith.constant 0 : index
    %c0_3 = arith.constant 0 : index
    %c0_4 = arith.constant 0 : index
    %2 = vector.load %arg3[%c0_2, %c0_3, %c0_4] : memref<1x128x2048xbf16, #tpu.memory_space<vmem>>, vector<1x128x2048xbf16>
    %3 = vector.shape_cast %2 : vector<1x128x2048xbf16> to vector<128x2048xbf16>
    %cst = arith.constant dense<0.000000e+00> : vector<2x2048xf32>
    %4 = tpu.matmul %1, %3, %cst {dimension_numbers = #tpu.dot_dimension_numbers<[1], [0], [0], [1], [0, 0, 1, 1], [], []>} : vector<2x128xbf16>, vector<128x2048xbf16>, vector<2x2048xf32> -> vector<2x2048xf32>
    %c0_5 = arith.constant 0 : index
    %c0_6 = arith.constant 0 : index
    %c0_7 = arith.constant 0 : index
    %5 = vector.load %arg4[%c0_5, %c0_6, %c0_7] : memref<1x2x2048xf32, #tpu.memory_space<vmem>>, vector<1x2x2048xf32>
    %6 = vector.shape_cast %5 : vector<1x2x2048xf32> to vector<2x2048xf32>
    %7 = vector.shape_cast %4 : vector<2x2048xf32> to vector<1x2x2048xf32>
    tpu.vector_store %arg4[%c0_5, %c0_6, %c0_7], %7 {strides = array<i32>} : memref<1x2x2048xf32, #tpu.memory_space<vmem>>, vector<1x2x2048xf32>,
    %cst_8 = arith.constant dense<0.000000e+00> : vector<2048xf32>
    %8 = vector.multi_reduction <add>, %4, %cst_8 [0] : vector<2x2048xf32> to vector<2048xf32>
    %9 = vector.shape_cast %8 : vector<2048xf32> to vector<1x2048xf32>
    %10 = arith.mulf %4, %4 : vector<2x2048xf32>
    %cst_9 = arith.constant dense<0.000000e+00> : vector<2048xf32>
    %11 = vector.multi_reduction <add>, %10, %cst_9 [0] : vector<2x2048xf32> to vector<2048xf32>
    %12 = vector.shape_cast %11 : vector<2048xf32> to vector<1x2048xf32>
    %13 = tpu.concatenate %9, %12 in 0 : vector<1x2048xf32>, vector<1x2048xf32> -> vector<2x2048xf32>
    %c0_10 = arith.constant 0 : index
    %c0_11 = arith.constant 0 : index
    %c0_12 = arith.constant 0 : index
    %c0_13 = arith.constant 0 : index
    %14 = vector.load %arg5[%c0_10, %c0_11, %c0_12, %c0_13] : memref<1x1x2x2048xf32, #tpu.memory_space<vmem>>, vector<1x1x2x2048xf32>
    %15 = vector.shape_cast %14 : vector<1x1x2x2048xf32> to vector<2x2048xf32>
    %16 = vector.shape_cast %13 : vector<2x2048xf32> to vector<1x1x2x2048xf32>
    tpu.vector_store %arg5[%c0_10, %c0_11, %c0_12, %c0_13], %16 {strides = array<i32>} : memref<1x1x2x2048xf32, #tpu.memory_space<vmem>>, vector<1x1x2x2048xf32>,
    return
  }
  func.func @transform_0(%arg0: i32, %arg1: i32) -> (i32, i32, i32) {
    %c0_i32 = arith.constant 0 : i32
    %c0_i32_0 = arith.constant 0 : i32
    return %arg0, %arg1, %c0_i32 : i32, i32, i32
  }
  func.func @transform_1(%arg0: i32, %arg1: i32) -> (i32, i32, i32) {
    %c0_i32 = arith.constant 0 : i32
    %c0_i32_0 = arith.constant 0 : i32
    %c0_i32_1 = arith.constant 0 : i32
    return %arg0, %c0_i32, %c0_i32_0 : i32, i32, i32
  }
  func.func @transform_2(%arg0: i32, %arg1: i32) -> (i32, i32, i32) {
    %c0_i32 = arith.constant 0 : i32
    %c0_i32_0 = arith.constant 0 : i32
    return %arg0, %arg1, %c0_i32 : i32, i32, i32
  }
  func.func @transform_3(%arg0: i32, %arg1: i32) -> (i32, i32, i32, i32) {
    %c0_i32 = arith.constant 0 : i32
    %c0_i32_0 = arith.constant 0 : i32
    %c0_i32_1 = arith.constant 0 : i32
    return %arg0, %arg1, %c0_i32, %c0_i32_0 : i32, i32, i32, i32
  }
}

module attributes {stable_mosaic.version = 11 : i64} {
  func.func @_bn_act_kernel(%arg0: i32, %arg1: memref<32x128xf32, #tpu.memory_space<vmem>>, %arg2: memref<1x128xf32, #tpu.memory_space<vmem>>, %arg3: memref<1x128xf32, #tpu.memory_space<vmem>>, %arg4: memref<32x128xbf16, #tpu.memory_space<vmem>>) attributes {dimension_semantics = [#tpu.dimension_semantics<parallel>], iteration_bounds = array<i64: 1>, scalar_prefetch = 0 : i64, scratch_operands = 0 : i64, tpu.core_type = #tpu.core_type<tc>, window_params = [{transform_indices = @transform_0, window_bounds = array<i64: 32, 128>}, {pipeline_mode = #tpu.pipeline_mode<synchronous>, transform_indices = @transform_1, window_bounds = array<i64: 1, 128>}, {pipeline_mode = #tpu.pipeline_mode<synchronous>, transform_indices = @transform_2, window_bounds = array<i64: 1, 128>}, {transform_indices = @transform_3, window_bounds = array<i64: 32, 128>}]} {
    %c0 = arith.constant 0 : index
    %c0_0 = arith.constant 0 : index
    %0 = vector.load %arg1[%c0, %c0_0] : memref<32x128xf32, #tpu.memory_space<vmem>>, vector<32x128xf32>
    %c0_1 = arith.constant 0 : index
    %c0_2 = arith.constant 0 : index
    %1 = vector.load %arg2[%c0_1, %c0_2] : memref<1x128xf32, #tpu.memory_space<vmem>>, vector<1x128xf32>
    %2 = vector.broadcast %1 : vector<1x128xf32> to vector<32x128xf32>
    %3 = arith.mulf %0, %2 : vector<32x128xf32>
    %c0_3 = arith.constant 0 : index
    %c0_4 = arith.constant 0 : index
    %4 = vector.load %arg3[%c0_3, %c0_4] : memref<1x128xf32, #tpu.memory_space<vmem>>, vector<1x128xf32>
    %5 = vector.broadcast %4 : vector<1x128xf32> to vector<32x128xf32>
    %6 = arith.addf %3, %5 : vector<32x128xf32>
    %cst = arith.constant 0.000000e+00 : f32
    %7 = vector.broadcast %cst : f32 to vector<32x128xf32>
    %8 = arith.maximumf %6, %7 : vector<32x128xf32>
    %9 = arith.truncf %8 : vector<32x128xf32> to vector<32x128xbf16>
    %c0_5 = arith.constant 0 : index
    %c0_6 = arith.constant 0 : index
    %10 = vector.load %arg4[%c0_5, %c0_6] : memref<32x128xbf16, #tpu.memory_space<vmem>>, vector<32x128xbf16>
    tpu.vector_store %arg4[%c0_5, %c0_6], %9 {strides = array<i32>} : memref<32x128xbf16, #tpu.memory_space<vmem>>, vector<32x128xbf16>,
    return
  }
  func.func @transform_0(%arg0: i32) -> (i32, i32) {
    %c0_i32 = arith.constant 0 : i32
    %c0_i32_0 = arith.constant 0 : i32
    return %arg0, %c0_i32 : i32, i32
  }
  func.func @transform_1(%arg0: i32) -> (i32, i32) {
    %c0_i32 = arith.constant 0 : i32
    %c0_i32_0 = arith.constant 0 : i32
    %c0_i32_1 = arith.constant 0 : i32
    return %c0_i32, %c0_i32_0 : i32, i32
  }
  func.func @transform_2(%arg0: i32) -> (i32, i32) {
    %c0_i32 = arith.constant 0 : i32
    %c0_i32_0 = arith.constant 0 : i32
    %c0_i32_1 = arith.constant 0 : i32
    return %c0_i32, %c0_i32_0 : i32, i32
  }
  func.func @transform_3(%arg0: i32) -> (i32, i32) {
    %c0_i32 = arith.constant 0 : i32
    %c0_i32_0 = arith.constant 0 : i32
    return %arg0, %c0_i32 : i32, i32
  }
}

module attributes {stable_mosaic.version = 11 : i64} {
  func.func @_gemm_stats_kernel(%arg0: i32, %arg1: i32, %arg2: memref<1x32x512xbf16, #tpu.memory_space<vmem>>, %arg3: memref<1x512x64xbf16, #tpu.memory_space<vmem>>, %arg4: memref<1x32x64xf32, #tpu.memory_space<vmem>>, %arg5: memref<1x1x2x64xf32, #tpu.memory_space<vmem>>) attributes {dimension_semantics = [#tpu.dimension_semantics<parallel>, #tpu.dimension_semantics<parallel>], iteration_bounds = array<i64: 4, 1>, scalar_prefetch = 0 : i64, scratch_operands = 0 : i64, tpu.core_type = #tpu.core_type<tc>, window_params = [{transform_indices = @transform_0, window_bounds = array<i64: 1, 32, 512>}, {transform_indices = @transform_1, window_bounds = array<i64: 1, 512, 64>}, {transform_indices = @transform_2, window_bounds = array<i64: 1, 32, 64>}, {transform_indices = @transform_3, window_bounds = array<i64: 1, 1, 2, 64>}]} {
    %c0 = arith.constant 0 : index
    %c0_0 = arith.constant 0 : index
    %c0_1 = arith.constant 0 : index
    %0 = vector.load %arg2[%c0, %c0_0, %c0_1] : memref<1x32x512xbf16, #tpu.memory_space<vmem>>, vector<1x32x512xbf16>
    %1 = vector.shape_cast %0 : vector<1x32x512xbf16> to vector<32x512xbf16>
    %c0_2 = arith.constant 0 : index
    %c0_3 = arith.constant 0 : index
    %c0_4 = arith.constant 0 : index
    %2 = vector.load %arg3[%c0_2, %c0_3, %c0_4] : memref<1x512x64xbf16, #tpu.memory_space<vmem>>, vector<1x512x64xbf16>
    %3 = vector.shape_cast %2 : vector<1x512x64xbf16> to vector<512x64xbf16>
    %cst = arith.constant dense<0.000000e+00> : vector<32x64xf32>
    %4 = tpu.matmul %1, %3, %cst {dimension_numbers = #tpu.dot_dimension_numbers<[1], [0], [0], [1], [0, 0, 1, 1], [], []>} : vector<32x512xbf16>, vector<512x64xbf16>, vector<32x64xf32> -> vector<32x64xf32>
    %c0_5 = arith.constant 0 : index
    %c0_6 = arith.constant 0 : index
    %c0_7 = arith.constant 0 : index
    %5 = vector.load %arg4[%c0_5, %c0_6, %c0_7] : memref<1x32x64xf32, #tpu.memory_space<vmem>>, vector<1x32x64xf32>
    %6 = vector.shape_cast %5 : vector<1x32x64xf32> to vector<32x64xf32>
    %7 = vector.shape_cast %4 : vector<32x64xf32> to vector<1x32x64xf32>
    tpu.vector_store %arg4[%c0_5, %c0_6, %c0_7], %7 {strides = array<i32>} : memref<1x32x64xf32, #tpu.memory_space<vmem>>, vector<1x32x64xf32>,
    %cst_8 = arith.constant dense<0.000000e+00> : vector<64xf32>
    %8 = vector.multi_reduction <add>, %4, %cst_8 [0] : vector<32x64xf32> to vector<64xf32>
    %9 = vector.shape_cast %8 : vector<64xf32> to vector<1x64xf32>
    %10 = arith.mulf %4, %4 : vector<32x64xf32>
    %cst_9 = arith.constant dense<0.000000e+00> : vector<64xf32>
    %11 = vector.multi_reduction <add>, %10, %cst_9 [0] : vector<32x64xf32> to vector<64xf32>
    %12 = vector.shape_cast %11 : vector<64xf32> to vector<1x64xf32>
    %13 = tpu.concatenate %9, %12 in 0 : vector<1x64xf32>, vector<1x64xf32> -> vector<2x64xf32>
    %c0_10 = arith.constant 0 : index
    %c0_11 = arith.constant 0 : index
    %c0_12 = arith.constant 0 : index
    %c0_13 = arith.constant 0 : index
    %14 = vector.load %arg5[%c0_10, %c0_11, %c0_12, %c0_13] : memref<1x1x2x64xf32, #tpu.memory_space<vmem>>, vector<1x1x2x64xf32>
    %15 = vector.shape_cast %14 : vector<1x1x2x64xf32> to vector<2x64xf32>
    %16 = vector.shape_cast %13 : vector<2x64xf32> to vector<1x1x2x64xf32>
    tpu.vector_store %arg5[%c0_10, %c0_11, %c0_12, %c0_13], %16 {strides = array<i32>} : memref<1x1x2x64xf32, #tpu.memory_space<vmem>>, vector<1x1x2x64xf32>,
    return
  }
  func.func @transform_0(%arg0: i32, %arg1: i32) -> (i32, i32, i32) {
    %c0_i32 = arith.constant 0 : i32
    %c0_i32_0 = arith.constant 0 : i32
    return %arg0, %arg1, %c0_i32 : i32, i32, i32
  }
  func.func @transform_1(%arg0: i32, %arg1: i32) -> (i32, i32, i32) {
    %c0_i32 = arith.constant 0 : i32
    %c0_i32_0 = arith.constant 0 : i32
    %c0_i32_1 = arith.constant 0 : i32
    return %arg0, %c0_i32, %c0_i32_0 : i32, i32, i32
  }
  func.func @transform_2(%arg0: i32, %arg1: i32) -> (i32, i32, i32) {
    %c0_i32 = arith.constant 0 : i32
    %c0_i32_0 = arith.constant 0 : i32
    return %arg0, %arg1, %c0_i32 : i32, i32, i32
  }
  func.func @transform_3(%arg0: i32, %arg1: i32) -> (i32, i32, i32, i32) {
    %c0_i32 = arith.constant 0 : i32
    %c0_i32_0 = arith.constant 0 : i32
    %c0_i32_1 = arith.constant 0 : i32
    return %arg0, %arg1, %c0_i32, %c0_i32_0 : i32, i32, i32, i32
  }
}

module attributes {stable_mosaic.version = 11 : i64} {
  func.func @_bn_act_kernel(%arg0: i32, %arg1: memref<128x64xf32, #tpu.memory_space<vmem>>, %arg2: memref<1x64xf32, #tpu.memory_space<vmem>>, %arg3: memref<1x64xf32, #tpu.memory_space<vmem>>, %arg4: memref<128x64xbf16, #tpu.memory_space<vmem>>) attributes {dimension_semantics = [#tpu.dimension_semantics<parallel>], iteration_bounds = array<i64: 1>, scalar_prefetch = 0 : i64, scratch_operands = 0 : i64, tpu.core_type = #tpu.core_type<tc>, window_params = [{transform_indices = @transform_0, window_bounds = array<i64: 128, 64>}, {pipeline_mode = #tpu.pipeline_mode<synchronous>, transform_indices = @transform_1, window_bounds = array<i64: 1, 64>}, {pipeline_mode = #tpu.pipeline_mode<synchronous>, transform_indices = @transform_2, window_bounds = array<i64: 1, 64>}, {transform_indices = @transform_3, window_bounds = array<i64: 128, 64>}]} {
    %c0 = arith.constant 0 : index
    %c0_0 = arith.constant 0 : index
    %0 = vector.load %arg1[%c0, %c0_0] : memref<128x64xf32, #tpu.memory_space<vmem>>, vector<128x64xf32>
    %c0_1 = arith.constant 0 : index
    %c0_2 = arith.constant 0 : index
    %1 = vector.load %arg2[%c0_1, %c0_2] : memref<1x64xf32, #tpu.memory_space<vmem>>, vector<1x64xf32>
    %2 = vector.broadcast %1 : vector<1x64xf32> to vector<128x64xf32>
    %3 = arith.mulf %0, %2 : vector<128x64xf32>
    %c0_3 = arith.constant 0 : index
    %c0_4 = arith.constant 0 : index
    %4 = vector.load %arg3[%c0_3, %c0_4] : memref<1x64xf32, #tpu.memory_space<vmem>>, vector<1x64xf32>
    %5 = vector.broadcast %4 : vector<1x64xf32> to vector<128x64xf32>
    %6 = arith.addf %3, %5 : vector<128x64xf32>
    %cst = arith.constant 0.000000e+00 : f32
    %7 = vector.broadcast %cst : f32 to vector<128x64xf32>
    %8 = arith.maximumf %6, %7 : vector<128x64xf32>
    %9 = arith.truncf %8 : vector<128x64xf32> to vector<128x64xbf16>
    %c0_5 = arith.constant 0 : index
    %c0_6 = arith.constant 0 : index
    %10 = vector.load %arg4[%c0_5, %c0_6] : memref<128x64xbf16, #tpu.memory_space<vmem>>, vector<128x64xbf16>
    tpu.vector_store %arg4[%c0_5, %c0_6], %9 {strides = array<i32>} : memref<128x64xbf16, #tpu.memory_space<vmem>>, vector<128x64xbf16>,
    return
  }
  func.func @transform_0(%arg0: i32) -> (i32, i32) {
    %c0_i32 = arith.constant 0 : i32
    %c0_i32_0 = arith.constant 0 : i32
    return %arg0, %c0_i32 : i32, i32
  }
  func.func @transform_1(%arg0: i32) -> (i32, i32) {
    %c0_i32 = arith.constant 0 : i32
    %c0_i32_0 = arith.constant 0 : i32
    %c0_i32_1 = arith.constant 0 : i32
    return %c0_i32, %c0_i32_0 : i32, i32
  }
  func.func @transform_2(%arg0: i32) -> (i32, i32) {
    %c0_i32 = arith.constant 0 : i32
    %c0_i32_0 = arith.constant 0 : i32
    %c0_i32_1 = arith.constant 0 : i32
    return %c0_i32, %c0_i32_0 : i32, i32
  }
  func.func @transform_3(%arg0: i32) -> (i32, i32) {
    %c0_i32 = arith.constant 0 : i32
    %c0_i32_0 = arith.constant 0 : i32
    return %arg0, %c0_i32 : i32, i32
  }
}

module attributes {stable_mosaic.version = 11 : i64} {
  func.func @_gemm_stats_kernel(%arg0: i32, %arg1: i32, %arg2: memref<1x128x256xbf16, #tpu.memory_space<vmem>>, %arg3: memref<1x256x32xbf16, #tpu.memory_space<vmem>>, %arg4: memref<1x128x32xf32, #tpu.memory_space<vmem>>, %arg5: memref<1x1x2x32xf32, #tpu.memory_space<vmem>>) attributes {dimension_semantics = [#tpu.dimension_semantics<parallel>, #tpu.dimension_semantics<parallel>], iteration_bounds = array<i64: 4, 1>, scalar_prefetch = 0 : i64, scratch_operands = 0 : i64, tpu.core_type = #tpu.core_type<tc>, window_params = [{transform_indices = @transform_0, window_bounds = array<i64: 1, 128, 256>}, {transform_indices = @transform_1, window_bounds = array<i64: 1, 256, 32>}, {transform_indices = @transform_2, window_bounds = array<i64: 1, 128, 32>}, {transform_indices = @transform_3, window_bounds = array<i64: 1, 1, 2, 32>}]} {
    %c0 = arith.constant 0 : index
    %c0_0 = arith.constant 0 : index
    %c0_1 = arith.constant 0 : index
    %0 = vector.load %arg2[%c0, %c0_0, %c0_1] : memref<1x128x256xbf16, #tpu.memory_space<vmem>>, vector<1x128x256xbf16>
    %1 = vector.shape_cast %0 : vector<1x128x256xbf16> to vector<128x256xbf16>
    %c0_2 = arith.constant 0 : index
    %c0_3 = arith.constant 0 : index
    %c0_4 = arith.constant 0 : index
    %2 = vector.load %arg3[%c0_2, %c0_3, %c0_4] : memref<1x256x32xbf16, #tpu.memory_space<vmem>>, vector<1x256x32xbf16>
    %3 = vector.shape_cast %2 : vector<1x256x32xbf16> to vector<256x32xbf16>
    %cst = arith.constant dense<0.000000e+00> : vector<128x32xf32>
    %4 = tpu.matmul %1, %3, %cst {dimension_numbers = #tpu.dot_dimension_numbers<[1], [0], [0], [1], [0, 0, 1, 1], [], []>} : vector<128x256xbf16>, vector<256x32xbf16>, vector<128x32xf32> -> vector<128x32xf32>
    %c0_5 = arith.constant 0 : index
    %c0_6 = arith.constant 0 : index
    %c0_7 = arith.constant 0 : index
    %5 = vector.load %arg4[%c0_5, %c0_6, %c0_7] : memref<1x128x32xf32, #tpu.memory_space<vmem>>, vector<1x128x32xf32>
    %6 = vector.shape_cast %5 : vector<1x128x32xf32> to vector<128x32xf32>
    %7 = vector.shape_cast %4 : vector<128x32xf32> to vector<1x128x32xf32>
    tpu.vector_store %arg4[%c0_5, %c0_6, %c0_7], %7 {strides = array<i32>} : memref<1x128x32xf32, #tpu.memory_space<vmem>>, vector<1x128x32xf32>,
    %cst_8 = arith.constant dense<0.000000e+00> : vector<32xf32>
    %8 = vector.multi_reduction <add>, %4, %cst_8 [0] : vector<128x32xf32> to vector<32xf32>
    %9 = vector.shape_cast %8 : vector<32xf32> to vector<1x32xf32>
    %10 = arith.mulf %4, %4 : vector<128x32xf32>
    %cst_9 = arith.constant dense<0.000000e+00> : vector<32xf32>
    %11 = vector.multi_reduction <add>, %10, %cst_9 [0] : vector<128x32xf32> to vector<32xf32>
    %12 = vector.shape_cast %11 : vector<32xf32> to vector<1x32xf32>
    %13 = tpu.concatenate %9, %12 in 0 : vector<1x32xf32>, vector<1x32xf32> -> vector<2x32xf32>
    %c0_10 = arith.constant 0 : index
    %c0_11 = arith.constant 0 : index
    %c0_12 = arith.constant 0 : index
    %c0_13 = arith.constant 0 : index
    %14 = vector.load %arg5[%c0_10, %c0_11, %c0_12, %c0_13] : memref<1x1x2x32xf32, #tpu.memory_space<vmem>>, vector<1x1x2x32xf32>
    %15 = vector.shape_cast %14 : vector<1x1x2x32xf32> to vector<2x32xf32>
    %16 = vector.shape_cast %13 : vector<2x32xf32> to vector<1x1x2x32xf32>
    tpu.vector_store %arg5[%c0_10, %c0_11, %c0_12, %c0_13], %16 {strides = array<i32>} : memref<1x1x2x32xf32, #tpu.memory_space<vmem>>, vector<1x1x2x32xf32>,
    return
  }
  func.func @transform_0(%arg0: i32, %arg1: i32) -> (i32, i32, i32) {
    %c0_i32 = arith.constant 0 : i32
    %c0_i32_0 = arith.constant 0 : i32
    return %arg0, %arg1, %c0_i32 : i32, i32, i32
  }
  func.func @transform_1(%arg0: i32, %arg1: i32) -> (i32, i32, i32) {
    %c0_i32 = arith.constant 0 : i32
    %c0_i32_0 = arith.constant 0 : i32
    %c0_i32_1 = arith.constant 0 : i32
    return %arg0, %c0_i32, %c0_i32_0 : i32, i32, i32
  }
  func.func @transform_2(%arg0: i32, %arg1: i32) -> (i32, i32, i32) {
    %c0_i32 = arith.constant 0 : i32
    %c0_i32_0 = arith.constant 0 : i32
    return %arg0, %arg1, %c0_i32 : i32, i32, i32
  }
  func.func @transform_3(%arg0: i32, %arg1: i32) -> (i32, i32, i32, i32) {
    %c0_i32 = arith.constant 0 : i32
    %c0_i32_0 = arith.constant 0 : i32
    %c0_i32_1 = arith.constant 0 : i32
    return %arg0, %arg1, %c0_i32, %c0_i32_0 : i32, i32, i32, i32
  }
}

module attributes {stable_mosaic.version = 11 : i64} {
  func.func @_bn_act_kernel(%arg0: i32, %arg1: memref<512x32xf32, #tpu.memory_space<vmem>>, %arg2: memref<1x32xf32, #tpu.memory_space<vmem>>, %arg3: memref<1x32xf32, #tpu.memory_space<vmem>>, %arg4: memref<512x32xbf16, #tpu.memory_space<vmem>>) attributes {dimension_semantics = [#tpu.dimension_semantics<parallel>], iteration_bounds = array<i64: 1>, scalar_prefetch = 0 : i64, scratch_operands = 0 : i64, tpu.core_type = #tpu.core_type<tc>, window_params = [{transform_indices = @transform_0, window_bounds = array<i64: 512, 32>}, {pipeline_mode = #tpu.pipeline_mode<synchronous>, transform_indices = @transform_1, window_bounds = array<i64: 1, 32>}, {pipeline_mode = #tpu.pipeline_mode<synchronous>, transform_indices = @transform_2, window_bounds = array<i64: 1, 32>}, {transform_indices = @transform_3, window_bounds = array<i64: 512, 32>}]} {
    %c0 = arith.constant 0 : index
    %c0_0 = arith.constant 0 : index
    %0 = vector.load %arg1[%c0, %c0_0] : memref<512x32xf32, #tpu.memory_space<vmem>>, vector<512x32xf32>
    %c0_1 = arith.constant 0 : index
    %c0_2 = arith.constant 0 : index
    %1 = vector.load %arg2[%c0_1, %c0_2] : memref<1x32xf32, #tpu.memory_space<vmem>>, vector<1x32xf32>
    %2 = vector.broadcast %1 : vector<1x32xf32> to vector<512x32xf32>
    %3 = arith.mulf %0, %2 : vector<512x32xf32>
    %c0_3 = arith.constant 0 : index
    %c0_4 = arith.constant 0 : index
    %4 = vector.load %arg3[%c0_3, %c0_4] : memref<1x32xf32, #tpu.memory_space<vmem>>, vector<1x32xf32>
    %5 = vector.broadcast %4 : vector<1x32xf32> to vector<512x32xf32>
    %6 = arith.addf %3, %5 : vector<512x32xf32>
    %cst = arith.constant 0.000000e+00 : f32
    %7 = vector.broadcast %cst : f32 to vector<512x32xf32>
    %8 = arith.maximumf %6, %7 : vector<512x32xf32>
    %9 = arith.truncf %8 : vector<512x32xf32> to vector<512x32xbf16>
    %c0_5 = arith.constant 0 : index
    %c0_6 = arith.constant 0 : index
    %10 = vector.load %arg4[%c0_5, %c0_6] : memref<512x32xbf16, #tpu.memory_space<vmem>>, vector<512x32xbf16>
    tpu.vector_store %arg4[%c0_5, %c0_6], %9 {strides = array<i32>} : memref<512x32xbf16, #tpu.memory_space<vmem>>, vector<512x32xbf16>,
    return
  }
  func.func @transform_0(%arg0: i32) -> (i32, i32) {
    %c0_i32 = arith.constant 0 : i32
    %c0_i32_0 = arith.constant 0 : i32
    return %arg0, %c0_i32 : i32, i32
  }
  func.func @transform_1(%arg0: i32) -> (i32, i32) {
    %c0_i32 = arith.constant 0 : i32
    %c0_i32_0 = arith.constant 0 : i32
    %c0_i32_1 = arith.constant 0 : i32
    return %c0_i32, %c0_i32_0 : i32, i32
  }
  func.func @transform_2(%arg0: i32) -> (i32, i32) {
    %c0_i32 = arith.constant 0 : i32
    %c0_i32_0 = arith.constant 0 : i32
    %c0_i32_1 = arith.constant 0 : i32
    return %c0_i32, %c0_i32_0 : i32, i32
  }
  func.func @transform_3(%arg0: i32) -> (i32, i32) {
    %c0_i32 = arith.constant 0 : i32
    %c0_i32_0 = arith.constant 0 : i32
    return %arg0, %c0_i32 : i32, i32
  }
}

module attributes {stable_mosaic.version = 11 : i64} {
  func.func @_gemm_stats_kernel(%arg0: i32, %arg1: i32, %arg2: memref<1x512x128xbf16, #tpu.memory_space<vmem>>, %arg3: memref<1x128x16xbf16, #tpu.memory_space<vmem>>, %arg4: memref<1x512x16xf32, #tpu.memory_space<vmem>>, %arg5: memref<1x1x2x16xf32, #tpu.memory_space<vmem>>) attributes {dimension_semantics = [#tpu.dimension_semantics<parallel>, #tpu.dimension_semantics<parallel>], iteration_bounds = array<i64: 4, 1>, scalar_prefetch = 0 : i64, scratch_operands = 0 : i64, tpu.core_type = #tpu.core_type<tc>, window_params = [{transform_indices = @transform_0, window_bounds = array<i64: 1, 512, 128>}, {transform_indices = @transform_1, window_bounds = array<i64: 1, 128, 16>}, {transform_indices = @transform_2, window_bounds = array<i64: 1, 512, 16>}, {transform_indices = @transform_3, window_bounds = array<i64: 1, 1, 2, 16>}]} {
    %c0 = arith.constant 0 : index
    %c0_0 = arith.constant 0 : index
    %c0_1 = arith.constant 0 : index
    %0 = vector.load %arg2[%c0, %c0_0, %c0_1] : memref<1x512x128xbf16, #tpu.memory_space<vmem>>, vector<1x512x128xbf16>
    %1 = vector.shape_cast %0 : vector<1x512x128xbf16> to vector<512x128xbf16>
    %c0_2 = arith.constant 0 : index
    %c0_3 = arith.constant 0 : index
    %c0_4 = arith.constant 0 : index
    %2 = vector.load %arg3[%c0_2, %c0_3, %c0_4] : memref<1x128x16xbf16, #tpu.memory_space<vmem>>, vector<1x128x16xbf16>
    %3 = vector.shape_cast %2 : vector<1x128x16xbf16> to vector<128x16xbf16>
    %cst = arith.constant dense<0.000000e+00> : vector<512x16xf32>
    %4 = tpu.matmul %1, %3, %cst {dimension_numbers = #tpu.dot_dimension_numbers<[1], [0], [0], [1], [0, 0, 1, 1], [], []>} : vector<512x128xbf16>, vector<128x16xbf16>, vector<512x16xf32> -> vector<512x16xf32>
    %c0_5 = arith.constant 0 : index
    %c0_6 = arith.constant 0 : index
    %c0_7 = arith.constant 0 : index
    %5 = vector.load %arg4[%c0_5, %c0_6, %c0_7] : memref<1x512x16xf32, #tpu.memory_space<vmem>>, vector<1x512x16xf32>
    %6 = vector.shape_cast %5 : vector<1x512x16xf32> to vector<512x16xf32>
    %7 = vector.shape_cast %4 : vector<512x16xf32> to vector<1x512x16xf32>
    tpu.vector_store %arg4[%c0_5, %c0_6, %c0_7], %7 {strides = array<i32>} : memref<1x512x16xf32, #tpu.memory_space<vmem>>, vector<1x512x16xf32>,
    %cst_8 = arith.constant dense<0.000000e+00> : vector<16xf32>
    %8 = vector.multi_reduction <add>, %4, %cst_8 [0] : vector<512x16xf32> to vector<16xf32>
    %9 = vector.shape_cast %8 : vector<16xf32> to vector<1x16xf32>
    %10 = arith.mulf %4, %4 : vector<512x16xf32>
    %cst_9 = arith.constant dense<0.000000e+00> : vector<16xf32>
    %11 = vector.multi_reduction <add>, %10, %cst_9 [0] : vector<512x16xf32> to vector<16xf32>
    %12 = vector.shape_cast %11 : vector<16xf32> to vector<1x16xf32>
    %13 = tpu.concatenate %9, %12 in 0 : vector<1x16xf32>, vector<1x16xf32> -> vector<2x16xf32>
    %c0_10 = arith.constant 0 : index
    %c0_11 = arith.constant 0 : index
    %c0_12 = arith.constant 0 : index
    %c0_13 = arith.constant 0 : index
    %14 = vector.load %arg5[%c0_10, %c0_11, %c0_12, %c0_13] : memref<1x1x2x16xf32, #tpu.memory_space<vmem>>, vector<1x1x2x16xf32>
    %15 = vector.shape_cast %14 : vector<1x1x2x16xf32> to vector<2x16xf32>
    %16 = vector.shape_cast %13 : vector<2x16xf32> to vector<1x1x2x16xf32>
    tpu.vector_store %arg5[%c0_10, %c0_11, %c0_12, %c0_13], %16 {strides = array<i32>} : memref<1x1x2x16xf32, #tpu.memory_space<vmem>>, vector<1x1x2x16xf32>,
    return
  }
  func.func @transform_0(%arg0: i32, %arg1: i32) -> (i32, i32, i32) {
    %c0_i32 = arith.constant 0 : i32
    %c0_i32_0 = arith.constant 0 : i32
    return %arg0, %arg1, %c0_i32 : i32, i32, i32
  }
  func.func @transform_1(%arg0: i32, %arg1: i32) -> (i32, i32, i32) {
    %c0_i32 = arith.constant 0 : i32
    %c0_i32_0 = arith.constant 0 : i32
    %c0_i32_1 = arith.constant 0 : i32
    return %arg0, %c0_i32, %c0_i32_0 : i32, i32, i32
  }
  func.func @transform_2(%arg0: i32, %arg1: i32) -> (i32, i32, i32) {
    %c0_i32 = arith.constant 0 : i32
    %c0_i32_0 = arith.constant 0 : i32
    return %arg0, %arg1, %c0_i32 : i32, i32, i32
  }
  func.func @transform_3(%arg0: i32, %arg1: i32) -> (i32, i32, i32, i32) {
    %c0_i32 = arith.constant 0 : i32
    %c0_i32_0 = arith.constant 0 : i32
    %c0_i32_1 = arith.constant 0 : i32
    return %arg0, %arg1, %c0_i32, %c0_i32_0 : i32, i32, i32, i32
  }
}

module attributes {stable_mosaic.version = 11 : i64} {
  func.func @_bn_act_kernel(%arg0: i32, %arg1: memref<1024x16xf32, #tpu.memory_space<vmem>>, %arg2: memref<1x16xf32, #tpu.memory_space<vmem>>, %arg3: memref<1x16xf32, #tpu.memory_space<vmem>>, %arg4: memref<1024x16xbf16, #tpu.memory_space<vmem>>) attributes {dimension_semantics = [#tpu.dimension_semantics<parallel>], iteration_bounds = array<i64: 2>, scalar_prefetch = 0 : i64, scratch_operands = 0 : i64, tpu.core_type = #tpu.core_type<tc>, window_params = [{transform_indices = @transform_0, window_bounds = array<i64: 1024, 16>}, {pipeline_mode = #tpu.pipeline_mode<synchronous>, transform_indices = @transform_1, window_bounds = array<i64: 1, 16>}, {pipeline_mode = #tpu.pipeline_mode<synchronous>, transform_indices = @transform_2, window_bounds = array<i64: 1, 16>}, {transform_indices = @transform_3, window_bounds = array<i64: 1024, 16>}]} {
    %c0 = arith.constant 0 : index
    %c0_0 = arith.constant 0 : index
    %0 = vector.load %arg1[%c0, %c0_0] : memref<1024x16xf32, #tpu.memory_space<vmem>>, vector<1024x16xf32>
    %c0_1 = arith.constant 0 : index
    %c0_2 = arith.constant 0 : index
    %1 = vector.load %arg2[%c0_1, %c0_2] : memref<1x16xf32, #tpu.memory_space<vmem>>, vector<1x16xf32>
    %2 = vector.broadcast %1 : vector<1x16xf32> to vector<1024x16xf32>
    %3 = arith.mulf %0, %2 : vector<1024x16xf32>
    %c0_3 = arith.constant 0 : index
    %c0_4 = arith.constant 0 : index
    %4 = vector.load %arg3[%c0_3, %c0_4] : memref<1x16xf32, #tpu.memory_space<vmem>>, vector<1x16xf32>
    %5 = vector.broadcast %4 : vector<1x16xf32> to vector<1024x16xf32>
    %6 = arith.addf %3, %5 : vector<1024x16xf32>
    %cst = arith.constant 0.000000e+00 : f32
    %7 = vector.broadcast %cst : f32 to vector<1024x16xf32>
    %8 = arith.maximumf %6, %7 : vector<1024x16xf32>
    %9 = arith.truncf %8 : vector<1024x16xf32> to vector<1024x16xbf16>
    %c0_5 = arith.constant 0 : index
    %c0_6 = arith.constant 0 : index
    %10 = vector.load %arg4[%c0_5, %c0_6] : memref<1024x16xbf16, #tpu.memory_space<vmem>>, vector<1024x16xbf16>
    tpu.vector_store %arg4[%c0_5, %c0_6], %9 {strides = array<i32>} : memref<1024x16xbf16, #tpu.memory_space<vmem>>, vector<1024x16xbf16>,
    return
  }
  func.func @transform_0(%arg0: i32) -> (i32, i32) {
    %c0_i32 = arith.constant 0 : i32
    %c0_i32_0 = arith.constant 0 : i32
    return %arg0, %c0_i32 : i32, i32
  }
  func.func @transform_1(%arg0: i32) -> (i32, i32) {
    %c0_i32 = arith.constant 0 : i32
    %c0_i32_0 = arith.constant 0 : i32
    %c0_i32_1 = arith.constant 0 : i32
    return %c0_i32, %c0_i32_0 : i32, i32
  }
  func.func @transform_2(%arg0: i32) -> (i32, i32) {
    %c0_i32 = arith.constant 0 : i32
    %c0_i32_0 = arith.constant 0 : i32
    %c0_i32_1 = arith.constant 0 : i32
    return %c0_i32, %c0_i32_0 : i32, i32
  }
  func.func @transform_3(%arg0: i32) -> (i32, i32) {
    %c0_i32 = arith.constant 0 : i32
    %c0_i32_0 = arith.constant 0 : i32
    return %arg0, %c0_i32 : i32, i32
  }
}

module attributes {stable_mosaic.version = 11 : i64} {
  func.func @_out_bias_tanh_kernel(%arg0: i32, %arg1: i32, %arg2: memref<1x128x512xbf16, #tpu.memory_space<vmem>>, %arg3: memref<1x3x128xbf16, #tpu.memory_space<vmem>>, %arg4: memref<1x3x1xf32, #tpu.memory_space<vmem>>, %arg5: memref<1x3x512xf32, #tpu.memory_space<vmem>>) attributes {dimension_semantics = [#tpu.dimension_semantics<parallel>, #tpu.dimension_semantics<parallel>], iteration_bounds = array<i64: 4, 4>, scalar_prefetch = 0 : i64, scratch_operands = 0 : i64, tpu.core_type = #tpu.core_type<tc>, window_params = [{transform_indices = @transform_0, window_bounds = array<i64: 1, 128, 512>}, {transform_indices = @transform_1, window_bounds = array<i64: 1, 3, 128>}, {pipeline_mode = #tpu.pipeline_mode<synchronous>, transform_indices = @transform_2, window_bounds = array<i64: 1, 3, 1>}, {transform_indices = @transform_3, window_bounds = array<i64: 1, 3, 512>}]} {
    %c0 = arith.constant 0 : index
    %c0_0 = arith.constant 0 : index
    %c0_1 = arith.constant 0 : index
    %0 = vector.load %arg3[%c0, %c0_0, %c0_1] : memref<1x3x128xbf16, #tpu.memory_space<vmem>>, vector<1x3x128xbf16>
    %1 = vector.shape_cast %0 : vector<1x3x128xbf16> to vector<3x128xbf16>
    %c0_2 = arith.constant 0 : index
    %c0_3 = arith.constant 0 : index
    %c0_4 = arith.constant 0 : index
    %2 = vector.load %arg2[%c0_2, %c0_3, %c0_4] : memref<1x128x512xbf16, #tpu.memory_space<vmem>>, vector<1x128x512xbf16>
    %3 = vector.shape_cast %2 : vector<1x128x512xbf16> to vector<128x512xbf16>
    %cst = arith.constant dense<0.000000e+00> : vector<3x512xf32>
    %4 = tpu.matmul %1, %3, %cst {dimension_numbers = #tpu.dot_dimension_numbers<[1], [0], [0], [1], [0, 0, 1, 1], [], []>} : vector<3x128xbf16>, vector<128x512xbf16>, vector<3x512xf32> -> vector<3x512xf32>
    %c0_5 = arith.constant 0 : index
    %c0_6 = arith.constant 0 : index
    %c0_7 = arith.constant 0 : index
    %5 = vector.load %arg4[%c0_5, %c0_6, %c0_7] : memref<1x3x1xf32, #tpu.memory_space<vmem>>, vector<1x3x1xf32>
    %6 = vector.shape_cast %5 : vector<1x3x1xf32> to vector<3x1xf32>
    %7 = vector.broadcast %6 : vector<3x1xf32> to vector<3x512xf32>
    %8 = arith.addf %4, %7 : vector<3x512xf32>
    %9 = math.tanh %8 : vector<3x512xf32>
    %c0_8 = arith.constant 0 : index
    %c0_9 = arith.constant 0 : index
    %c0_10 = arith.constant 0 : index
    %10 = vector.load %arg5[%c0_8, %c0_9, %c0_10] : memref<1x3x512xf32, #tpu.memory_space<vmem>>, vector<1x3x512xf32>
    %11 = vector.shape_cast %10 : vector<1x3x512xf32> to vector<3x512xf32>
    %12 = vector.shape_cast %9 : vector<3x512xf32> to vector<1x3x512xf32>
    tpu.vector_store %arg5[%c0_8, %c0_9, %c0_10], %12 {strides = array<i32>} : memref<1x3x512xf32, #tpu.memory_space<vmem>>, vector<1x3x512xf32>,
    return
  }
  func.func @transform_0(%arg0: i32, %arg1: i32) -> (i32, i32, i32) {
    %c0_i32 = arith.constant 0 : i32
    %c0_i32_0 = arith.constant 0 : i32
    return %arg0, %c0_i32, %arg1 : i32, i32, i32
  }
  func.func @transform_1(%arg0: i32, %arg1: i32) -> (i32, i32, i32) {
    %c0_i32 = arith.constant 0 : i32
    %c0_i32_0 = arith.constant 0 : i32
    %c0_i32_1 = arith.constant 0 : i32
    return %arg0, %c0_i32, %c0_i32_0 : i32, i32, i32
  }
  func.func @transform_2(%arg0: i32, %arg1: i32) -> (i32, i32, i32) {
    %c0_i32 = arith.constant 0 : i32
    %c0_i32_0 = arith.constant 0 : i32
    %c0_i32_1 = arith.constant 0 : i32
    %c0_i32_2 = arith.constant 0 : i32
    return %c0_i32, %c0_i32_0, %c0_i32_1 : i32, i32, i32
  }
  func.func @transform_3(%arg0: i32, %arg1: i32) -> (i32, i32, i32) {
    %c0_i32 = arith.constant 0 : i32
    %c0_i32_0 = arith.constant 0 : i32
    return %arg0, %c0_i32, %arg1 : i32, i32, i32
  }
}

</mosaic_0001>

<bundles_post_ra>
// kernel: generator_forward.10
= control target key start
LH: loop header
LB: loop body
LE: loop exit
PB: predicated region body
PF: predicated region fallthrough
CT: control target
= control target key end

     0   :  { %s107_s0 = inlined_call_operand.vmem [shape: f32[32,128], index: 0, kind: input, shape index: {}]   ;;  %s108_s1 = inlined_call_operand.vmem [shape: f32[1,128], index: 1, kind: input, shape index: {}]   ;;  %s109_s2 = inlined_call_operand.vmem [shape: f32[1,128], index: 2, kind: input, shape index: {}]   ;;  %s110_s3 = inlined_call_operand.vmem [shape: bf16[32,128], index: 3, kind: output, shape index: {}]  }
   0x1   :  { %v14_v0 = vld [vmem:[%s107_s0] sm:$0xff]  ;;  %v15_v1 = vld [vmem:[%s107_s0 + $0x8] sm:$0xff]  ;;  %v16_v4 = vld [vmem:[%s107_s0 + $0x10] sm:$0xff] }
   0x2   :  { %v61_v2 = vld [vmem:[%s108_s1] ss:$0 sm:$0xff]  ;;  %v17_v5 = vld [vmem:[%s107_s0 + $0x18] sm:$0xff] }
   0x3   :  { %v62_v3 = vld [vmem:[%s109_s2] ss:$0 sm:$0xff]  ;;  %v22_v6 = vmul.f32 %v61_v2, %v14_v0  ;;  %v23_v7 = vmul.f32 %v61_v2, %v15_v1  ;;  %v24_v8 = vmul.f32 %v61_v2, %v16_v4  ;;  %v25_v9 = vmul.f32 %v61_v2, %v17_v5 }
   0x5   :  { %v30_v10 = vadd.f32 %v62_v3, %v22_v6  ;;  %v31_v11 = vadd.f32 %v62_v3, %v23_v7  ;;  %v32_v12 = vadd.f32 %v62_v3, %v24_v8  ;;  %v33_v13 = vadd.f32 %v62_v3, %v25_v9 }
   0x7   :  { %v34_v14 = vmax.f32 %v30_v10, 0.0  ;;  %v35_v15 = vmax.f32 %v31_v11, 0.0  ;;  %v36_v16 = vmax.f32 %v32_v12, 0.0  ;;  %v37_v17 = vmax.f32 %v33_v13, 0.0 }
   0x9   :  { %v53_v18 = vpack.c.bf16 %v35_v15, %v34_v14  ;;  %v58_v19 = vpack.c.bf16 %v37_v17, %v36_v16 }
   0xb   :  { %54 = vst [vmem:[%s110_s3] sm:$0xff] %v53_v18  }
   0xc   :  { %60 = vst [vmem:[%s110_s3 + $0x8] sm:$0xff] %v58_v19  }

// kernel: generator_forward.9
= control target key start
LH: loop header
LB: loop body
LE: loop exit
PB: predicated region body
PF: predicated region fallthrough
CT: control target
= control target key end

     0   :  { %vm1018_vm0 = vcmask 1041408   ;;  %vm1020_vm1 = vcmask 1045508   ;;  %vm1022_vm2 = vcmask 1043456   ;;  %vm1281_vm3 = vcmask 1040384   ;;  %s2899_s1 = inlined_call_operand.vmem [shape: bf16[1,128,2048], index: 1, kind: input, shape index: {}]   ;;  %s2900_s0 = inlined_call_operand.vmem [shape: bf16[1,2,128], index: 0, kind: input, shape index: {}]   ;;  %s2901_s2 = inlined_call_operand.vmem [shape: f32[1,2,2048], index: 2, kind: output, shape index: {0}]   ;;  %s2902_s3 = inlined_call_operand.vmem [shape: f32[1,1,2,2048], index: 3, kind: output, shape index: {1}]  }
   0x1   :  { %v1804_v0 = vld [vmem:[%s2899_s1 + $0x380] sm:$0xf]  ;;  %v1978_v2 = vld [vmem:[%s2899_s1 + $0x384] sm:$0xf]  ;;  %v1812_v5 = vld [vmem:[%s2899_s1 + $0x388] sm:$0xf] }
   0x2   :  { %v1986_v1 = vld [vmem:[%s2899_s1 + $0x3bc] sm:$0xf0]  ;;  %v1806_v4 = vld [vmem:[%s2899_s1 + $0x3c0] sm:$0xf0]  ;;  %v1987_v6 = vld [vmem:[%s2899_s1 + $0x3c4] sm:$0xf0] }
   0x3   :  { %v1805_v3 = vor.u32 %v1986_v1, %v1804_v0  ;;  %v1809_v7 = vor.u32 %v1978_v2, %v1806_v4  ;;  %v1813_v8 = vor.u32 %v1987_v6, %v1812_v5  ;;  %v1979_v9 = vld [vmem:[%s2899_s1 + $0x38c] sm:$0xf]  ;;  %v1740_v11 = vld [vmem:[%s2899_s1 + $0x300] sm:$0xf]  ;;  %v1962_v14 = vld [vmem:[%s2899_s1 + $0x304] sm:$0xf] }
   0x4   :  { %v1814_v10 = vld [vmem:[%s2899_s1 + $0x3c8] sm:$0xf0]  ;;  %v1970_v13 = vld [vmem:[%s2899_s1 + $0x33c] sm:$0xf0]  ;;  %v1742_v15 = vld [vmem:[%s2899_s1 + $0x340] sm:$0xf0] }
   0x5   :  { %782 = vmatpush.bf16.msra.mxu0 %v1805_v3  ;;  %v1817_v12 = vor.u32 %v1979_v9, %v1814_v10  ;;  %795 = vmatpush.bf16.msra.mxu1 %v1809_v7  ;;  %v1741_v16 = vor.u32 %v1970_v13, %v1740_v11  ;;  %v1745_v17 = vor.u32 %v1962_v14, %v1742_v15  ;;  %v1748_v18 = vld [vmem:[%s2899_s1 + $0x308] sm:$0xf]  ;;  %v1963_v20 = vld [vmem:[%s2899_s1 + $0x30c] sm:$0xf]  ;;  %v1676_v23 = vld [vmem:[%s2899_s1 + $0x280] sm:$0xf] }
   0x6   :  { %808 = vmatpush.bf16.msra.mxu2 %v1813_v8  ;;  %v1971_v19 = vld [vmem:[%s2899_s1 + $0x344] sm:$0xf0]  ;;  %v1750_v22 = vld [vmem:[%s2899_s1 + $0x348] sm:$0xf0]  ;;  %v1954_v24 = vld [vmem:[%s2899_s1 + $0x2bc] sm:$0xf0] }
   0x7   :  { %821 = vmatpush.bf16.msra.mxu3 %v1817_v12  ;;  %v1749_v21 = vor.u32 %v1971_v19, %v1748_v18  ;;  %v1753_v25 = vor.u32 %v1963_v20, %v1750_v22  ;;  %v1946_v26 = vld [vmem:[%s2899_s1 + $0x284] sm:$0xf]  ;;  %v1684_v28 = vld [vmem:[%s2899_s1 + $0x288] sm:$0xf]  ;;  %v1677_v29 = vor.u32 %v1954_v24, %v1676_v23  ;;  %v1947_v31 = vld [vmem:[%s2899_s1 + $0x28c] sm:$0xf] }
   0x8   :  { %v1678_v27 = vld [vmem:[%s2899_s1 + $0x2c0] sm:$0xf0]  ;;  %v1955_v30 = vld [vmem:[%s2899_s1 + $0x2c4] sm:$0xf0]  ;;  %v1686_v32 = vld [vmem:[%s2899_s1 + $0x2c8] sm:$0xf0] }
   0x9   :  { %783 = vmatpush.bf16.msra.mxu0 %v1741_v16  ;;  %796 = vmatpush.bf16.msra.mxu1 %v1745_v17  ;;  %v1681_v33 = vor.u32 %v1946_v26, %v1678_v27  ;;  %v1685_v34 = vor.u32 %v1955_v30, %v1684_v28  ;;  %v1612_v35 = vld [vmem:[%s2899_s1 + $0x200] sm:$0xf]  ;;  %v1930_v37 = vld [vmem:[%s2899_s1 + $0x204] sm:$0xf]  ;;  %v1689_v38 = vor.u32 %v1947_v31, %v1686_v32  ;;  %v1620_v40 = vld [vmem:[%s2899_s1 + $0x208] sm:$0xf] }
   0xa   :  { %809 = vmatpush.bf16.msra.mxu2 %v1749_v21  ;;  %v1938_v36 = vld [vmem:[%s2899_s1 + $0x23c] sm:$0xf0]  ;;  %v1614_v39 = vld [vmem:[%s2899_s1 + $0x240] sm:$0xf0]  ;;  %v1939_v41 = vld [vmem:[%s2899_s1 + $0x244] sm:$0xf0] }
   0xb   :  { %822 = vmatpush.bf16.msra.mxu3 %v1753_v25  ;;  %v1931_v42 = vld [vmem:[%s2899_s1 + $0x20c] sm:$0xf]  ;;  %v1613_v44 = vor.u32 %v1938_v36, %v1612_v35  ;;  %v1617_v45 = vor.u32 %v1930_v37, %v1614_v39  ;;  %v1621_v46 = vor.u32 %v1939_v41, %v1620_v40  ;;  %v1548_v47 = vld [vmem:[%s2899_s1 + $0x180] sm:$0xf]  ;;  %v1914_v49 = vld [vmem:[%s2899_s1 + $0x184] sm:$0xf] }
   0xc   :  { %v1622_v43 = vld [vmem:[%s2899_s1 + $0x248] sm:$0xf0]  ;;  %v1922_v48 = vld [vmem:[%s2899_s1 + $0x1bc] sm:$0xf0]  ;;  %v1550_v51 = vld [vmem:[%s2899_s1 + $0x1c0] sm:$0xf0] }
   0xd   :  { %784 = vmatpush.bf16.msra.mxu0 %v1677_v29  ;;  %797 = vmatpush.bf16.msra.mxu1 %v1681_v33  ;;  %v1625_v50 = vor.u32 %v1931_v42, %v1622_v43  ;;  %v1556_v52 = vld [vmem:[%s2899_s1 + $0x188] sm:$0xf]  ;;  %v1915_v54 = vld [vmem:[%s2899_s1 + $0x18c] sm:$0xf]  ;;  %v1549_v56 = vor.u32 %v1922_v48, %v1548_v47  ;;  %v1553_v57 = vor.u32 %v1914_v49, %v1550_v51  ;;  %v1484_v59 = vld [vmem:[%s2899_s1 + $0x100] sm:$0xf] }
   0xe   :  { %810 = vmatpush.bf16.msra.mxu2 %v1685_v34  ;;  %v1923_v53 = vld [vmem:[%s2899_s1 + $0x1c4] sm:$0xf0]  ;;  %v1558_v55 = vld [vmem:[%s2899_s1 + $0x1c8] sm:$0xf0]  ;;  %v1906_v60 = vld [vmem:[%s2899_s1 + $0x13c] sm:$0xf0] }
   0xf   :  { %823 = vmatpush.bf16.msra.mxu3 %v1689_v38  ;;  %v1557_v58 = vor.u32 %v1923_v53, %v1556_v52  ;;  %v1898_v61 = vld [vmem:[%s2899_s1 + $0x104] sm:$0xf]  ;;  %v1561_v62 = vor.u32 %v1915_v54, %v1558_v55  ;;  %v1492_v0 = vld [vmem:[%s2899_s1 + $0x108] sm:$0xf]  ;;  %v1899_v2 = vld [vmem:[%s2899_s1 + $0x10c] sm:$0xf]  ;;  %v1485_v4 = vor.u32 %v1906_v60, %v1484_v59 }
  0x10   :  { %v1486_v63 = vld [vmem:[%s2899_s1 + $0x140] sm:$0xf0]  ;;  %v1907_v1 = vld [vmem:[%s2899_s1 + $0x144] sm:$0xf0]  ;;  %v1494_v3 = vld [vmem:[%s2899_s1 + $0x148] sm:$0xf0] }
  0x11   :  { %785 = vmatpush.bf16.msra.mxu0 %v1613_v44  ;;  %798 = vmatpush.bf16.msra.mxu1 %v1617_v45  ;;  %v1489_v5 = vor.u32 %v1898_v61, %v1486_v63  ;;  %v1493_v6 = vor.u32 %v1907_v1, %v1492_v0  ;;  %v1420_v7 = vld [vmem:[%s2899_s1 + $0x80] sm:$0xf]  ;;  %v1882_v9 = vld [vmem:[%s2899_s1 + $0x84] sm:$0xf]  ;;  %v1497_v10 = vor.u32 %v1899_v2, %v1494_v3  ;;  %v1428_v12 = vld [vmem:[%s2899_s1 + $0x88] sm:$0xf] }
  0x12   :  { %811 = vmatpush.bf16.msra.mxu2 %v1621_v46  ;;  %v1890_v8 = vld [vmem:[%s2899_s1 + $0xbc] sm:$0xf0]  ;;  %v1422_v11 = vld [vmem:[%s2899_s1 + $0xc0] sm:$0xf0]  ;;  %v1891_v13 = vld [vmem:[%s2899_s1 + $0xc4] sm:$0xf0] }
  0x13   :  { %824 = vmatpush.bf16.msra.mxu3 %v1625_v50  ;;  %v1883_v14 = vld [vmem:[%s2899_s1 + $0x8c] sm:$0xf]  ;;  %v1421_v16 = vor.u32 %v1890_v8, %v1420_v7  ;;  %v1356_v17 = vld [vmem:[%s2899_s1] sm:$0xf]  ;;  %v1425_v19 = vor.u32 %v1882_v9, %v1422_v11  ;;  %v1429_v20 = vor.u32 %v1891_v13, %v1428_v12  ;;  %v1866_v21 = vld [vmem:[%s2899_s1 + $0x4] sm:$0xf] }
  0x14   :  { %v1430_v15 = vld [vmem:[%s2899_s1 + $0xc8] sm:$0xf0]  ;;  %v1874_v18 = vld [vmem:[%s2899_s1 + $0x3c] sm:$0xf0]  ;;  %v1358_v22 = vld [vmem:[%s2899_s1 + $0x40] sm:$0xf0] }
  0x15   :  { %786 = vmatpush.bf16.msra.mxu0 %v1549_v56  ;;  %799 = vmatpush.bf16.msra.mxu1 %v1553_v57  ;;  %v1364_v23 = vld [vmem:[%s2899_s1 + $0x8] sm:$0xf]  ;;  %v1433_v24 = vor.u32 %v1883_v14, %v1430_v15  ;;  %v1867_v26 = vld [vmem:[%s2899_s1 + $0xc] sm:$0xf]  ;;  %v1820_v28 = vld [vmem:[%s2899_s1 + $0x390] sm:$0xf]  ;;  %v1357_v31 = vor.u32 %v1874_v18, %v1356_v17  ;;  %v1361_v35 = vor.u32 %v1866_v21, %v1358_v22 }
  0x16   :  { %812 = vmatpush.bf16.msra.mxu2 %v1557_v58  ;;  %v1875_v25 = vld [vmem:[%s2899_s1 + $0x44] sm:$0xf0]  ;;  %v1366_v27 = vld [vmem:[%s2899_s1 + $0x48] sm:$0xf0]  ;;  %v1988_v29 = vld [vmem:[%s2899_s1 + $0x3cc] sm:$0xf0] }
  0x17   :  { %825 = vmatpush.bf16.msra.mxu3 %v1561_v62  ;;  %v1980_v30 = vld [vmem:[%s2899_s1 + $0x394] sm:$0xf]  ;;  %v1828_v33 = vld [vmem:[%s2899_s1 + $0x398] sm:$0xf]  ;;  %v1365_v36 = vor.u32 %v1875_v25, %v1364_v23  ;;  %v1981_v37 = vld [vmem:[%s2899_s1 + $0x39c] sm:$0xf]  ;;  %v1369_v39 = vor.u32 %v1867_v26, %v1366_v27  ;;  %v1821_v40 = vor.u32 %v1988_v29, %v1820_v28 }
  0x18   :  { %v1822_v32 = vld [vmem:[%s2899_s1 + $0x3d0] sm:$0xf0]  ;;  %v1989_v34 = vld [vmem:[%s2899_s1 + $0x3d4] sm:$0xf0]  ;;  %v1830_v38 = vld [vmem:[%s2899_s1 + $0x3d8] sm:$0xf0] }
  0x19   :  { %787 = vmatpush.bf16.msra.mxu0 %v1485_v4  ;;  %800 = vmatpush.bf16.msra.mxu1 %v1489_v5  ;;  %v1825_v41 = vor.u32 %v1980_v30, %v1822_v32  ;;  %v1829_v42 = vor.u32 %v1989_v34, %v1828_v33  ;;  %v1756_v43 = vld [vmem:[%s2899_s1 + $0x310] sm:$0xf]  ;;  %v1964_v45 = vld [vmem:[%s2899_s1 + $0x314] sm:$0xf]  ;;  %v1833_v46 = vor.u32 %v1981_v37, %v1830_v38  ;;  %v1764_v48 = vld [vmem:[%s2899_s1 + $0x318] sm:$0xf] }
  0x1a   :  { %813 = vmatpush.bf16.msra.mxu2 %v1493_v6  ;;  %v1972_v44 = vld [vmem:[%s2899_s1 + $0x34c] sm:$0xf0]  ;;  %v1758_v47 = vld [vmem:[%s2899_s1 + $0x350] sm:$0xf0]  ;;  %v1973_v49 = vld [vmem:[%s2899_s1 + $0x354] sm:$0xf0] }
  0x1b   :  { %826 = vmatpush.bf16.msra.mxu3 %v1497_v10  ;;  %v1965_v50 = vld [vmem:[%s2899_s1 + $0x31c] sm:$0xf]  ;;  %v1757_v52 = vor.u32 %v1972_v44, %v1756_v43  ;;  %v1761_v53 = vor.u32 %v1964_v45, %v1758_v47  ;;  %v1765_v54 = vor.u32 %v1973_v49, %v1764_v48  ;;  %v1692_v55 = vld [vmem:[%s2899_s1 + $0x290] sm:$0xf]  ;;  %v1948_v57 = vld [vmem:[%s2899_s1 + $0x294] sm:$0xf] }
  0x1c   :  { %v1766_v51 = vld [vmem:[%s2899_s1 + $0x358] sm:$0xf0]  ;;  %v1956_v56 = vld [vmem:[%s2899_s1 + $0x2cc] sm:$0xf0]  ;;  %v1694_v59 = vld [vmem:[%s2899_s1 + $0x2d0] sm:$0xf0] }
  0x1d   :  { %788 = vmatpush.bf16.msra.mxu0 %v1421_v16  ;;  %801 = vmatpush.bf16.msra.mxu1 %v1425_v19  ;;  %v1769_v58 = vor.u32 %v1965_v50, %v1766_v51  ;;  %v1700_v60 = vld [vmem:[%s2899_s1 + $0x298] sm:$0xf]  ;;  %v1949_v62 = vld [vmem:[%s2899_s1 + $0x29c] sm:$0xf]  ;;  %v1693_v0 = vor.u32 %v1956_v56, %v1692_v55  ;;  %v2281_v1 = vld [vmem:[%s2900_s0] sm:$0x1]  ;;  %v1697_v2 = vor.u32 %v1948_v57, %v1694_v59 }
  0x1e   :  { %814 = vmatpush.bf16.msra.mxu2 %v1429_v20  ;;  %v1957_v61 = vld [vmem:[%s2899_s1 + $0x2d4] sm:$0xf0]  ;;  %v1702_v63 = vld [vmem:[%s2899_s1 + $0x2d8] sm:$0xf0]  ;;  %v1628_v4 = vld [vmem:[%s2899_s1 + $0x210] sm:$0xf] }
  0x1f   :  { %827 = vmatpush.bf16.msra.mxu3 %v1433_v24  ;;  %v1701_v3 = vor.u32 %v1957_v61, %v1700_v60  ;;  %v1940_v5 = vld [vmem:[%s2899_s1 + $0x24c] sm:$0xf0]  ;;  %v1932_v6 = vld [vmem:[%s2899_s1 + $0x214] sm:$0xf]  ;;  %v1705_v7 = vor.u32 %v1949_v62, %v1702_v63  ;;  %v1636_v9 = vld [vmem:[%s2899_s1 + $0x218] sm:$0xf] }
  0x20   :  { %v1630_v8 = vld [vmem:[%s2899_s1 + $0x250] sm:$0xf0]  ;;  %v1941_v10 = vld [vmem:[%s2899_s1 + $0x254] sm:$0xf0]  ;;  %v1933_v11 = vld [vmem:[%s2899_s1 + $0x21c] sm:$0xf]  ;;  %v1629_v13 = vor.u32 %v1940_v5, %v1628_v4 }
  0x21   :  { %789 = vmatpush.bf16.msra.mxu0 %v1357_v31  ;;  %802 = vmatpush.bf16.msra.mxu1 %v1361_v35  ;;  %v1638_v12 = vld [vmem:[%s2899_s1 + $0x258] sm:$0xf0]  ;;  %v1633_v14 = vor.u32 %v1932_v6, %v1630_v8  ;;  %v1637_v15 = vor.u32 %v1941_v10, %v1636_v9  ;;  %v1564_v16 = vld [vmem:[%s2899_s1 + $0x190] sm:$0xf]  ;;  %v1916_v18 = vld [vmem:[%s2899_s1 + $0x194] sm:$0xf] }
  0x22   :  { %815 = vmatpush.bf16.msra.mxu2 %v1365_v36  ;;  %v1924_v17 = vld [vmem:[%s2899_s1 + $0x1cc] sm:$0xf0]  ;;  %v1641_v19 = vor.u32 %v1933_v11, %v1638_v12  ;;  %v1566_v20 = vld [vmem:[%s2899_s1 + $0x1d0] sm:$0xf0]  ;;  %v1572_v21 = vld [vmem:[%s2899_s1 + $0x198] sm:$0xf] }
  0x23   :  { %828 = vmatpush.bf16.msra.mxu3 %v1369_v39  ;;  %v1925_v22 = vld [vmem:[%s2899_s1 + $0x1d4] sm:$0xf0]  ;;  %v1917_v23 = vld [vmem:[%s2899_s1 + $0x19c] sm:$0xf]  ;;  %v1565_v25 = vor.u32 %v1924_v17, %v1564_v16  ;;  %v1569_v26 = vor.u32 %v1916_v18, %v1566_v20  ;;  %v1500_v28 = vld [vmem:[%s2899_s1 + $0x110] sm:$0xf] }
  0x24   :  { %803 = vmatmul.bf16.vlgmr.msra.gmra.mxu1 %v2281_v1  ;;  %790 = vmatmul.bf16.vlgmr.msra.gmra.mxu0 %v2281_v1  ;;  %v1574_v24 = vld [vmem:[%s2899_s1 + $0x1d8] sm:$0xf0]  ;;  %v1573_v27 = vor.u32 %v1925_v22, %v1572_v21  ;;  %v1908_v29 = vld [vmem:[%s2899_s1 + $0x14c] sm:$0xf0]  ;;  %v1900_v30 = vld [vmem:[%s2899_s1 + $0x114] sm:$0xf] }
  0x25   :  { %834 = vmatpush.bf16.msrb.mxu0 %v1821_v40  ;;  %847 = vmatpush.bf16.msrb.mxu1 %v1825_v41  ;;  %v1577_v31 = vor.u32 %v1917_v23, %v1574_v24  ;;  %v1502_v32 = vld [vmem:[%s2899_s1 + $0x150] sm:$0xf0]  ;;  %v1508_v33 = vld [vmem:[%s2899_s1 + $0x118] sm:$0xf]  ;;  %v1901_v35 = vld [vmem:[%s2899_s1 + $0x11c] sm:$0xf]  ;;  %v1501_v37 = vor.u32 %v1908_v29, %v1500_v28 }
  0x26   :  { %860 = vmatpush.bf16.msrb.mxu2 %v1829_v42  ;;  %829 = vmatmul.bf16.vlgmr.msra.gmra.mxu3 %v2281_v1  ;;  %v1909_v34 = vld [vmem:[%s2899_s1 + $0x154] sm:$0xf0]  ;;  %v1510_v36 = vld [vmem:[%s2899_s1 + $0x158] sm:$0xf0]  ;;  %v1505_v38 = vor.u32 %v1900_v30, %v1502_v32  ;;  %v1436_v40 = vld [vmem:[%s2899_s1 + $0x90] sm:$0xf] }
  0x27   :  { %873 = vmatpush.bf16.msrb.mxu3 %v1833_v46  ;;  %816 = vmatmul.bf16.vlgmr.msra.gmra.mxu2 %v2281_v1  ;;  %v1509_v39 = vor.u32 %v1909_v34, %v1508_v33  ;;  %v1892_v41 = vld [vmem:[%s2899_s1 + $0xcc] sm:$0xf0]  ;;  %v1884_v42 = vld [vmem:[%s2899_s1 + $0x94] sm:$0xf]  ;;  %v1513_v43 = vor.u32 %v1901_v35, %v1510_v36  ;;  %v1444_v45 = vld [vmem:[%s2899_s1 + $0x98] sm:$0xf] }
  0x28   :  { %v1438_v44 = vld [vmem:[%s2899_s1 + $0xd0] sm:$0xf0]  ;;  %v1893_v46 = vld [vmem:[%s2899_s1 + $0xd4] sm:$0xf0]  ;;  %v1885_v47 = vld [vmem:[%s2899_s1 + $0x9c] sm:$0xf]  ;;  %v1437_v49 = vor.u32 %v1892_v41, %v1436_v40 }
  0x29   :  { %835 = vmatpush.bf16.msrb.mxu0 %v1757_v52  ;;  %848 = vmatpush.bf16.msrb.mxu1 %v1761_v53  ;;  %v1446_v48 = vld [vmem:[%s2899_s1 + $0xd8] sm:$0xf0]  ;;  %v1372_v50 = vld [vmem:[%s2899_s1 + $0x10] sm:$0xf]  ;;  %v1441_v52 = vor.u32 %v1884_v42, %v1438_v44  ;;  %v1445_v53 = vor.u32 %v1893_v46, %v1444_v45  ;;  %v1374_v55 = vld [vmem:[%s2899_s1 + $0x50] sm:$0xf0] }
  0x2a   :  { %861 = vmatpush.bf16.msrb.mxu2 %v1765_v54  ;;  %v1876_v51 = vld [vmem:[%s2899_s1 + $0x4c] sm:$0xf0]  ;;  %v1868_v54 = vld [vmem:[%s2899_s1 + $0x14] sm:$0xf]  ;;  %v1380_v56 = vld [vmem:[%s2899_s1 + $0x18] sm:$0xf]  ;;  %v1449_v57 = vor.u32 %v1885_v47, %v1446_v48 }
  0x2b   :  { %874 = vmatpush.bf16.msrb.mxu3 %v1769_v58  ;;  %v1877_v58 = vld [vmem:[%s2899_s1 + $0x54] sm:$0xf0]  ;;  %v1869_v59 = vld [vmem:[%s2899_s1 + $0x1c] sm:$0xf]  ;;  %v1836_v61 = vld [vmem:[%s2899_s1 + $0x3a0] sm:$0xf]  ;;  %v1377_v5 = vor.u32 %v1868_v54, %v1374_v55 }
  0x2c   :  { %v1382_v60 = vld [vmem:[%s2899_s1 + $0x58] sm:$0xf0]  ;;  %v1990_v62 = vld [vmem:[%s2899_s1 + $0x3dc] sm:$0xf0]  ;;  %v1982_v63 = vld [vmem:[%s2899_s1 + $0x3a4] sm:$0xf]  ;;  %v1381_v6 = vor.u32 %v1877_v58, %v1380_v56 }
  0x2d   :  { %836 = vmatpush.bf16.msrb.mxu0 %v1693_v0  ;;  %849 = vmatpush.bf16.msrb.mxu1 %v1697_v2  ;;  %v1373_v0 = vor.u32 %v1876_v51, %v1372_v50  ;;  %v1838_v2 = vld [vmem:[%s2899_s1 + $0x3e0] sm:$0xf0]  ;;  %v1991_v4 = vld [vmem:[%s2899_s1 + $0x3e4] sm:$0xf0]  ;;  %v1846_v8 = vld [vmem:[%s2899_s1 + $0x3e8] sm:$0xf0]  ;;  %v1385_v9 = vor.u32 %v1869_v59, %v1382_v60  ;;  %v1837_v10 = vor.u32 %v1990_v62, %v1836_v61 }
  0x2e   :  { %862 = vmatpush.bf16.msrb.mxu2 %v1701_v3  ;;  %v1844_v3 = vld [vmem:[%s2899_s1 + $0x3a8] sm:$0xf]  ;;  %v1841_v11 = vor.u32 %v1982_v63, %v1838_v2  ;;  %v1774_v17 = vld [vmem:[%s2899_s1 + $0x360] sm:$0xf0]  ;;  %v1967_v20 = vld [vmem:[%s2899_s1 + $0x32c] sm:$0xf] }
  0x2f   :  { %875 = vmatpush.bf16.msrb.mxu3 %v1705_v7  ;;  %v1983_v7 = vld [vmem:[%s2899_s1 + $0x3ac] sm:$0xf]  ;;  %v1845_v12 = vor.u32 %v1991_v4, %v1844_v3  ;;  %v1780_v18 = vld [vmem:[%s2899_s1 + $0x328] sm:$0xf]  ;;  %v1710_v29 = vld [vmem:[%s2899_s1 + $0x2e0] sm:$0xf0] }
  0x30   :  { %v1849_v16 = vor.u32 %v1983_v7, %v1846_v8  ;;  %v1782_v21 = vld [vmem:[%s2899_s1 + $0x368] sm:$0xf0]  ;;  %v1716_v30 = vld [vmem:[%s2899_s1 + $0x2a8] sm:$0xf]  ;;  %v1646_v41 = vld [vmem:[%s2899_s1 + $0x260] sm:$0xf0] }
  0x31   :  { %837 = vmatpush.bf16.msrb.mxu0 %v1629_v13  ;;  %850 = vmatpush.bf16.msrb.mxu1 %v1633_v14  ;;  %v1772_v13 = vld [vmem:[%s2899_s1 + $0x320] sm:$0xf]  ;;  %v1785_v28 = vor.u32 %v1967_v20, %v1782_v21  ;;  %v1951_v32 = vld [vmem:[%s2899_s1 + $0x2ac] sm:$0xf]  ;;  %v1652_v42 = vld [vmem:[%s2899_s1 + $0x228] sm:$0xf] }
  0x32   :  { %863 = vmatpush.bf16.msrb.mxu2 %v1637_v15  ;;  %v1974_v14 = vld [vmem:[%s2899_s1 + $0x35c] sm:$0xf0]  ;;  %v1966_v15 = vld [vmem:[%s2899_s1 + $0x324] sm:$0xf]  ;;  %v1718_v33 = vld [vmem:[%s2899_s1 + $0x2e8] sm:$0xf0] }
  0x33   :  { %876 = vmatpush.bf16.msrb.mxu3 %v1641_v19  ;;  %v1975_v19 = vld [vmem:[%s2899_s1 + $0x364] sm:$0xf0]  ;;  %v1773_v22 = vor.u32 %v1974_v14, %v1772_v13  ;;  %v1777_v23 = vor.u32 %v1966_v15, %v1774_v17  ;;  %v1721_v40 = vor.u32 %v1951_v32, %v1718_v33  ;;  %v1935_v44 = vld [vmem:[%s2899_s1 + $0x22c] sm:$0xf]  ;;  %v1926_v50 = vld [vmem:[%s2899_s1 + $0x1dc] sm:$0xf0] }
  0x34   :  { %v1781_v24 = vor.u32 %v1975_v19, %v1780_v18  ;;  %v1654_v45 = vld [vmem:[%s2899_s1 + $0x268] sm:$0xf0]  ;;  %v1918_v51 = vld [vmem:[%s2899_s1 + $0x1a4] sm:$0xf]  ;;  %v1588_v54 = vld [vmem:[%s2899_s1 + $0x1a8] sm:$0xf] }
  0x35   :  { %838 = vmatpush.bf16.msrb.mxu0 %v1565_v25  ;;  %851 = vmatpush.bf16.msrb.mxu1 %v1569_v26  ;;  %v1708_v25 = vld [vmem:[%s2899_s1 + $0x2a0] sm:$0xf]  ;;  %v1927_v55 = vld [vmem:[%s2899_s1 + $0x1e4] sm:$0xf0]  ;;  %v1919_v56 = vld [vmem:[%s2899_s1 + $0x1ac] sm:$0xf] }
  0x36   :  { %864 = vmatpush.bf16.msrb.mxu2 %v1573_v27  ;;  %v1958_v26 = vld [vmem:[%s2899_s1 + $0x2dc] sm:$0xf0]  ;;  %v1950_v27 = vld [vmem:[%s2899_s1 + $0x2a4] sm:$0xf]  ;;  %v1589_v60 = vor.u32 %v1927_v55, %v1588_v54  ;;  %v1524_v3 = vld [vmem:[%s2899_s1 + $0x128] sm:$0xf] }
  0x37   :  { %877 = vmatpush.bf16.msrb.mxu3 %v1577_v31  ;;  %v1959_v31 = vld [vmem:[%s2899_s1 + $0x2e4] sm:$0xf0]  ;;  %v1709_v34 = vor.u32 %v1958_v26, %v1708_v25  ;;  %v1713_v35 = vor.u32 %v1950_v27, %v1710_v29  ;;  %v1516_v61 = vld [vmem:[%s2899_s1 + $0x120] sm:$0xf]  ;;  %v1902_v63 = vld [vmem:[%s2899_s1 + $0x124] sm:$0xf] }
  0x38   :  { %v1717_v36 = vor.u32 %v1959_v31, %v1716_v30  ;;  %v1910_v62 = vld [vmem:[%s2899_s1 + $0x15c] sm:$0xf0]  ;;  %v1518_v2 = vld [vmem:[%s2899_s1 + $0x160] sm:$0xf0]  ;;  %v1911_v4 = vld [vmem:[%s2899_s1 + $0x164] sm:$0xf0] }
  0x39   :  { %839 = vmatpush.bf16.msrb.mxu0 %v1501_v37  ;;  %852 = vmatpush.bf16.msrb.mxu1 %v1505_v38  ;;  %v1644_v37 = vld [vmem:[%s2899_s1 + $0x220] sm:$0xf]  ;;  %v1517_v7 = vor.u32 %v1910_v62, %v1516_v61  ;;  %v1521_v8 = vor.u32 %v1902_v63, %v1518_v2  ;;  %v1454_v14 = vld [vmem:[%s2899_s1 + $0xe0] sm:$0xf0]  ;;  %v1460_v15 = vld [vmem:[%s2899_s1 + $0xa8] sm:$0xf] }
  0x3a   :  { %865 = vmatpush.bf16.msrb.mxu2 %v1509_v39  ;;  %v1942_v38 = vld [vmem:[%s2899_s1 + $0x25c] sm:$0xf0]  ;;  %v1934_v39 = vld [vmem:[%s2899_s1 + $0x224] sm:$0xf]  ;;  %v1887_v17 = vld [vmem:[%s2899_s1 + $0xac] sm:$0xf] }
  0x3b   :  { %878 = vmatpush.bf16.msrb.mxu3 %v1513_v43  ;;  %v1943_v43 = vld [vmem:[%s2899_s1 + $0x264] sm:$0xf0]  ;;  %v1645_v46 = vor.u32 %v1942_v38, %v1644_v37  ;;  %v1649_v47 = vor.u32 %v1934_v39, %v1646_v41  ;;  %v1462_v18 = vld [vmem:[%s2899_s1 + $0xe8] sm:$0xf0]  ;;  %v1388_v20 = vld [vmem:[%s2899_s1 + $0x20] sm:$0xf] }
  0x3c   :  { %v1653_v48 = vor.u32 %v1943_v43, %v1652_v42  ;;  %v1878_v21 = vld [vmem:[%s2899_s1 + $0x5c] sm:$0xf0]  ;;  %v1390_v25 = vld [vmem:[%s2899_s1 + $0x60] sm:$0xf0]  ;;  %v1396_v26 = vld [vmem:[%s2899_s1 + $0x28] sm:$0xf]  ;;  %v1465_v27 = vor.u32 %v1887_v17, %v1462_v18 }
  0x3d   :  { %840 = vmatpush.bf16.msrb.mxu0 %v1437_v49  ;;  %853 = vmatpush.bf16.msrb.mxu1 %v1441_v52  ;;  %v1580_v49 = vld [vmem:[%s2899_s1 + $0x1a0] sm:$0xf]  ;;  %v1657_v52 = vor.u32 %v1935_v44, %v1654_v45  ;;  %v1871_v29 = vld [vmem:[%s2899_s1 + $0x2c] sm:$0xf]  ;;  %v1852_v31 = vld [vmem:[%s2899_s1 + $0x3b0] sm:$0xf] }
  0x3e   :  { %866 = vmatpush.bf16.msrb.mxu2 %v1445_v53  ;;  %v1582_v53 = vld [vmem:[%s2899_s1 + $0x1e0] sm:$0xf0]  ;;  %v1581_v58 = vor.u32 %v1926_v50, %v1580_v49  ;;  %v1398_v30 = vld [vmem:[%s2899_s1 + $0x68] sm:$0xf0]  ;;  %v1992_v32 = vld [vmem:[%s2899_s1 + $0x3ec] sm:$0xf0] }
  0x3f   :  { %879 = vmatpush.bf16.msrb.mxu3 %v1449_v57  ;;  %v1590_v57 = vld [vmem:[%s2899_s1 + $0x1e8] sm:$0xf0]  ;;  %v1585_v59 = vor.u32 %v1918_v51, %v1582_v53  ;;  %v1984_v33 = vld [vmem:[%s2899_s1 + $0x3b4] sm:$0xf]  ;;  %v1993_v37 = vld [vmem:[%s2899_s1 + $0x3f4] sm:$0xf0]  ;;  %v1401_v42 = vor.u32 %v1871_v29, %v1398_v30  ;;  %v1853_v43 = vor.u32 %v1992_v32, %v1852_v31 }
  0x40   :  { %v1862_v41 = vld [vmem:[%s2899_s1 + $0x3f8] sm:$0xf0]  ;;  %v1790_v50 = vld [vmem:[%s2899_s1 + $0x370] sm:$0xf0]  ;;  %v1796_v51 = vld [vmem:[%s2899_s1 + $0x338] sm:$0xf] }
  0x41   :  { %841 = vmatpush.bf16.msrb.mxu0 %v1373_v0  ;;  %854 = vmatpush.bf16.msrb.mxu1 %v1377_v5  ;;  %v1593_v0 = vor.u32 %v1919_v56, %v1590_v57  ;;  %v1903_v5 = vld [vmem:[%s2899_s1 + $0x12c] sm:$0xf]  ;;  %v1969_v53 = vld [vmem:[%s2899_s1 + $0x33c] sm:$0xf]  ;;  %v1726_v62 = vld [vmem:[%s2899_s1 + $0x2f0] sm:$0xf0] }
  0x42   :  { %867 = vmatpush.bf16.msrb.mxu2 %v1381_v6  ;;  %v1526_v6 = vld [vmem:[%s2899_s1 + $0x168] sm:$0xf0]  ;;  %v1798_v54 = vld [vmem:[%s2899_s1 + $0x378] sm:$0xf0]  ;;  %v1732_v63 = vld [vmem:[%s2899_s1 + $0x2b8] sm:$0xf] }
  0x43   :  { %880 = vmatpush.bf16.msrb.mxu3 %v1385_v9  ;;  %v1525_v9 = vor.u32 %v1911_v4, %v1524_v3  ;;  %v1529_v13 = vor.u32 %v1903_v5, %v1526_v6  ;;  %v1801_v61 = vor.u32 %v1969_v53, %v1798_v54  ;;  %v1953_v2 = vld [vmem:[%s2899_s1 + $0x2bc] sm:$0xf]  ;;  %v1532_v31 = vld [vmem:[%s2899_s1 + $0x130] sm:$0xf] }
  0x44   :  { %855 = vmatmul.bf16.vlgmr.msrb.gmra.mxu1 %v2281_v1  ;;  %842 = vmatmul.bf16.vlgmr.msrb.gmra.mxu0 %v2281_v1  ;;  %v1734_v3 = vld [vmem:[%s2899_s1 + $0x2f8] sm:$0xf0]  ;;  %v1912_v32 = vld [vmem:[%s2899_s1 + $0x16c] sm:$0xf0] }
  0x45   :  { %886 = vmatpush.bf16.msra.mxu0 %v1837_v10  ;;  %899 = vmatpush.bf16.msra.mxu1 %v1841_v11  ;;  %v1452_v10 = vld [vmem:[%s2899_s1 + $0xa0] sm:$0xf] }
  0x46   :  { %912 = vmatpush.bf16.msra.mxu2 %v1845_v12  ;;  %881 = vmatmul.bf16.vlgmr.msrb.gmra.mxu3 %v2281_v1  ;;  %v1894_v11 = vld [vmem:[%s2899_s1 + $0xdc] sm:$0xf0]  ;;  %v1886_v12 = vld [vmem:[%s2899_s1 + $0xa4] sm:$0xf] }
  0x47   :  { %925 = vmatpush.bf16.msra.mxu3 %v1849_v16  ;;  %868 = vmatmul.bf16.vlgmr.msrb.gmra.mxu2 %v2281_v1  ;;  %v1895_v16 = vld [vmem:[%s2899_s1 + $0xe4] sm:$0xf0]  ;;  %v1453_v19 = vor.u32 %v1894_v11, %v1452_v10  ;;  %v1737_v10 = vor.u32 %v1953_v2, %v1734_v3  ;;  %v1662_v11 = vld [vmem:[%s2899_s1 + $0x270] sm:$0xf0] }
  0x49   :  { %887 = vmatpush.bf16.msra.mxu0 %v1773_v22  ;;  %900 = vmatpush.bf16.msra.mxu1 %v1777_v23  ;;  %v1457_v22 = vor.u32 %v1886_v12, %v1454_v14  ;;  %v1461_v23 = vor.u32 %v1895_v16, %v1460_v15  ;;  %v1668_v12 = vld [vmem:[%s2899_s1 + $0x238] sm:$0xf]  ;;  %v1937_v14 = vld [vmem:[%s2899_s1 + $0x23c] sm:$0xf] }
  0x4a   :  { %913 = vmatpush.bf16.msra.mxu2 %v1781_v24  ;;  %v1870_v24 = vld [vmem:[%s2899_s1 + $0x24] sm:$0xf]  ;;  %v1670_v15 = vld [vmem:[%s2899_s1 + $0x278] sm:$0xf0] }
  0x4b   :  { %926 = vmatpush.bf16.msra.mxu3 %v1785_v28  ;;  %v1879_v28 = vld [vmem:[%s2899_s1 + $0x64] sm:$0xf0]  ;;  %v1393_v38 = vor.u32 %v1870_v24, %v1390_v25  ;;  %v1604_v24 = vld [vmem:[%s2899_s1 + $0x1b8] sm:$0xf] }
  0x4c   :  { %v1397_v39 = vor.u32 %v1879_v28, %v1396_v26  ;;  %v1929_v25 = vld [vmem:[%s2899_s1 + $0x1f4] sm:$0xf0]  ;;  %v1921_v26 = vld [vmem:[%s2899_s1 + $0x1bc] sm:$0xf] }
  0x4d   :  { %888 = vmatpush.bf16.msra.mxu0 %v1709_v34  ;;  %901 = vmatpush.bf16.msra.mxu1 %v1713_v35  ;;  %v1389_v34 = vor.u32 %v1878_v21, %v1388_v20  ;;  %v1854_v35 = vld [vmem:[%s2899_s1 + $0x3f0] sm:$0xf0]  ;;  %v1928_v20 = vld [vmem:[%s2899_s1 + $0x1ec] sm:$0xf0]  ;;  %v1605_v30 = vor.u32 %v1929_v25, %v1604_v24 }
  0x4e   :  { %914 = vmatpush.bf16.msra.mxu2 %v1717_v36  ;;  %v1860_v36 = vld [vmem:[%s2899_s1 + $0x3b8] sm:$0xf]  ;;  %v1857_v44 = vor.u32 %v1984_v33, %v1854_v35  ;;  %v1920_v21 = vld [vmem:[%s2899_s1 + $0x1b4] sm:$0xf] }
  0x4f   :  { %927 = vmatpush.bf16.msra.mxu3 %v1721_v40  ;;  %v1985_v40 = vld [vmem:[%s2899_s1 + $0x3bc] sm:$0xf]  ;;  %v1861_v45 = vor.u32 %v1993_v37, %v1860_v36  ;;  %v1904_v33 = vld [vmem:[%s2899_s1 + $0x134] sm:$0xf]  ;;  %v1540_v36 = vld [vmem:[%s2899_s1 + $0x138] sm:$0xf] }
  0x50   :  { %v1865_v49 = vor.u32 %v1985_v40, %v1862_v41  ;;  %v1534_v35 = vld [vmem:[%s2899_s1 + $0x170] sm:$0xf0]  ;;  %v1913_v37 = vld [vmem:[%s2899_s1 + $0x174] sm:$0xf0]  ;;  %v1533_v40 = vor.u32 %v1912_v32, %v1532_v31 }
  0x51   :  { %889 = vmatpush.bf16.msra.mxu0 %v1645_v46  ;;  %902 = vmatpush.bf16.msra.mxu1 %v1649_v47  ;;  %v1788_v46 = vld [vmem:[%s2899_s1 + $0x330] sm:$0xf]  ;;  %v1537_v41 = vor.u32 %v1904_v33, %v1534_v35 }
  0x52   :  { %915 = vmatpush.bf16.msra.mxu2 %v1653_v48  ;;  %v1976_v47 = vld [vmem:[%s2899_s1 + $0x36c] sm:$0xf0]  ;;  %v1968_v48 = vld [vmem:[%s2899_s1 + $0x334] sm:$0xf] }
  0x53   :  { %928 = vmatpush.bf16.msra.mxu3 %v1657_v52  ;;  %v1977_v52 = vld [vmem:[%s2899_s1 + $0x374] sm:$0xf0]  ;;  %v1789_v55 = vor.u32 %v1976_v47, %v1788_v46  ;;  %v1793_v56 = vor.u32 %v1968_v48, %v1790_v50  ;;  %v1470_v47 = vld [vmem:[%s2899_s1 + $0xf0] sm:$0xf0]  ;;  %v1889_v50 = vld [vmem:[%s2899_s1 + $0xbc] sm:$0xf] }
  0x54   :  { %v1797_v57 = vor.u32 %v1977_v52, %v1796_v51  ;;  %v1476_v48 = vld [vmem:[%s2899_s1 + $0xb8] sm:$0xf]  ;;  %v1478_v51 = vld [vmem:[%s2899_s1 + $0xf8] sm:$0xf0] }
  0x55   :  { %890 = vmatpush.bf16.msra.mxu0 %v1581_v58  ;;  %903 = vmatpush.bf16.msra.mxu1 %v1585_v59  ;;  %v1724_v58 = vld [vmem:[%s2899_s1 + $0x2b0] sm:$0xf] }
  0x56   :  { %916 = vmatpush.bf16.msra.mxu2 %v1589_v60  ;;  %v1960_v59 = vld [vmem:[%s2899_s1 + $0x2ec] sm:$0xf0]  ;;  %v1952_v60 = vld [vmem:[%s2899_s1 + $0x2b4] sm:$0xf] }
  0x57   :  { %929 = vmatpush.bf16.msra.mxu3 %v1593_v0  ;;  %v1961_v0 = vld [vmem:[%s2899_s1 + $0x2f4] sm:$0xf0]  ;;  %v1725_v4 = vor.u32 %v1960_v59, %v1724_v58  ;;  %v1729_v5 = vor.u32 %v1952_v60, %v1726_v62  ;;  %v1481_v58 = vor.u32 %v1889_v50, %v1478_v51  ;;  %v1406_v59 = vld [vmem:[%s2899_s1 + $0x70] sm:$0xf0]  ;;  %v1873_v62 = vld [vmem:[%s2899_s1 + $0x3c] sm:$0xf] }
  0x58   :  { %v1733_v6 = vor.u32 %v1961_v0, %v1732_v63  ;;  %v1412_v60 = vld [vmem:[%s2899_s1 + $0x38] sm:$0xf]  ;;  %v1414_v63 = vld [vmem:[%s2899_s1 + $0x78] sm:$0xf0] }
  0x59   :  { %891 = vmatpush.bf16.msra.mxu0 %v1517_v7  ;;  %904 = vmatpush.bf16.msra.mxu1 %v1521_v8  ;;  %v1660_v7 = vld [vmem:[%s2899_s1 + $0x230] sm:$0xf] }
  0x5a   :  { %917 = vmatpush.bf16.msra.mxu2 %v1525_v9  ;;  %v1944_v8 = vld [vmem:[%s2899_s1 + $0x26c] sm:$0xf0]  ;;  %v1936_v9 = vld [vmem:[%s2899_s1 + $0x234] sm:$0xf] }
  0x5b   :  { %930 = vmatpush.bf16.msra.mxu3 %v1529_v13  ;;  %v1945_v13 = vld [vmem:[%s2899_s1 + $0x274] sm:$0xf0]  ;;  %v1661_v16 = vor.u32 %v1944_v8, %v1660_v7  ;;  %v1665_v17 = vor.u32 %v1936_v9, %v1662_v11 }
  0x5c   :  { %v1669_v18 = vor.u32 %v1945_v13, %v1668_v12 }
  0x5d   :  { %892 = vmatpush.bf16.msra.mxu0 %v1453_v19  ;;  %905 = vmatpush.bf16.msra.mxu1 %v1457_v22  ;;  %v1596_v19 = vld [vmem:[%s2899_s1 + $0x1b0] sm:$0xf]  ;;  %v1673_v22 = vor.u32 %v1937_v14, %v1670_v15 }
  0x5e   :  { %918 = vmatpush.bf16.msra.mxu2 %v1461_v23  ;;  %v1598_v23 = vld [vmem:[%s2899_s1 + $0x1f0] sm:$0xf0]  ;;  %v1597_v28 = vor.u32 %v1928_v20, %v1596_v19 }
  0x5f   :  { %931 = vmatpush.bf16.msra.mxu3 %v1465_v27  ;;  %v1606_v27 = vld [vmem:[%s2899_s1 + $0x1f8] sm:$0xf0]  ;;  %v1601_v29 = vor.u32 %v1920_v21, %v1598_v23 }
  0x61   :  { %893 = vmatpush.bf16.msra.mxu0 %v1389_v34  ;;  %906 = vmatpush.bf16.msra.mxu1 %v1393_v38  ;;  %v1609_v34 = vor.u32 %v1921_v26, %v1606_v27  ;;  %v1905_v38 = vld [vmem:[%s2899_s1 + $0x13c] sm:$0xf] }
  0x62   :  { %919 = vmatpush.bf16.msra.mxu2 %v1397_v39  ;;  %v1542_v39 = vld [vmem:[%s2899_s1 + $0x178] sm:$0xf0] }
  0x63   :  { %932 = vmatpush.bf16.msra.mxu3 %v1401_v42  ;;  %v1541_v42 = vor.u32 %v1913_v37, %v1540_v36  ;;  %v1545_v46 = vor.u32 %v1905_v38, %v1542_v39 }
  0x64   :  { %907 = vmatmul.bf16.vlgmr.msra.gmra.mxu1 %v2281_v1  ;;  %894 = vmatmul.bf16.vlgmr.msra.gmra.mxu0 %v2281_v1 }
  0x65   :  { %938 = vmatpush.bf16.msrb.mxu0 %v1853_v43  ;;  %951 = vmatpush.bf16.msrb.mxu1 %v1857_v44  ;;  %v1468_v43 = vld [vmem:[%s2899_s1 + $0xb0] sm:$0xf] }
  0x66   :  { %964 = vmatpush.bf16.msrb.mxu2 %v1861_v45  ;;  %933 = vmatmul.bf16.vlgmr.msra.gmra.mxu3 %v2281_v1  ;;  %v1896_v44 = vld [vmem:[%s2899_s1 + $0xec] sm:$0xf0]  ;;  %v1888_v45 = vld [vmem:[%s2899_s1 + $0xb4] sm:$0xf] }
  0x67   :  { %977 = vmatpush.bf16.msrb.mxu3 %v1865_v49  ;;  %920 = vmatmul.bf16.vlgmr.msra.gmra.mxu2 %v2281_v1  ;;  %v1897_v49 = vld [vmem:[%s2899_s1 + $0xf4] sm:$0xf0]  ;;  %v1469_v52 = vor.u32 %v1896_v44, %v1468_v43  ;;  %v1473_v53 = vor.u32 %v1888_v45, %v1470_v47 }
  0x68   :  { %v1477_v54 = vor.u32 %v1897_v49, %v1476_v48 }
  0x69   :  { %939 = vmatpush.bf16.msrb.mxu0 %v1789_v55  ;;  %952 = vmatpush.bf16.msrb.mxu1 %v1793_v56  ;;  %v1404_v55 = vld [vmem:[%s2899_s1 + $0x30] sm:$0xf] }
  0x6a   :  { %965 = vmatpush.bf16.msrb.mxu2 %v1797_v57  ;;  %v1880_v56 = vld [vmem:[%s2899_s1 + $0x6c] sm:$0xf0]  ;;  %v1872_v57 = vld [vmem:[%s2899_s1 + $0x34] sm:$0xf] }
  0x6b   :  { %978 = vmatpush.bf16.msrb.mxu3 %v1801_v61  ;;  %v1881_v61 = vld [vmem:[%s2899_s1 + $0x74] sm:$0xf0]  ;;  %v1405_v0 = vor.u32 %v1880_v56, %v1404_v55  ;;  %v1409_v2 = vor.u32 %v1872_v57, %v1406_v59 }
  0x6c   :  { %v1413_v3 = vor.u32 %v1881_v61, %v1412_v60 }
  0x6d   :  { %940 = vmatpush.bf16.msrb.mxu0 %v1725_v4  ;;  %953 = vmatpush.bf16.msrb.mxu1 %v1729_v5  ;;  %v1417_v4 = vor.u32 %v1873_v62, %v1414_v63 }
  0x6e   :  { %966 = vmatpush.bf16.msrb.mxu2 %v1733_v6 }
  0x6f   :  { %979 = vmatpush.bf16.msrb.mxu3 %v1737_v10 }
  0x71   :  { %941 = vmatpush.bf16.msrb.mxu0 %v1661_v16  ;;  %954 = vmatpush.bf16.msrb.mxu1 %v1665_v17 }
  0x72   :  { %967 = vmatpush.bf16.msrb.mxu2 %v1669_v18 }
  0x73   :  { %980 = vmatpush.bf16.msrb.mxu3 %v1673_v22 }
  0x75   :  { %942 = vmatpush.bf16.msrb.mxu0 %v1597_v28  ;;  %955 = vmatpush.bf16.msrb.mxu1 %v1601_v29 }
  0x76   :  { %968 = vmatpush.bf16.msrb.mxu2 %v1605_v30 }
  0x77   :  { %981 = vmatpush.bf16.msrb.mxu3 %v1609_v34 }
  0x79   :  { %943 = vmatpush.bf16.msrb.mxu0 %v1533_v40  ;;  %956 = vmatpush.bf16.msrb.mxu1 %v1537_v41 }
  0x7a   :  { %969 = vmatpush.bf16.msrb.mxu2 %v1541_v42 }
  0x7b   :  { %982 = vmatpush.bf16.msrb.mxu3 %v1545_v46 }
  0x7d   :  { %944 = vmatpush.bf16.msrb.mxu0 %v1469_v52  ;;  %957 = vmatpush.bf16.msrb.mxu1 %v1473_v53 }
  0x7e   :  { %970 = vmatpush.bf16.msrb.mxu2 %v1477_v54 }
  0x7f   :  { %983 = vmatpush.bf16.msrb.mxu3 %v1481_v58 }
  0x81   :  { %945 = vmatpush.bf16.msrb.mxu0 %v1405_v0  ;;  %958 = vmatpush.bf16.msrb.mxu1 %v1409_v2 }
  0x82   :  { %971 = vmatpush.bf16.msrb.mxu2 %v1413_v3 }
  0x83   :  { %984 = vmatpush.bf16.msrb.mxu3 %v1417_v4 }
  0x84   :  { %946 = vmatmul.bf16.vlgmr.msrb.gmra.mxu0 %v2281_v1  ;;  %959 = vmatmul.bf16.vlgmr.msrb.gmra.mxu1 %v2281_v1 }
  0x85   :  { %972 = vmatmul.bf16.vlgmr.msrb.gmra.mxu2 %v2281_v1 }
  0x86   :  { %985 = vmatmul.bf16.vlgmr.msrb.gmra.mxu3 %v2281_v1 }
  0xa1   :  { %v804_v5 = vpop.f32.mrf.mxu1  ;;  %v791_v11 = vpop.f32.mrf.mxu0 }
  0xa2   :  { %v1006_v6 = vrot.slane %v804_v5, 6  ;;  %v1048_v7 = vsel %vm1018_vm0, %v804_v5, 0.0  ;;  %v1154_v8 = vmul.f32 %v804_v5, %v804_v5  ;;  %v1041_v14 = vsel %vm1018_vm0, %v791_v11, 0.0 }
  0xa3   :  { %v1049_v9 = vrot.slane %v1048_v7, 4  ;;  %v1042_v1 = vrot.slane %v1041_v14, 4  ;;  %v1153_v17 = vmul.f32 %v791_v11, %v791_v11 }
  0xa4   :  { %v1176_v10 = vsel %vm1018_vm0, %v1154_v8, 0.0  ;;  %v1019_v16 = vsel %vm1018_vm0, %v791_v11, %v1006_v6 }
  0xa5   :  { %v1050_v12 = vadd.f32 %v1049_v9, %v1048_v7  ;;  %v1177_v13 = vrot.slane %v1176_v10, 4  ;;  %v1043_v35 = vadd.f32 %v1042_v1, %v1041_v14  ;;  %v1169_v50 = vsel %vm1018_vm0, %v1153_v17, 0.0 }
  0xa6   :  { %v1170_v55 = vrot.slane %v1169_v50, 4 }
  0xa7   :  { %v1051_v18 = vrot.slane %v1050_v12, 2  ;;  %v1178_v19 = vadd.f32 %v1177_v13, %v1176_v10  ;;  %v1044_v42 = vrot.slane %v1043_v35, 2 }
  0xa8   :  { %v1171_v62 = vadd.f32 %v1170_v55, %v1169_v50 }
  0xa9   :  { %v830_v22 = vpop.f32.mrf.mxu3  ;;  %v1052_v27 = vadd.f32 %v1051_v18, %v1050_v12  ;;  %v1179_v28 = vrot.slane %v1178_v19, 2  ;;  %v806_v31 = vpop.f32.mrf.mxu1  ;;  %v1045_v54 = vadd.f32 %v1044_v42, %v1043_v35 }
  0xaa   :  { %v817_v15 = vpop.f32.mrf.mxu2  ;;  %v1008_v25 = vrot.slane %v830_v22, 2  ;;  %v1062_v26 = vsel %vm1018_vm0, %v830_v22, 0.0  ;;  %v1156_v30 = vmul.f32 %v830_v22, %v830_v22  ;;  %v793_v43 = vpop.f32.mrf.mxu0  ;;  %v1172_v5 = vrot.slane %v1171_v62, 2 }
  0xab   :  { %v1007_v20 = vrot.slane %v817_v15, 4  ;;  %v1055_v21 = vsel %vm1018_vm0, %v817_v15, 0.0  ;;  %v1155_v24 = vmul.f32 %v817_v15, %v817_v15  ;;  %v1063_v29 = vrot.slane %v1062_v26, 4 }
  0xac   :  { %v1056_v23 = vrot.slane %v1055_v21, 4  ;;  %v1180_v36 = vadd.f32 %v1179_v28, %v1178_v19  ;;  %v1190_v40 = vsel %vm1018_vm0, %v1156_v30, 0.0  ;;  %v1053_v44 = vrot.slane %v1052_v27, 1 }
  0xad   :  { %v1183_v33 = vsel %vm1018_vm0, %v1155_v24, 0.0  ;;  %v1021_v34 = vsel %vm1020_vm1, %v1007_v20, %v1008_v25  ;;  %v1064_v38 = vadd.f32 %v1063_v29, %v1062_v26  ;;  %v1191_v49 = vrot.slane %v1190_v40, 4 }
  0xae   :  { %v1057_v32 = vadd.f32 %v1056_v23, %v1055_v21  ;;  %v1184_v37 = vrot.slane %v1183_v33, 4  ;;  %v1023_v41 = vsel %vm1022_vm2, %v1019_v16, %v1021_v34  ;;  %v1181_v45 = vrot.slane %v1180_v36, 1 }
  0xaf   :  { %v1065_v47 = vrot.slane %v1064_v38, 2  ;;  %1037 = vst [vmem:[%s2901_s2] sm:$0xff] %v1023_v41  ;;  %v1192_v58 = vadd.f32 %v1191_v49, %v1190_v40  ;;  %v1054_v59 = vadd.f32 %v1053_v44, %v1052_v27  ;;  %v1046_v4 = vrot.slane %v1045_v54, 1 }
  0xb0   :  { %v1058_v39 = vrot.slane %v1057_v32, 2  ;;  %v1185_v46 = vadd.f32 %v1184_v37, %v1183_v33  ;;  %v1182_v60 = vadd.f32 %v1181_v45, %v1180_v36  ;;  %v1173_v9 = vadd.f32 %v1172_v5, %v1171_v62 }
  0xb1   :  { %v1066_v53 = vadd.f32 %v1065_v47, %v1064_v38  ;;  %v832_v56 = vpop.f32.mrf.mxu3  ;;  %v1193_v0 = vrot.slane %v1192_v58, 2  ;;  %v1047_v13 = vadd.f32 %v1046_v4, %v1045_v54 }
  0xb2   :  { %v1059_v48 = vadd.f32 %v1058_v39, %v1057_v32  ;;  %v819_v51 = vpop.f32.mrf.mxu2  ;;  %v1186_v52 = vrot.slane %v1185_v46, 2  ;;  %v1283_v7 = vsel %vm1281_vm3, %v1054_v59, %v1182_v60  ;;  %v1174_v14 = vrot.slane %v1173_v9, 1 }
  0xb3   :  { %v1067_v63 = vrot.slane %v1066_v53, 1  ;;  %v1194_v6 = vadd.f32 %v1193_v0, %v1192_v58  ;;  %v1314_v15 = vrot.slane %v1283_v7, 6 }
  0xb4   :  { %v1060_v57 = vrot.slane %v1059_v48, 1  ;;  %v1187_v61 = vadd.f32 %v1186_v52, %v1185_v46  ;;  %v1175_v17 = vadd.f32 %v1174_v14, %v1173_v9 }
  0xb5   :  { %v1068_v10 = vadd.f32 %v1067_v63, %v1066_v53  ;;  %v1195_v11 = vrot.slane %v1194_v6, 1 }
  0xb6   :  { %v1061_v2 = vadd.f32 %v1060_v57, %v1059_v48  ;;  %v1188_v3 = vrot.slane %v1187_v61, 1  ;;  %v1282_v20 = vsel %vm1281_vm3, %v1047_v13, %v1175_v17 }
  0xb7   :  { %v1196_v16 = vadd.f32 %v1195_v11, %v1194_v6  ;;  %v1326_v22 = vsel %vm1018_vm0, %v1282_v20, %v1314_v15 }
  0xb8   :  { %v1189_v8 = vadd.f32 %v1188_v3, %v1187_v61 }
  0xb9   :  { %v1285_v18 = vsel %vm1281_vm3, %v1068_v10, %v1196_v16 }
  0xba   :  { %v1284_v12 = vsel %vm1281_vm3, %v1061_v2, %v1189_v8  ;;  %v1316_v19 = vrot.slane %v1285_v18, 2 }
  0xbb   :  { %v1315_v1 = vrot.slane %v1284_v12, 4 }
  0xbd   :  { %v1327_v26 = vsel %vm1020_vm1, %v1315_v1, %v1316_v19 }
  0xbe   :  { %v1328_v28 = vsel %vm1022_vm2, %v1326_v22, %v1327_v26 }
  0xbf   :  { %1342 = vst [vmem:[%s2902_s3] sm:$0xff] %v1328_v28 }
  0xc1   :  { %v856_v21 = vpop.f32.mrf.mxu1  ;;  %v843_v30 = vpop.f32.mrf.mxu0 }
  0xc2   :  { %v1009_v23 = vrot.slane %v856_v21, 6  ;;  %v1076_v24 = vsel %vm1018_vm0, %v856_v21, 0.0  ;;  %v1158_v25 = vmul.f32 %v856_v21, %v856_v21  ;;  %v1069_v33 = vsel %vm1018_vm0, %v843_v30, 0.0 }
  0xc3   :  { %v1077_v27 = vrot.slane %v1076_v24, 4  ;;  %v1070_v36 = vrot.slane %v1069_v33, 4  ;;  %v1157_v37 = vmul.f32 %v843_v30, %v843_v30 }
  0xc4   :  { %v1204_v29 = vsel %vm1018_vm0, %v1158_v25, 0.0  ;;  %v1024_v35 = vsel %vm1018_vm0, %v843_v30, %v1009_v23 }
  0xc5   :  { %v1078_v31 = vadd.f32 %v1077_v27, %v1076_v24  ;;  %v1205_v32 = vrot.slane %v1204_v29, 4  ;;  %v1071_v55 = vadd.f32 %v1070_v36, %v1069_v33  ;;  %v1197_v7 = vsel %vm1018_vm0, %v1157_v37, 0.0 }
  0xc6   :  { %v1198_v12 = vrot.slane %v1197_v7, 4 }
  0xc7   :  { %v1079_v38 = vrot.slane %v1078_v31, 2  ;;  %v1206_v39 = vadd.f32 %v1205_v32, %v1204_v29  ;;  %v1072_v62 = vrot.slane %v1071_v55, 2 }
  0xc8   :  { %v1199_v18 = vadd.f32 %v1198_v12, %v1197_v7 }
  0xc9   :  { %v882_v42 = vpop.f32.mrf.mxu3  ;;  %v1080_v47 = vadd.f32 %v1079_v38, %v1078_v31  ;;  %v1207_v48 = vrot.slane %v1206_v39, 2  ;;  %v858_v51 = vpop.f32.mrf.mxu1  ;;  %v1073_v11 = vadd.f32 %v1072_v62, %v1071_v55 }
  0xca   :  { %v869_v34 = vpop.f32.mrf.mxu2  ;;  %v1011_v45 = vrot.slane %v882_v42, 2  ;;  %v1090_v46 = vsel %vm1018_vm0, %v882_v42, 0.0  ;;  %v1160_v50 = vmul.f32 %v882_v42, %v882_v42  ;;  %v845_v63 = vpop.f32.mrf.mxu0  ;;  %v1200_v24 = vrot.slane %v1199_v18, 2 }
  0xcb   :  { %v1010_v40 = vrot.slane %v869_v34, 4  ;;  %v1083_v41 = vsel %vm1018_vm0, %v869_v34, 0.0  ;;  %v1159_v44 = vmul.f32 %v869_v34, %v869_v34  ;;  %v1091_v49 = vrot.slane %v1090_v46, 4 }
  0xcc   :  { %v1084_v43 = vrot.slane %v1083_v41, 4  ;;  %v1208_v56 = vadd.f32 %v1207_v48, %v1206_v39  ;;  %v1218_v60 = vsel %vm1018_vm0, %v1160_v50, 0.0  ;;  %v1081_v0 = vrot.slane %v1080_v47, 1 }
  0xcd   :  { %v1211_v53 = vsel %vm1018_vm0, %v1159_v44, 0.0  ;;  %v1025_v54 = vsel %vm1020_vm1, %v1010_v40, %v1011_v45  ;;  %v1092_v58 = vadd.f32 %v1091_v49, %v1090_v46  ;;  %v1219_v6 = vrot.slane %v1218_v60, 4 }
  0xce   :  { %v1085_v52 = vadd.f32 %v1084_v43, %v1083_v41  ;;  %v1212_v57 = vrot.slane %v1211_v53, 4  ;;  %v1026_v61 = vsel %vm1022_vm2, %v1024_v35, %v1025_v54  ;;  %v1209_v2 = vrot.slane %v1208_v56, 1 }
  0xcf   :  { %v1093_v4 = vrot.slane %v1092_v58, 2  ;;  %1038 = vst [vmem:[%s2901_s2 + $0x8] sm:$0xff] %v1026_v61  ;;  %v1220_v15 = vadd.f32 %v1219_v6, %v1218_v60  ;;  %v1082_v16 = vadd.f32 %v1081_v0, %v1080_v47  ;;  %v1074_v23 = vrot.slane %v1073_v11, 1 }
  0xd0   :  { %v1086_v59 = vrot.slane %v1085_v52, 2  ;;  %v1213_v3 = vadd.f32 %v1212_v57, %v1211_v53  ;;  %v1210_v1 = vadd.f32 %v1209_v2, %v1208_v56  ;;  %v1201_v28 = vadd.f32 %v1200_v24, %v1199_v18 }
  0xd1   :  { %v1094_v10 = vadd.f32 %v1093_v4, %v1092_v58  ;;  %v884_v13 = vpop.f32.mrf.mxu3  ;;  %v1221_v20 = vrot.slane %v1220_v15, 2  ;;  %v1075_v32 = vadd.f32 %v1074_v23, %v1073_v11 }
  0xd2   :  { %v1087_v5 = vadd.f32 %v1086_v59, %v1085_v52  ;;  %v871_v8 = vpop.f32.mrf.mxu2  ;;  %v1214_v9 = vrot.slane %v1213_v3, 2  ;;  %v1287_v26 = vsel %vm1281_vm3, %v1082_v16, %v1210_v1  ;;  %v1202_v33 = vrot.slane %v1201_v28, 1 }
  0xd3   :  { %v1095_v19 = vrot.slane %v1094_v10, 1  ;;  %v1222_v25 = vadd.f32 %v1221_v20, %v1220_v15  ;;  %v1317_v34 = vrot.slane %v1287_v26, 6 }
  0xd4   :  { %v1088_v14 = vrot.slane %v1087_v5, 1  ;;  %v1215_v17 = vadd.f32 %v1214_v9, %v1213_v3  ;;  %v1203_v37 = vadd.f32 %v1202_v33, %v1201_v28 }
  0xd5   :  { %v1096_v29 = vadd.f32 %v1095_v19, %v1094_v10  ;;  %v1223_v30 = vrot.slane %v1222_v25, 1 }
  0xd6   :  { %v1089_v21 = vadd.f32 %v1088_v14, %v1087_v5  ;;  %v1216_v22 = vrot.slane %v1215_v17, 1  ;;  %v1286_v40 = vsel %vm1281_vm3, %v1075_v32, %v1203_v37 }
  0xd7   :  { %v1224_v35 = vadd.f32 %v1223_v30, %v1222_v25  ;;  %v1329_v41 = vsel %vm1018_vm0, %v1286_v40, %v1317_v34 }
  0xd8   :  { %v1217_v27 = vadd.f32 %v1216_v22, %v1215_v17 }
  0xd9   :  { %v1289_v38 = vsel %vm1281_vm3, %v1096_v29, %v1224_v35 }
  0xda   :  { %v1288_v31 = vsel %vm1281_vm3, %v1089_v21, %v1217_v27  ;;  %v1319_v39 = vrot.slane %v1289_v38, 2 }
  0xdb   :  { %v1318_v36 = vrot.slane %v1288_v31, 4 }
  0xdd   :  { %v1330_v42 = vsel %vm1020_vm1, %v1318_v36, %v1319_v39 }
  0xde   :  { %v1331_v43 = vsel %vm1022_vm2, %v1329_v41, %v1330_v42 }
  0xdf   :  { %1343 = vst [vmem:[%s2902_s3 + $0x8] sm:$0xff] %v1331_v43 }
  0xe1   :  { %v908_v44 = vpop.f32.mrf.mxu1  ;;  %v895_v50 = vpop.f32.mrf.mxu0 }
  0xe2   :  { %v1012_v45 = vrot.slane %v908_v44, 6  ;;  %v1104_v46 = vsel %vm1018_vm0, %v908_v44, 0.0  ;;  %v1162_v47 = vmul.f32 %v908_v44, %v908_v44  ;;  %v1097_v53 = vsel %vm1018_vm0, %v895_v50, 0.0 }
  0xe3   :  { %v1105_v48 = vrot.slane %v1104_v46, 4  ;;  %v1098_v56 = vrot.slane %v1097_v53, 4  ;;  %v1161_v57 = vmul.f32 %v895_v50, %v895_v50 }
  0xe4   :  { %v1232_v49 = vsel %vm1018_vm0, %v1162_v47, 0.0  ;;  %v1027_v55 = vsel %vm1018_vm0, %v895_v50, %v1012_v45 }
  0xe5   :  { %v1106_v51 = vadd.f32 %v1105_v48, %v1104_v46  ;;  %v1233_v52 = vrot.slane %v1232_v49, 4  ;;  %v1099_v12 = vadd.f32 %v1098_v56, %v1097_v53  ;;  %v1225_v26 = vsel %vm1018_vm0, %v1161_v57, 0.0 }
  0xe6   :  { %v1226_v31 = vrot.slane %v1225_v26, 4 }
  0xe7   :  { %v1107_v58 = vrot.slane %v1106_v51, 2  ;;  %v1234_v59 = vadd.f32 %v1233_v52, %v1232_v49  ;;  %v1100_v18 = vrot.slane %v1099_v12, 2 }
  0xe8   :  { %v1227_v38 = vadd.f32 %v1226_v31, %v1225_v26 }
  0xe9   :  { %v934_v62 = vpop.f32.mrf.mxu3  ;;  %v1108_v4 = vadd.f32 %v1107_v58, %v1106_v51  ;;  %v1235_v5 = vrot.slane %v1234_v59, 2  ;;  %v910_v8 = vpop.f32.mrf.mxu1  ;;  %v1101_v30 = vadd.f32 %v1100_v18, %v1099_v12 }
  0xea   :  { %v921_v54 = vpop.f32.mrf.mxu2  ;;  %v1014_v2 = vrot.slane %v934_v62, 2  ;;  %v1118_v3 = vsel %vm1018_vm0, %v934_v62, 0.0  ;;  %v1164_v7 = vmul.f32 %v934_v62, %v934_v62  ;;  %v897_v19 = vpop.f32.mrf.mxu0  ;;  %v1228_v44 = vrot.slane %v1227_v38, 2 }
  0xeb   :  { %v1013_v60 = vrot.slane %v921_v54, 4  ;;  %v1111_v61 = vsel %vm1018_vm0, %v921_v54, 0.0  ;;  %v1163_v0 = vmul.f32 %v921_v54, %v921_v54  ;;  %v1119_v6 = vrot.slane %v1118_v3, 4 }
  0xec   :  { %v1112_v63 = vrot.slane %v1111_v61, 4  ;;  %v1236_v13 = vadd.f32 %v1235_v5, %v1234_v59  ;;  %v1246_v1 = vsel %vm1018_vm0, %v1164_v7, 0.0  ;;  %v1109_v20 = vrot.slane %v1108_v4, 1 }
  0xed   :  { %v1239_v10 = vsel %vm1018_vm0, %v1163_v0, 0.0  ;;  %v1028_v11 = vsel %vm1020_vm1, %v1013_v60, %v1014_v2  ;;  %v1120_v15 = vadd.f32 %v1119_v6, %v1118_v3  ;;  %v1247_v25 = vrot.slane %v1246_v1, 4 }
  0xee   :  { %v1113_v9 = vadd.f32 %v1112_v63, %v1111_v61  ;;  %v1240_v14 = vrot.slane %v1239_v10, 4  ;;  %v1029_v17 = vsel %vm1022_vm2, %v1027_v55, %v1028_v11  ;;  %v1237_v21 = vrot.slane %v1236_v13, 1 }
  0xef   :  { %v1121_v23 = vrot.slane %v1120_v15, 2  ;;  %1039 = vst [vmem:[%s2901_s2 + $0x10] sm:$0xff] %v1029_v17  ;;  %v1248_v34 = vadd.f32 %v1247_v25, %v1246_v1  ;;  %v1110_v35 = vadd.f32 %v1109_v20, %v1108_v4  ;;  %v1102_v43 = vrot.slane %v1101_v30, 1 }
  0xf0   :  { %v1114_v16 = vrot.slane %v1113_v9, 2  ;;  %v1241_v22 = vadd.f32 %v1240_v14, %v1239_v10  ;;  %v1238_v36 = vadd.f32 %v1237_v21, %v1236_v13  ;;  %v1229_v48 = vadd.f32 %v1228_v44, %v1227_v38 }
  0xf1   :  { %v1122_v29 = vadd.f32 %v1121_v23, %v1120_v15  ;;  %v936_v32 = vpop.f32.mrf.mxu3  ;;  %v1249_v40 = vrot.slane %v1248_v34, 2  ;;  %v1103_v52 = vadd.f32 %v1102_v43, %v1101_v30 }
  0xf2   :  { %v1115_v24 = vadd.f32 %v1114_v16, %v1113_v9  ;;  %v923_v27 = vpop.f32.mrf.mxu2  ;;  %v1242_v28 = vrot.slane %v1241_v22, 2  ;;  %v1291_v46 = vsel %vm1281_vm3, %v1110_v35, %v1238_v36  ;;  %v1230_v53 = vrot.slane %v1229_v48, 1 }
  0xf3   :  { %v1123_v39 = vrot.slane %v1122_v29, 1  ;;  %v1250_v45 = vadd.f32 %v1249_v40, %v1248_v34  ;;  %v1320_v54 = vrot.slane %v1291_v46, 6 }
  0xf4   :  { %v1116_v33 = vrot.slane %v1115_v24, 1  ;;  %v1243_v37 = vadd.f32 %v1242_v28, %v1241_v22  ;;  %v1231_v57 = vadd.f32 %v1230_v53, %v1229_v48 }
  0xf5   :  { %v1124_v49 = vadd.f32 %v1123_v39, %v1122_v29  ;;  %v1251_v50 = vrot.slane %v1250_v45, 1 }
  0xf6   :  { %v1117_v41 = vadd.f32 %v1116_v33, %v1115_v24  ;;  %v1244_v42 = vrot.slane %v1243_v37, 1  ;;  %v1290_v60 = vsel %vm1281_vm3, %v1103_v52, %v1231_v57 }
  0xf7   :  { %v1252_v55 = vadd.f32 %v1251_v50, %v1250_v45  ;;  %v1332_v61 = vsel %vm1018_vm0, %v1290_v60, %v1320_v54 }
  0xf8   :  { %v1245_v47 = vadd.f32 %v1244_v42, %v1243_v37 }
  0xf9   :  { %v1293_v58 = vsel %vm1281_vm3, %v1124_v49, %v1252_v55 }
  0xfa   :  { %v1292_v51 = vsel %vm1281_vm3, %v1117_v41, %v1245_v47  ;;  %v1322_v59 = vrot.slane %v1293_v58, 2 }
  0xfb   :  { %v1321_v56 = vrot.slane %v1292_v51, 4 }
  0xfd   :  { %v1333_v62 = vsel %vm1020_vm1, %v1321_v56, %v1322_v59 }
  0xfe   :  { %v1334_v0 = vsel %vm1022_vm2, %v1332_v61, %v1333_v62 }
  0xff   :  { %1344 = vst [vmem:[%s2902_s3 + $0x10] sm:$0xff] %v1334_v0 }
 0x101   :  { %v947_v63 = vpop.f32.mrf.mxu0  ;;  %v960_v3 = vpop.f32.mrf.mxu1 }
 0x102   :  { %v1165_v2 = vmul.f32 %v947_v63, %v947_v63  ;;  %v1125_v4 = vsel %vm1018_vm0, %v947_v63, 0.0  ;;  %v1132_v5 = vsel %vm1018_vm0, %v960_v3, 0.0  ;;  %v1166_v6 = vmul.f32 %v960_v3, %v960_v3 }
 0x103   :  { %v1133_v8 = vrot.slane %v1132_v5, 4  ;;  %v1126_v10 = vrot.slane %v1125_v4, 4  ;;  %v1015_v13 = vrot.slane %v960_v3, 6 }
 0x104   :  { %v1253_v7 = vsel %vm1018_vm0, %v1165_v2, 0.0  ;;  %v1260_v9 = vsel %vm1018_vm0, %v1166_v6, 0.0 }
 0x105   :  { %v1261_v11 = vrot.slane %v1260_v9, 4  ;;  %v1254_v12 = vrot.slane %v1253_v7, 4  ;;  %v1134_v14 = vadd.f32 %v1133_v8, %v1132_v5  ;;  %v1127_v20 = vadd.f32 %v1126_v10, %v1125_v4 }
 0x106   :  { %v1030_v26 = vsel %vm1018_vm0, %v947_v63, %v1015_v13 }
 0x107   :  { %v1262_v15 = vadd.f32 %v1261_v11, %v1260_v9  ;;  %v1255_v25 = vadd.f32 %v1254_v12, %v1253_v7  ;;  %v1135_v28 = vrot.slane %v1134_v14, 2  ;;  %v1128_v34 = vrot.slane %v1127_v20, 2 }
 0x108   :  { %v973_v16 = vpop.f32.mrf.mxu2 }
 0x109   :  { %v1016_v1 = vrot.slane %v973_v16, 4  ;;  %v1139_v17 = vsel %vm1018_vm0, %v973_v16, 0.0  ;;  %v986_v18 = vpop.f32.mrf.mxu3  ;;  %v949_v19 = vpop.f32.mrf.mxu0  ;;  %v1263_v21 = vrot.slane %v1262_v15, 2  ;;  %v1167_v23 = vmul.f32 %v973_v16, %v973_v16 }
 0x10a   :  { %v1140_v22 = vrot.slane %v1139_v17, 4  ;;  %v962_v24 = vpop.f32.mrf.mxu1  ;;  %v1017_v27 = vrot.slane %v986_v18, 2  ;;  %v1146_v31 = vsel %vm1018_vm0, %v986_v18, 0.0  ;;  %v1256_v38 = vrot.slane %v1255_v25, 2 }
 0x10b   :  { %v1267_v30 = vsel %vm1018_vm0, %v1167_v23, 0.0  ;;  %v1264_v35 = vadd.f32 %v1263_v21, %v1262_v15  ;;  %v1147_v40 = vrot.slane %v1146_v31, 4  ;;  %v1168_v41 = vmul.f32 %v986_v18, %v986_v18 }
 0x10c   :  { %v1141_v29 = vadd.f32 %v1140_v22, %v1139_v17  ;;  %v1268_v32 = vrot.slane %v1267_v30, 4  ;;  %v1031_v33 = vsel %vm1020_vm1, %v1016_v1, %v1017_v27  ;;  %v1136_v42 = vadd.f32 %v1135_v28, %v1134_v14 }
 0x10d   :  { %v1032_v37 = vsel %vm1022_vm2, %v1030_v26, %v1031_v33  ;;  %v1148_v46 = vadd.f32 %v1147_v40, %v1146_v31  ;;  %v1274_v47 = vsel %vm1018_vm0, %v1168_v41, 0.0  ;;  %v1265_v49 = vrot.slane %v1264_v35, 1 }
 0x10e   :  { %v1142_v36 = vrot.slane %v1141_v29, 2  ;;  %v1269_v39 = vadd.f32 %v1268_v32, %v1267_v30  ;;  %1040 = vst [vmem:[%s2901_s2 + $0x18] sm:$0xff] %v1032_v37  ;;  %v1275_v50 = vrot.slane %v1274_v47, 4  ;;  %v1129_v51 = vadd.f32 %v1128_v34, %v1127_v20 }
 0x10f   :  { %v1257_v52 = vadd.f32 %v1256_v38, %v1255_v25  ;;  %v1149_v54 = vrot.slane %v1148_v46, 2  ;;  %v1137_v55 = vrot.slane %v1136_v42, 1  ;;  %v1266_v60 = vadd.f32 %v1265_v49, %v1264_v35 }
 0x110   :  { %v1143_v43 = vadd.f32 %v1142_v36, %v1141_v29  ;;  %v975_v44 = vpop.f32.mrf.mxu2  ;;  %v1270_v45 = vrot.slane %v1269_v39, 2  ;;  %v1276_v57 = vadd.f32 %v1275_v50, %v1274_v47  ;;  %v1130_v62 = vrot.slane %v1129_v51, 1 }
 0x111   :  { %v988_v48 = vpop.f32.mrf.mxu3  ;;  %v1150_v59 = vadd.f32 %v1149_v54, %v1148_v46  ;;  %v1258_v63 = vrot.slane %v1257_v52, 1  ;;  %v1138_v2 = vadd.f32 %v1137_v55, %v1136_v42 }
 0x112   :  { %v1271_v53 = vadd.f32 %v1270_v45, %v1269_v39  ;;  %v1144_v56 = vrot.slane %v1143_v43, 1  ;;  %v1277_v61 = vrot.slane %v1276_v57, 2  ;;  %v1131_v9 = vadd.f32 %v1130_v62, %v1129_v51 }
 0x113   :  { %v1151_v4 = vrot.slane %v1150_v59, 1  ;;  %v1295_v6 = vsel %vm1281_vm3, %v1138_v2, %v1266_v60  ;;  %v1259_v10 = vadd.f32 %v1258_v63, %v1257_v52 }
 0x114   :  { %v1272_v58 = vrot.slane %v1271_v53, 1  ;;  %v1145_v3 = vadd.f32 %v1144_v56, %v1143_v43  ;;  %v1278_v5 = vadd.f32 %v1277_v61, %v1276_v57  ;;  %v1323_v13 = vrot.slane %v1295_v6, 6 }
 0x115   :  { %v1152_v11 = vadd.f32 %v1151_v4, %v1150_v59  ;;  %v1294_v1 = vsel %vm1281_vm3, %v1131_v9, %v1259_v10 }
 0x116   :  { %v1273_v0 = vadd.f32 %v1272_v58, %v1271_v53  ;;  %v1279_v8 = vrot.slane %v1278_v5, 1  ;;  %v1335_v17 = vsel %vm1018_vm0, %v1294_v1, %v1323_v13 }
 0x118   :  { %v1296_v7 = vsel %vm1281_vm3, %v1145_v3, %v1273_v0  ;;  %v1280_v12 = vadd.f32 %v1279_v8, %v1278_v5 }
 0x119   :  { %v1324_v14 = vrot.slane %v1296_v7, 4 }
 0x11a   :  { %v1297_v15 = vsel %vm1281_vm3, %v1152_v11, %v1280_v12 }
 0x11b   :  { %v1325_v16 = vrot.slane %v1297_v15, 2 }
 0x11d   :  { %v1336_v18 = vsel %vm1020_vm1, %v1324_v14, %v1325_v16 }
 0x11e   :  { %v1337_v19 = vsel %vm1022_vm2, %v1335_v17, %v1336_v18 }
 0x11f   :  { %1345 = vst [vmem:[%s2902_s3 + $0x18] sm:$0xff] %v1337_v19 }

// kernel: generator_forward.12
= control target key start
LH: loop header
LB: loop body
LE: loop exit
PB: predicated region body
PF: predicated region fallthrough
CT: control target
= control target key end

     0   :  { %vm102_vm0 = vcmask 519168   ;;  %s299_s0 = inlined_call_operand.vmem [shape: f32[128,64], index: 0, kind: input, shape index: {}]   ;;  %s300_s1 = inlined_call_operand.vmem [shape: f32[1,64], index: 1, kind: input, shape index: {}]   ;;  %s301_s2 = inlined_call_operand.vmem [shape: f32[1,64], index: 2, kind: input, shape index: {}]   ;;  %s302_s3 = inlined_call_operand.vmem [shape: bf16[128,64], index: 3, kind: output, shape index: {}]  }
   0x1   :  { %v14_v0 = vld [vmem:[%s299_s0] sm:$0xff]  ;;  %v15_v3 = vld [vmem:[%s299_s0 + $0x8] sm:$0xff]  ;;  %v16_v6 = vld [vmem:[%s299_s0 + $0x10] sm:$0xff] }
   0x2   :  { %v151_v1 = vld [vmem:[%s300_s1] ss:$0 sm:$0xff]  ;;  %v17_v7 = vld [vmem:[%s299_s0 + $0x18] sm:$0xff]  ;;  %v19_v12 = vld [vmem:[%s299_s0 + $0x28] sm:$0xff] }
   0x3   :  { %v156_v2 = vld [vmem:[%s301_s2] ss:$0 sm:$0xff]  ;;  %v34_v4 = vmul.f32 %v151_v1, %v14_v0  ;;  %v35_v5 = vmul.f32 %v151_v1, %v15_v3  ;;  %v36_v9 = vmul.f32 %v151_v1, %v16_v6  ;;  %v37_v10 = vmul.f32 %v151_v1, %v17_v7  ;;  %v20_v13 = vld [vmem:[%s299_s0 + $0x30] sm:$0xff]  ;;  %v21_v14 = vld [vmem:[%s299_s0 + $0x38] sm:$0xff] }
   0x4   :  { %v18_v8 = vld [vmem:[%s299_s0 + $0x20] sm:$0xff]  ;;  %v39_v17 = vmul.f32 %v151_v1, %v19_v12  ;;  %v40_v18 = vmul.f32 %v151_v1, %v20_v13  ;;  %v41_v22 = vmul.f32 %v151_v1, %v21_v14  ;;  %v23_v32 = vld [vmem:[%s299_s0 + $0x48] sm:$0xff]  ;;  %v24_v37 = vld [vmem:[%s299_s0 + $0x50] sm:$0xff] }
   0x5   :  { %v38_v11 = vmul.f32 %v151_v1, %v18_v8  ;;  %v54_v15 = vadd.f32 %v156_v2, %v34_v4  ;;  %v55_v16 = vadd.f32 %v156_v2, %v35_v5  ;;  %v56_v19 = vadd.f32 %v156_v2, %v36_v9  ;;  %v22_v31 = vld [vmem:[%s299_s0 + $0x40] sm:$0xff]  ;;  %v25_v38 = vld [vmem:[%s299_s0 + $0x58] sm:$0xff]  ;;  %v27_v44 = vld [vmem:[%s299_s0 + $0x68] sm:$0xff] }
   0x6   :  { %v57_v20 = vadd.f32 %v156_v2, %v37_v10  ;;  %v59_v25 = vadd.f32 %v156_v2, %v39_v17  ;;  %v60_v26 = vadd.f32 %v156_v2, %v40_v18  ;;  %v61_v30 = vadd.f32 %v156_v2, %v41_v22  ;;  %v26_v39 = vld [vmem:[%s299_s0 + $0x60] sm:$0xff]  ;;  %v28_v45 = vld [vmem:[%s299_s0 + $0x70] sm:$0xff]  ;;  %v29_v50 = vld [vmem:[%s299_s0 + $0x78] sm:$0xff] }
   0x7   :  { %v58_v21 = vadd.f32 %v156_v2, %v38_v11  ;;  %v70_v23 = vmax.f32 %v54_v15, 0.0  ;;  %v71_v24 = vmax.f32 %v55_v16, 0.0  ;;  %v72_v27 = vmax.f32 %v56_v19, 0.0 }
   0x8   :  { %v73_v28 = vmax.f32 %v57_v20, 0.0  ;;  %v75_v35 = vmax.f32 %v59_v25, 0.0  ;;  %v76_v36 = vmax.f32 %v60_v26, 0.0  ;;  %v77_v43 = vmax.f32 %v61_v30, 0.0 }
   0x9   :  { %v74_v29 = vmax.f32 %v58_v21, 0.0  ;;  %v86_v33 = vpack.c.bf16 %v70_v23, %v70_v23  ;;  %v87_v34 = vpack.c.bf16 %v71_v24, %v71_v24  ;;  %v88_v40 = vpack.c.bf16 %v72_v27, %v72_v27 }
   0xa   :  { %v89_v41 = vpack.c.bf16 %v73_v28, %v73_v28  ;;  %v91_v46 = vpack.c.bf16 %v75_v35, %v75_v35  ;;  %v92_v47 = vpack.c.bf16 %v76_v36, %v76_v36  ;;  %v42_v48 = vmul.f32 %v151_v1, %v22_v31 }
   0xb   :  { %v90_v42 = vpack.c.bf16 %v74_v29, %v74_v29  ;;  %103 = vst.msk [vmem:[%s302_s3] sm:$0xf] %vm102_vm0, %v86_v33  ;;  %v43_v49 = vmul.f32 %v151_v1, %v23_v32  ;;  %v93_v51 = vpack.c.bf16 %v77_v43, %v77_v43  ;;  %v44_v52 = vmul.f32 %v151_v1, %v24_v37 }
   0xc   :  { %104 = vst.msk [vmem:[%s302_s3 + $0x4] sm:$0xf] %vm102_vm0, %v87_v34  ;;  %v45_v53 = vmul.f32 %v151_v1, %v25_v38  ;;  %v46_v54 = vmul.f32 %v151_v1, %v26_v39  ;;  %v62_v55 = vadd.f32 %v156_v2, %v42_v48  ;;  %v47_v57 = vmul.f32 %v151_v1, %v27_v44 }
   0xd   :  { %105 = vst.msk [vmem:[%s302_s3 + $0x8] sm:$0xf] %vm102_vm0, %v88_v40  ;;  %v63_v56 = vadd.f32 %v156_v2, %v43_v49  ;;  %v48_v58 = vmul.f32 %v151_v1, %v28_v45  ;;  %v64_v59 = vadd.f32 %v156_v2, %v44_v52  ;;  %v49_v62 = vmul.f32 %v151_v1, %v29_v50 }
   0xe   :  { %106 = vst.msk [vmem:[%s302_s3 + $0xc] sm:$0xf] %vm102_vm0, %v89_v41  ;;  %v65_v60 = vadd.f32 %v156_v2, %v45_v53  ;;  %v66_v61 = vadd.f32 %v156_v2, %v46_v54  ;;  %v78_v63 = vmax.f32 %v62_v55, 0.0  ;;  %v67_v3 = vadd.f32 %v156_v2, %v47_v57 }
   0xf   :  { %107 = vst.msk [vmem:[%s302_s3 + $0x10] sm:$0xf] %vm102_vm0, %v90_v42  ;;  %v79_v0 = vmax.f32 %v63_v56, 0.0  ;;  %v68_v4 = vadd.f32 %v156_v2, %v48_v58  ;;  %v80_v5 = vmax.f32 %v64_v59, 0.0  ;;  %v69_v1 = vadd.f32 %v156_v2, %v49_v62 }
  0x10   :  { %108 = vst.msk [vmem:[%s302_s3 + $0x14] sm:$0xf] %vm102_vm0, %v91_v46  ;;  %v81_v6 = vmax.f32 %v65_v60, 0.0  ;;  %v82_v7 = vmax.f32 %v66_v61, 0.0  ;;  %v94_v8 = vpack.c.bf16 %v78_v63, %v78_v63  ;;  %v83_v10 = vmax.f32 %v67_v3, 0.0 }
  0x11   :  { %109 = vst.msk [vmem:[%s302_s3 + $0x18] sm:$0xf] %vm102_vm0, %v92_v47  ;;  %v95_v9 = vpack.c.bf16 %v79_v0, %v79_v0  ;;  %v84_v11 = vmax.f32 %v68_v4, 0.0  ;;  %v96_v12 = vpack.c.bf16 %v80_v5, %v80_v5  ;;  %v85_v14 = vmax.f32 %v69_v1, 0.0 }
  0x12   :  { %110 = vst.msk [vmem:[%s302_s3 + $0x1c] sm:$0xf] %vm102_vm0, %v93_v51  ;;  %v97_v13 = vpack.c.bf16 %v81_v6, %v81_v6  ;;  %v98_v2 = vpack.c.bf16 %v82_v7, %v82_v7  ;;  %v99_v15 = vpack.c.bf16 %v83_v10, %v83_v10 }
  0x13   :  { %111 = vst.msk [vmem:[%s302_s3 + $0x20] sm:$0xf] %vm102_vm0, %v94_v8  ;;  %v100_v16 = vpack.c.bf16 %v84_v11, %v84_v11  ;;  %v101_v17 = vpack.c.bf16 %v85_v14, %v85_v14 }
  0x14   :  { %112 = vst.msk [vmem:[%s302_s3 + $0x24] sm:$0xf] %vm102_vm0, %v95_v9 }
  0x15   :  { %113 = vst.msk [vmem:[%s302_s3 + $0x28] sm:$0xf] %vm102_vm0, %v96_v12 }
  0x16   :  { %114 = vst.msk [vmem:[%s302_s3 + $0x2c] sm:$0xf] %vm102_vm0, %v97_v13 }
  0x17   :  { %115 = vst.msk [vmem:[%s302_s3 + $0x30] sm:$0xf] %vm102_vm0, %v98_v2 }
  0x18   :  { %116 = vst.msk [vmem:[%s302_s3 + $0x34] sm:$0xf] %vm102_vm0, %v99_v15 }
  0x19   :  { %117 = vst.msk [vmem:[%s302_s3 + $0x38] sm:$0xf] %vm102_vm0, %v100_v16 }
  0x1a   :  { %118 = vst.msk [vmem:[%s302_s3 + $0x3c] sm:$0xf] %vm102_vm0, %v101_v17 }

// kernel: generator_forward.11
= control target key start
LH: loop header
LB: loop body
LE: loop exit
PB: predicated region body
PF: predicated region fallthrough
CT: control target
= control target key end

     0   :  { %s1099_s12 = smov 0   ;;  %s1101_s13 = smov 0   ;;  %s1214_s0 = inlined_call_operand.vmem [shape: bf16[4,32,512], index: 0, kind: input, shape index: {}]   ;;  %s1215_s1 = inlined_call_operand.vmem [shape: bf16[4,512,64], index: 1, kind: input, shape index: {}]   ;;  %s1216_s2 = inlined_call_operand.vmem [shape: f32[4,32,64], index: 2, kind: output, shape index: {0}]   ;;  %s1217_s3 = inlined_call_operand.vmem [shape: f32[4,1,2,64], index: 3, kind: output, shape index: {1}]  }
   0x1   :  { %s1103_s14 = smov 0  }
   0x2 LB: > { %s26_s15 = sadd.s32 1, %s1073_s13  ;;  %p818_p0 = scmp.ge.s32.totalorder %s1077_s14, 1  ;;  %s1077_s14 = sphi %s1103_s14, %s14_s14   ;;  %s1073_s13 = sphi %s1101_s13, %s1219_s13   ;;  %s1069_s12 = sphi %s1099_s12, %s1218_s12  }
   0x3   : > { %p28_p1 = scmp.ge.s32.totalorder %s26_s15, 4  ;;  %p174_p2 = scmp.lt.s32.totalorder %s1077_s14, 5 }
   0x5   : > { %s1221_s15 = smov (%p28_p1, %s26_s15), 0  ;;  %p175_p3 = pnand %p818_p0, %p174_p2 }
   0x6   : > { %p220_p4 = scmp.lt.s32.totalorder (!%p175_p3), %s1069_s12, 3 }
   0x7   : > { %178 = sbr.rel (%p175_p3) target bundleno = 228 (0xe4), region = 28 }
   0xc   : > { %s1223_s12 = smov (!%p220_p4, %s1069_s12), 3  ;;  %vm632_vm0 = vcmask 523264   ;;  %vm667_vm1 = vcmask 1040384   ;;  %vm669_vm2 = vcmask 517120  }
   0xd   : > { %s989_s16 = sshll.u32 %s1223_s12, 8  ;;  %s988_s20 = sshll.u32 %s1223_s12, 6 }
   0xe   : > { %s1123_s19 = scalar_lea.vmem %s1215_s1, %s989_s16  ;;  %s1155_s23 = scalar_lea.vmem %s1214_s0, %s988_s20 }
   0xf   : > { %v1006_v0 = vld [vmem:[%s1123_s19 + $0x38] sm:$0xff]  ;;  %v1005_v4 = vld [vmem:[%s1123_s19 + $0x30] sm:$0xff]  ;;  %v1004_v8 = vld [vmem:[%s1123_s19 + $0x28] sm:$0xff]  ;;  %s990_s24 = sshll.u32 %s1223_s12, 5  ;;  %s825_s28 = sshll.u32 %s1223_s12, 1 }
  0x10   : > { %v1014_v1 = vld [vmem:[%s1123_s19 + $0x78] sm:$0xff]  ;;  %556 = vmatpush.bf16.msra.mxu0 %v1006_v0  ;;  %v1013_v5 = vld [vmem:[%s1123_s19 + $0x70] sm:$0xff]  ;;  %v1012_v9 = vld [vmem:[%s1123_s19 + $0x68] sm:$0xff]  ;;  %s1183_s27 = scalar_lea.vmem %s1216_s2, %s990_s24  ;;  %s251_s4 = scalar_lea.vmem %s1217_s3, %s825_s28 }
  0x11   : > { %v1022_v2 = vld [vmem:[%s1123_s19 + $0xb8] sm:$0xff]  ;;  %575 = vmatpush.bf16.msra.mxu1 %v1014_v1  ;;  %v1021_v6 = vld [vmem:[%s1123_s19 + $0xb0] sm:$0xff]  ;;  %v1020_v10 = vld [vmem:[%s1123_s19 + $0xa8] sm:$0xff] }
  0x12   : > { %v1030_v3 = vld [vmem:[%s1123_s19 + $0xf8] sm:$0xff]  ;;  %594 = vmatpush.bf16.msra.mxu2 %v1022_v2  ;;  %v1029_v7 = vld [vmem:[%s1123_s19 + $0xf0] sm:$0xff]  ;;  %v1028_v11 = vld [vmem:[%s1123_s19 + $0xe8] sm:$0xff] }
  0x13   : > { %613 = vmatpush.bf16.msra.mxu3 %v1030_v3  ;;  %v1003_v12 = vld [vmem:[%s1123_s19 + $0x20] sm:$0xff]  ;;  %v1002_v16 = vld [vmem:[%s1123_s19 + $0x18] sm:$0xff]  ;;  %v1001_v20 = vld [vmem:[%s1123_s19 + $0x10] sm:$0xff] }
  0x14   : > { %557 = vmatpush.bf16.msra.mxu0 %v1005_v4  ;;  %v1011_v13 = vld [vmem:[%s1123_s19 + $0x60] sm:$0xff]  ;;  %v1010_v17 = vld [vmem:[%s1123_s19 + $0x58] sm:$0xff]  ;;  %v1009_v21 = vld [vmem:[%s1123_s19 + $0x50] sm:$0xff] }
  0x15   : > { %576 = vmatpush.bf16.msra.mxu1 %v1013_v5  ;;  %v1019_v14 = vld [vmem:[%s1123_s19 + $0xa0] sm:$0xff]  ;;  %v1018_v18 = vld [vmem:[%s1123_s19 + $0x98] sm:$0xff]  ;;  %v1017_v22 = vld [vmem:[%s1123_s19 + $0x90] sm:$0xff] }
  0x16   : > { %595 = vmatpush.bf16.msra.mxu2 %v1021_v6  ;;  %v1027_v15 = vld [vmem:[%s1123_s19 + $0xe0] sm:$0xff]  ;;  %v1026_v19 = vld [vmem:[%s1123_s19 + $0xd8] sm:$0xff]  ;;  %v1025_v23 = vld [vmem:[%s1123_s19 + $0xd0] sm:$0xff] }
  0x17   : > { %614 = vmatpush.bf16.msra.mxu3 %v1029_v7  ;;  %v1000_v24 = vld [vmem:[%s1123_s19 + $0x8] sm:$0xff]  ;;  %v999_v28 = vld [vmem:[%s1123_s19] sm:$0xff]  ;;  %v993_v33 = vld [vmem:[%s1155_s23 + $0xc] sm:$0xf0] }
  0x18   : > { %558 = vmatpush.bf16.msra.mxu0 %v1004_v8  ;;  %v1008_v25 = vld [vmem:[%s1123_s19 + $0x48] sm:$0xff]  ;;  %v1007_v29 = vld [vmem:[%s1123_s19 + $0x40] sm:$0xff]  ;;  %v830_v35 = vld [vmem:[%s1155_s23 + $0x10] sm:$0xf0] }
  0x19   : > { %577 = vmatpush.bf16.msra.mxu1 %v1012_v9  ;;  %v1016_v26 = vld [vmem:[%s1123_s19 + $0x88] sm:$0xff]  ;;  %v1015_v30 = vld [vmem:[%s1123_s19 + $0x80] sm:$0xff]  ;;  %v994_v37 = vld [vmem:[%s1155_s23 + $0x14] sm:$0xf0] }
  0x1a   : > { %596 = vmatpush.bf16.msra.mxu2 %v1020_v10  ;;  %v1024_v27 = vld [vmem:[%s1123_s19 + $0xc8] sm:$0xff]  ;;  %v1023_v31 = vld [vmem:[%s1123_s19 + $0xc0] sm:$0xff]  ;;  %v838_v39 = vld [vmem:[%s1155_s23 + $0x18] sm:$0xf0] }
  0x1b   : > { %615 = vmatpush.bf16.msra.mxu3 %v1028_v11  ;;  %v828_v32 = vld [vmem:[%s1155_s23] sm:$0xf]  ;;  %v991_v34 = vld [vmem:[%s1155_s23 + $0x4] sm:$0xf]  ;;  %v836_v36 = vld [vmem:[%s1155_s23 + $0x8] sm:$0xf] }
  0x1c   : > { %559 = vmatpush.bf16.msra.mxu0 %v1003_v12  ;;  %v992_v38 = vld [vmem:[%s1155_s23 + $0xc] sm:$0xf]  ;;  %v829_v40 = vor.u32 %v993_v33, %v828_v32  ;;  %v833_v41 = vor.u32 %v991_v34, %v830_v35  ;;  %v837_v42 = vor.u32 %v994_v37, %v836_v36  ;;  %v844_v44 = vld [vmem:[%s1155_s23 + $0x20] sm:$0xf]  ;;  %v997_v45 = vld [vmem:[%s1155_s23 + $0x2c] sm:$0xf0] }
  0x1d   : > { %578 = vmatpush.bf16.msra.mxu1 %v1011_v13  ;;  %v841_v43 = vor.u32 %v992_v38, %v838_v39  ;;  %v995_v46 = vld [vmem:[%s1155_s23 + $0x24] sm:$0xf]  ;;  %v846_v47 = vld [vmem:[%s1155_s23 + $0x30] sm:$0xf0]  ;;  %v852_v48 = vld [vmem:[%s1155_s23 + $0x28] sm:$0xf]  ;;  %v845_v52 = vor.u32 %v997_v45, %v844_v44 }
  0x1e   : > { %597 = vmatpush.bf16.msra.mxu2 %v1019_v14  ;;  %v998_v49 = vld [vmem:[%s1155_s23 + $0x34] sm:$0xf0]  ;;  %v996_v50 = vld [vmem:[%s1155_s23 + $0x2c] sm:$0xf]  ;;  %v854_v51 = vld [vmem:[%s1155_s23 + $0x38] sm:$0xf0]  ;;  %v849_v53 = vor.u32 %v995_v46, %v846_v47 }
  0x1f   : > { %616 = vmatpush.bf16.msra.mxu3 %v1027_v15  ;;  %v853_v54 = vor.u32 %v998_v49, %v852_v48  ;;  %v857_v55 = vor.u32 %v996_v50, %v854_v51 }
  0x20   : > { %560 = vmatpush.bf16.msra.mxu0 %v1002_v16 }
  0x21   : > { %579 = vmatpush.bf16.msra.mxu1 %v1010_v17 }
  0x22   : > { %598 = vmatpush.bf16.msra.mxu2 %v1018_v18 }
  0x23   : > { %617 = vmatpush.bf16.msra.mxu3 %v1026_v19 }
  0x24   : > { %561 = vmatpush.bf16.msra.mxu0 %v1001_v20 }
  0x25   : > { %580 = vmatpush.bf16.msra.mxu1 %v1009_v21 }
  0x26   : > { %599 = vmatpush.bf16.msra.mxu2 %v1017_v22 }
  0x27   : > { %618 = vmatpush.bf16.msra.mxu3 %v1025_v23 }
  0x28   : > { %562 = vmatpush.bf16.msra.mxu0 %v1000_v24 }
  0x29   : > { %581 = vmatpush.bf16.msra.mxu1 %v1008_v25 }
  0x2a   : > { %600 = vmatpush.bf16.msra.mxu2 %v1016_v26 }
  0x2b   : > { %619 = vmatpush.bf16.msra.mxu3 %v1024_v27 }
  0x2c   : > { %563 = vmatpush.bf16.msra.mxu0 %v999_v28 }
  0x2d   : > { %582 = vmatpush.bf16.msra.mxu1 %v1007_v29 }
  0x2e   : > { %601 = vmatpush.bf16.msra.mxu2 %v1015_v30 }
  0x2f   : > { %620 = vmatpush.bf16.msra.mxu3 %v1023_v31  ;;  %564 = vmatmul.bf16.vlgmr.msra.gmra.mxu0 %v829_v40 }
  0x30   : > { %583 = vmatmul.bf16.vlgmr.msra.gmra.mxu1 %v833_v41 }
  0x31   : > { %602 = vmatmul.bf16.vlgmr.msra.gmra.mxu2 %v837_v42 }
  0x32   : > { %621 = vmatmul.bf16.vlgmr.msra.gmra.mxu3 %v841_v43 }
  0x3f   : > { %569 = vmatmul.bf16.gmra.mxu0 %v845_v52 }
  0x40   : > { %588 = vmatmul.bf16.gmra.mxu1 %v849_v53 }
  0x41   : > { %607 = vmatmul.bf16.gmra.mxu2 %v853_v54 }
  0x42   : > { %626 = vmatmul.bf16.gmra.mxu3 %v857_v55 }
  0xac   : > { %v565_v56 = vpop.f32.mrf.mxu0 }
  0xad   : > { %v584_v57 = vpop.f32.mrf.mxu1 }
  0xae   : > { %v585_v58 = vadd.f32 %v584_v57, %v565_v56 }
  0xb4   : > { %v603_v59 = vpop.f32.mrf.mxu2  ;;  %v567_v62 = vpop.f32.mrf.mxu0 }
  0xb5   : > { %v622_v60 = vpop.f32.mrf.mxu3  ;;  %v604_v61 = vadd.f32 %v603_v59, %v585_v58  ;;  %v586_v63 = vpop.f32.mrf.mxu1 }
  0xb6   : > { %v587_v1 = vadd.f32 %v586_v63, %v567_v62 }
  0xb7   : > { %v623_v0 = vadd.f32 %v622_v60, %v604_v61 }
  0xb9   : > { %633 = vst.msk [vmem:[%s1183_s27] sm:$0xff] %vm632_vm0, %v623_v0  ;;  %v650_v16 = vmul.f32 %v623_v0, %v623_v0  ;;  %v637_v21 = vsel %vm632_vm0, %v623_v0, 0.0 }
  0xbb   : > { %v654_v27 = vsel %vm632_vm0, %v650_v16, 0.0 }
  0xbc   : > { %v605_v2 = vpop.f32.mrf.mxu2  ;;  %v570_v5 = vpop.f32.mrf.mxu0 }
  0xbd   : > { %v624_v3 = vpop.f32.mrf.mxu3  ;;  %v606_v4 = vadd.f32 %v605_v2, %v587_v1  ;;  %v589_v6 = vpop.f32.mrf.mxu1 }
  0xbe   : > { %v590_v8 = vadd.f32 %v589_v6, %v570_v5 }
  0xbf   : > { %v625_v7 = vadd.f32 %v624_v3, %v606_v4 }
  0xc1   : > { %634 = vst.msk [vmem:[%s1183_s27 + $0x8] sm:$0xff] %vm632_vm0, %v625_v7  ;;  %v651_v15 = vmul.f32 %v625_v7, %v625_v7  ;;  %v638_v17 = vsel %vm632_vm0, %v625_v7, 0.0 }
  0xc2   : > { %v639_v25 = vadd.f32 %v638_v17, %v637_v21 }
  0xc3   : > { %v655_v22 = vsel %vm632_vm0, %v651_v15, 0.0 }
  0xc4   : > { %v608_v9 = vpop.f32.mrf.mxu2  ;;  %v572_v13 = vpop.f32.mrf.mxu0  ;;  %v656_v30 = vadd.f32 %v655_v22, %v654_v27 }
  0xc5   : > { %v627_v10 = vpop.f32.mrf.mxu3  ;;  %v609_v11 = vadd.f32 %v608_v9, %v590_v8  ;;  %v591_v14 = vpop.f32.mrf.mxu1 }
  0xc6   : > { %v592_v19 = vadd.f32 %v591_v14, %v572_v13 }
  0xc7   : > { %v628_v12 = vadd.f32 %v627_v10, %v609_v11 }
  0xc9   : > { %635 = vst.msk [vmem:[%s1183_s27 + $0x10] sm:$0xff] %vm632_vm0, %v628_v12  ;;  %v652_v18 = vmul.f32 %v628_v12, %v628_v12  ;;  %v640_v23 = vsel %vm632_vm0, %v628_v12, 0.0 }
  0xca   : > { %v641_v31 = vadd.f32 %v640_v23, %v639_v25 }
  0xcb   : > { %v657_v28 = vsel %vm632_vm0, %v652_v18, 0.0 }
  0xcc   : > { %v610_v20 = vpop.f32.mrf.mxu2  ;;  %v658_v34 = vadd.f32 %v657_v28, %v656_v30 }
  0xcd   : > { %v611_v24 = vadd.f32 %v610_v20, %v592_v19  ;;  %v629_v26 = vpop.f32.mrf.mxu3 }
  0xcf   : > { %v630_v29 = vadd.f32 %v629_v26, %v611_v24 }
  0xd1   : > { %636 = vst.msk [vmem:[%s1183_s27 + $0x18] sm:$0xff] %vm632_vm0, %v630_v29  ;;  %v642_v32 = vsel %vm632_vm0, %v630_v29, 0.0  ;;  %v653_v33 = vmul.f32 %v630_v29, %v630_v29 }
  0xd2   : > { %v643_v35 = vadd.f32 %v642_v32, %v641_v31 }
  0xd3   : > { %v659_v36 = vsel %vm632_vm0, %v653_v33, 0.0 }
  0xd4   : > { %v644_v37 = vrot.slane %v643_v35, 4  ;;  %v660_v38 = vadd.f32 %v659_v36, %v658_v34 }
  0xd6   : > { %v645_v39 = vadd.f32 %v644_v37, %v643_v35  ;;  %v661_v40 = vrot.slane %v660_v38, 4 }
  0xd8   : > { %v646_v41 = vrot.slane %v645_v39, 2  ;;  %v662_v42 = vadd.f32 %v661_v40, %v660_v38 }
  0xda   : > { %v647_v43 = vadd.f32 %v646_v41, %v645_v39  ;;  %v663_v44 = vrot.slane %v662_v42, 2 }
  0xdc   : > { %v648_v45 = vrot.slane %v647_v43, 1  ;;  %v664_v46 = vadd.f32 %v663_v44, %v662_v42 }
  0xde   : > { %v665_v47 = vrot.slane %v664_v46, 1  ;;  %v649_v48 = vadd.f32 %v648_v45, %v647_v43 }
  0xe0   : > { %v666_v49 = vadd.f32 %v665_v47, %v664_v46 }
  0xe2   : > { %v668_v50 = vsel %vm667_vm1, %v649_v48, %v666_v49 }
  0xe3   : > { %670 = vst.msk [vmem:[%s251_s4] sm:$0x3] %vm669_vm2, %v668_v50 }
  0xe4 PF: > { %s14_s14 = sadd.s32 1, %s1077_s14   ;;  %s1218_s12 = smov %s1073_s13 }
  0xe5   : > { %p11_p5 = scmp.ge.s32.totalorder %s14_s14, 6   ;;  %s1219_s13 = smov %s1221_s15 }
  0xe7   :  { %13 = sbr.rel (!%p11_p5) target bundleno = 2 (0x2), region = 73 }

// kernel: generator_forward.13
= control target key start
LH: loop header
LB: loop body
LE: loop exit
PB: predicated region body
PF: predicated region fallthrough
CT: control target
= control target key end

     0   :  { %s1089_s12 = smov 0   ;;  %s1091_s13 = smov 0   ;;  %s1291_s0 = inlined_call_operand.vmem [shape: bf16[4,128,256], index: 0, kind: input, shape index: {}]   ;;  %s1292_s1 = inlined_call_operand.vmem [shape: bf16[4,256,32], index: 1, kind: input, shape index: {}]   ;;  %s1293_s2 = inlined_call_operand.vmem [shape: f32[4,128,32], index: 2, kind: output, shape index: {0}]   ;;  %s1294_s3 = inlined_call_operand.vmem [shape: f32[4,1,2,32], index: 3, kind: output, shape index: {1}]  }
   0x1   :  { %s1093_s14 = smov 0  }
   0x2 LB: > { %s26_s15 = sadd.s32 1, %s1063_s13  ;;  %p832_p0 = scmp.ge.s32.totalorder %s1067_s14, 1  ;;  %s1067_s14 = sphi %s1093_s14, %s14_s14   ;;  %s1063_s13 = sphi %s1091_s13, %s1296_s13   ;;  %s1059_s12 = sphi %s1089_s12, %s1295_s12  }
   0x3   : > { %p28_p1 = scmp.ge.s32.totalorder %s26_s15, 4  ;;  %p174_p2 = scmp.lt.s32.totalorder %s1067_s14, 5 }
   0x5   : > { %s1298_s15 = smov (%p28_p1, %s26_s15), 0  ;;  %p175_p3 = pnand %p832_p0, %p174_p2 }
   0x6   : > { %p220_p4 = scmp.lt.s32.totalorder (!%p175_p3), %s1059_s12, 3 }
   0x7   : > { %178 = sbr.rel (%p175_p3) target bundleno = 267 (0x10b), region = 28 }
   0xc   : > { %s1300_s12 = smov (!%p220_p4, %s1059_s12), 3  ;;  %vm574_vm0 = vcmask 261120   ;;  %vm681_vm1 = vcmask 1040384   ;;  %vm683_vm2 = vcmask 254976  }
   0xd   : > { %s1110_s16 = sshll.u32 %s1300_s12, 7  ;;  %s839_s26 = sshll.u32 %s1300_s12, 1 }
   0xe   : > { %s1116_s19 = scalar_lea.vmem %s1292_s1, %s1110_s16  ;;  %s1136_s22 = scalar_lea.vmem %s1291_s0, %s1110_s16 }
   0xf   : > { %v996_v0 = vld [vmem:[%s1116_s19 + $0x38] sm:$0xff]  ;;  %v995_v2 = vld [vmem:[%s1116_s19 + $0x30] sm:$0xff]  ;;  %v994_v4 = vld [vmem:[%s1116_s19 + $0x28] sm:$0xff]  ;;  %s1176_s25 = scalar_lea.vmem %s1293_s2, %s1110_s16  ;;  %s251_s29 = scalar_lea.vmem %s1294_s3, %s839_s26 }
  0x10   : > { %v1004_v1 = vld [vmem:[%s1116_s19 + $0x78] sm:$0xff]  ;;  %476 = vmatpush.bf16.msra.mxu0 %v996_v0  ;;  %v1003_v3 = vld [vmem:[%s1116_s19 + $0x70] sm:$0xff]  ;;  %1005 = vmatpush.bf16.msra.mxu2 %v996_v0  ;;  %v1002_v5 = vld [vmem:[%s1116_s19 + $0x68] sm:$0xff] }
  0x11   : > { %525 = vmatpush.bf16.msra.mxu1 %v1004_v1  ;;  %1013 = vmatpush.bf16.msra.mxu3 %v1004_v1  ;;  %v993_v6 = vld [vmem:[%s1116_s19 + $0x20] sm:$0xff]  ;;  %v992_v8 = vld [vmem:[%s1116_s19 + $0x18] sm:$0xff]  ;;  %v991_v10 = vld [vmem:[%s1116_s19 + $0x10] sm:$0xff] }
  0x12   : > { %v1001_v7 = vld [vmem:[%s1116_s19 + $0x60] sm:$0xff]  ;;  %v1000_v9 = vld [vmem:[%s1116_s19 + $0x58] sm:$0xff]  ;;  %v999_v11 = vld [vmem:[%s1116_s19 + $0x50] sm:$0xff] }
  0x13   : > { %v990_v12 = vld [vmem:[%s1116_s19 + $0x8] sm:$0xff]  ;;  %v989_v14 = vld [vmem:[%s1116_s19] sm:$0xff]  ;;  %v850_v28 = vld [vmem:[%s1136_s22 + $0x10] sm:$0xf] }
  0x14   : > { %477 = vmatpush.bf16.msra.mxu0 %v995_v2  ;;  %1006 = vmatpush.bf16.msra.mxu2 %v995_v2  ;;  %v998_v13 = vld [vmem:[%s1116_s19 + $0x48] sm:$0xff]  ;;  %v997_v15 = vld [vmem:[%s1116_s19 + $0x40] sm:$0xff]  ;;  %v976_v29 = vld [vmem:[%s1136_s22 + $0x14] sm:$0xf0] }
  0x15   : > { %526 = vmatpush.bf16.msra.mxu1 %v1003_v3  ;;  %1014 = vmatpush.bf16.msra.mxu3 %v1003_v3  ;;  %v842_v16 = vld [vmem:[%s1136_s22] sm:$0xf]  ;;  %v974_v17 = vld [vmem:[%s1136_s22 + $0x4] sm:$0xf0]  ;;  %v973_v18 = vld [vmem:[%s1136_s22 + $0x4] sm:$0xf]  ;;  %v851_v36 = vor.u32 %v976_v29, %v850_v28 }
  0x16   : > { %v844_v19 = vld [vmem:[%s1136_s22 + $0x8] sm:$0xf0]  ;;  %v874_v20 = vld [vmem:[%s1136_s22 + $0x40] sm:$0xf]  ;;  %v982_v21 = vld [vmem:[%s1136_s22 + $0x44] sm:$0xf0]  ;;  %v843_v24 = vor.u32 %v974_v17, %v842_v16 }
  0x17   : > { %v981_v22 = vld [vmem:[%s1136_s22 + $0x44] sm:$0xf]  ;;  %v876_v23 = vld [vmem:[%s1136_s22 + $0x48] sm:$0xf0]  ;;  %v847_v25 = vor.u32 %v973_v18, %v844_v19  ;;  %v875_v26 = vor.u32 %v982_v21, %v874_v20  ;;  %v975_v30 = vld [vmem:[%s1136_s22 + $0x14] sm:$0xf] }
  0x18   : > { %478 = vmatpush.bf16.msra.mxu0 %v994_v4  ;;  %1007 = vmatpush.bf16.msra.mxu2 %v994_v4  ;;  %v879_v27 = vor.u32 %v981_v22, %v876_v23  ;;  %v852_v31 = vld [vmem:[%s1136_s22 + $0x18] sm:$0xf0]  ;;  %v882_v32 = vld [vmem:[%s1136_s22 + $0x50] sm:$0xf]  ;;  %v984_v33 = vld [vmem:[%s1136_s22 + $0x54] sm:$0xf0] }
  0x19   : > { %527 = vmatpush.bf16.msra.mxu1 %v1002_v5  ;;  %1015 = vmatpush.bf16.msra.mxu3 %v1002_v5  ;;  %v983_v34 = vld [vmem:[%s1136_s22 + $0x54] sm:$0xf]  ;;  %v884_v35 = vld [vmem:[%s1136_s22 + $0x58] sm:$0xf0]  ;;  %v855_v37 = vor.u32 %v975_v30, %v852_v31  ;;  %v883_v38 = vor.u32 %v984_v33, %v882_v32  ;;  %v858_v40 = vld [vmem:[%s1136_s22 + $0x20] sm:$0xf] }
  0x1a   : > { %v887_v39 = vor.u32 %v983_v34, %v884_v35  ;;  %v978_v41 = vld [vmem:[%s1136_s22 + $0x24] sm:$0xf0]  ;;  %v977_v42 = vld [vmem:[%s1136_s22 + $0x24] sm:$0xf]  ;;  %v860_v43 = vld [vmem:[%s1136_s22 + $0x28] sm:$0xf0] }
  0x1b   : > { %v890_v44 = vld [vmem:[%s1136_s22 + $0x60] sm:$0xf]  ;;  %v986_v45 = vld [vmem:[%s1136_s22 + $0x64] sm:$0xf0]  ;;  %v985_v46 = vld [vmem:[%s1136_s22 + $0x64] sm:$0xf]  ;;  %v859_v48 = vor.u32 %v978_v41, %v858_v40  ;;  %v863_v49 = vor.u32 %v977_v42, %v860_v43 }
  0x1c   : > { %479 = vmatpush.bf16.msra.mxu0 %v993_v6  ;;  %1008 = vmatpush.bf16.msra.mxu2 %v993_v6  ;;  %v892_v47 = vld [vmem:[%s1136_s22 + $0x68] sm:$0xf0]  ;;  %v891_v50 = vor.u32 %v986_v45, %v890_v44  ;;  %v866_v52 = vld [vmem:[%s1136_s22 + $0x30] sm:$0xf]  ;;  %v980_v53 = vld [vmem:[%s1136_s22 + $0x34] sm:$0xf0] }
  0x1d   : > { %528 = vmatpush.bf16.msra.mxu1 %v1001_v7  ;;  %1016 = vmatpush.bf16.msra.mxu3 %v1001_v7  ;;  %v895_v51 = vor.u32 %v985_v46, %v892_v47  ;;  %v979_v54 = vld [vmem:[%s1136_s22 + $0x34] sm:$0xf]  ;;  %v868_v55 = vld [vmem:[%s1136_s22 + $0x38] sm:$0xf0]  ;;  %v898_v56 = vld [vmem:[%s1136_s22 + $0x70] sm:$0xf]  ;;  %v867_v60 = vor.u32 %v980_v53, %v866_v52 }
  0x1e   : > { %v988_v57 = vld [vmem:[%s1136_s22 + $0x74] sm:$0xf0]  ;;  %v987_v58 = vld [vmem:[%s1136_s22 + $0x74] sm:$0xf]  ;;  %v900_v59 = vld [vmem:[%s1136_s22 + $0x78] sm:$0xf0]  ;;  %v871_v61 = vor.u32 %v979_v54, %v868_v55 }
  0x1f   : > { %v899_v62 = vor.u32 %v988_v57, %v898_v56  ;;  %v903_v63 = vor.u32 %v987_v58, %v900_v59 }
  0x20   : > { %480 = vmatpush.bf16.msra.mxu0 %v992_v8  ;;  %1009 = vmatpush.bf16.msra.mxu2 %v992_v8 }
  0x21   : > { %529 = vmatpush.bf16.msra.mxu1 %v1000_v9  ;;  %1017 = vmatpush.bf16.msra.mxu3 %v1000_v9 }
  0x24   : > { %481 = vmatpush.bf16.msra.mxu0 %v991_v10  ;;  %1010 = vmatpush.bf16.msra.mxu2 %v991_v10 }
  0x25   : > { %530 = vmatpush.bf16.msra.mxu1 %v999_v11  ;;  %1018 = vmatpush.bf16.msra.mxu3 %v999_v11 }
  0x28   : > { %482 = vmatpush.bf16.msra.mxu0 %v990_v12  ;;  %1011 = vmatpush.bf16.msra.mxu2 %v990_v12 }
  0x29   : > { %531 = vmatpush.bf16.msra.mxu1 %v998_v13  ;;  %1019 = vmatpush.bf16.msra.mxu3 %v998_v13 }
  0x2c   : > { %483 = vmatpush.bf16.msra.mxu0 %v989_v14  ;;  %1012 = vmatpush.bf16.msra.mxu2 %v989_v14 }
  0x2d   : > { %532 = vmatpush.bf16.msra.mxu1 %v997_v15  ;;  %1020 = vmatpush.bf16.msra.mxu3 %v997_v15 }
  0x2f   : > { %484 = vmatmul.bf16.vlgmr.msra.gmra.mxu0 %v843_v24  ;;  %504 = vmatmul.bf16.vlgmr.msra.gmra.mxu2 %v875_v26 }
  0x30   : > { %533 = vmatmul.bf16.vlgmr.msra.gmra.mxu1 %v847_v25  ;;  %553 = vmatmul.bf16.vlgmr.msra.gmra.mxu3 %v879_v27 }
  0x3f   : > { %489 = vmatmul.bf16.gmra.mxu0 %v851_v36  ;;  %509 = vmatmul.bf16.gmra.mxu2 %v883_v38 }
  0x40   : > { %538 = vmatmul.bf16.gmra.mxu1 %v855_v37  ;;  %558 = vmatmul.bf16.gmra.mxu3 %v887_v39 }
  0x4f   : > { %494 = vmatmul.bf16.gmra.mxu0 %v859_v48  ;;  %514 = vmatmul.bf16.gmra.mxu2 %v891_v50 }
  0x50   : > { %543 = vmatmul.bf16.gmra.mxu1 %v863_v49  ;;  %563 = vmatmul.bf16.gmra.mxu3 %v895_v51 }
  0x5f   : > { %499 = vmatmul.bf16.gmra.mxu0 %v867_v60  ;;  %519 = vmatmul.bf16.gmra.mxu2 %v899_v62 }
  0x60   : > { %548 = vmatmul.bf16.gmra.mxu1 %v871_v61  ;;  %568 = vmatmul.bf16.gmra.mxu3 %v903_v63 }
  0xac   : > { %v485_v0 = vpop.f32.mrf.mxu0 }
  0xad   : > { %v534_v1 = vpop.f32.mrf.mxu1 }
  0xae   : > { %v535_v2 = vadd.f32 %v534_v1, %v485_v0 }
  0xb0   : > { %575 = vst.msk [vmem:[%s1176_s25] sm:$0xff] %vm574_vm0, %v535_v2  ;;  %v628_v34 = vmul.f32 %v535_v2, %v535_v2  ;;  %v591_v37 = vsel %vm574_vm0, %v535_v2, 0.0 }
  0xb2   : > { %v505_v3 = vpop.f32.mrf.mxu2  ;;  %v644_v43 = vsel %vm574_vm0, %v628_v34, 0.0 }
  0xb3   : > { %v554_v4 = vpop.f32.mrf.mxu3 }
  0xb4   : > { %v487_v5 = vpop.f32.mrf.mxu0  ;;  %v1180_v7 = vadd.f32 %v554_v4, %v505_v3 }
  0xb5   : > { %v536_v6 = vpop.f32.mrf.mxu1 }
  0xb6   : > { %v537_v8 = vadd.f32 %v536_v6, %v487_v5  ;;  %583 = vst.msk [vmem:[%s1176_s25 + $0x40] sm:$0xff] %vm574_vm0, %v1180_v7 }
  0xb8   : > { %576 = vst.msk [vmem:[%s1176_s25 + $0x8] sm:$0xff] %vm574_vm0, %v537_v8  ;;  %v629_v33 = vmul.f32 %v537_v8, %v537_v8  ;;  %v592_v35 = vsel %vm574_vm0, %v537_v8, 0.0 }
  0xb9   : > { %v593_v44 = vadd.f32 %v592_v35, %v591_v37 }
  0xba   : > { %v507_v9 = vpop.f32.mrf.mxu2  ;;  %v645_v38 = vsel %vm574_vm0, %v629_v33, 0.0 }
  0xbb   : > { %v556_v10 = vpop.f32.mrf.mxu3  ;;  %v646_v52 = vadd.f32 %v645_v38, %v644_v43 }
  0xbc   : > { %v490_v11 = vpop.f32.mrf.mxu0  ;;  %v1187_v13 = vadd.f32 %v556_v10, %v507_v9 }
  0xbd   : > { %v539_v12 = vpop.f32.mrf.mxu1 }
  0xbe   : > { %v540_v14 = vadd.f32 %v539_v12, %v490_v11  ;;  %584 = vst.msk [vmem:[%s1176_s25 + $0x48] sm:$0xff] %vm574_vm0, %v1187_v13 }
  0xc0   : > { %577 = vst.msk [vmem:[%s1176_s25 + $0x10] sm:$0xff] %vm574_vm0, %v540_v14  ;;  %v630_v36 = vmul.f32 %v540_v14, %v540_v14  ;;  %v594_v39 = vsel %vm574_vm0, %v540_v14, 0.0 }
  0xc1   : > { %v595_v53 = vadd.f32 %v594_v39, %v593_v44 }
  0xc2   : > { %v510_v15 = vpop.f32.mrf.mxu2  ;;  %v647_v48 = vsel %vm574_vm0, %v630_v36, 0.0 }
  0xc3   : > { %v559_v16 = vpop.f32.mrf.mxu3  ;;  %v648_v57 = vadd.f32 %v647_v48, %v646_v52 }
  0xc4   : > { %v492_v17 = vpop.f32.mrf.mxu0  ;;  %v1194_v19 = vadd.f32 %v559_v16, %v510_v15  ;;  %v636_v15 = vmul.f32 %v1180_v7, %v1180_v7 }
  0xc5   : > { %v541_v18 = vpop.f32.mrf.mxu1 }
  0xc6   : > { %v542_v20 = vadd.f32 %v541_v18, %v492_v17  ;;  %585 = vst.msk [vmem:[%s1176_s25 + $0x50] sm:$0xff] %vm574_vm0, %v1194_v19  ;;  %v610_v36 = vsel %vm574_vm0, %v1194_v19, 0.0 }
  0xc8   : > { %578 = vst.msk [vmem:[%s1176_s25 + $0x18] sm:$0xff] %vm574_vm0, %v542_v20  ;;  %v631_v40 = vmul.f32 %v542_v20, %v542_v20  ;;  %v596_v49 = vsel %vm574_vm0, %v542_v20, 0.0 }
  0xc9   : > { %v597_v58 = vadd.f32 %v596_v49, %v595_v53 }
  0xca   : > { %v512_v21 = vpop.f32.mrf.mxu2  ;;  %v649_v54 = vsel %vm574_vm0, %v631_v40, 0.0 }
  0xcb   : > { %v561_v22 = vpop.f32.mrf.mxu3  ;;  %v650_v62 = vadd.f32 %v649_v54, %v648_v57 }
  0xcc   : > { %v495_v23 = vpop.f32.mrf.mxu0  ;;  %v1201_v25 = vadd.f32 %v561_v22, %v512_v21  ;;  %v606_v21 = vsel %vm574_vm0, %v1180_v7, 0.0  ;;  %v637_v22 = vmul.f32 %v1187_v13, %v1187_v13 }
  0xcd   : > { %v544_v24 = vpop.f32.mrf.mxu1 }
  0xce   : > { %v545_v26 = vadd.f32 %v544_v24, %v495_v23  ;;  %586 = vst.msk [vmem:[%s1176_s25 + $0x58] sm:$0xff] %vm574_vm0, %v1201_v25  ;;  %v661_v35 = vsel %vm574_vm0, %v637_v22, 0.0  ;;  %v639_v37 = vmul.f32 %v1201_v25, %v1201_v25  ;;  %v612_v40 = vsel %vm574_vm0, %v1201_v25, 0.0 }
  0xd0   : > { %579 = vst.msk [vmem:[%s1176_s25 + $0x20] sm:$0xff] %vm574_vm0, %v545_v26  ;;  %v632_v50 = vmul.f32 %v545_v26, %v545_v26  ;;  %v598_v55 = vsel %vm574_vm0, %v545_v26, 0.0  ;;  %v665_v44 = vsel %vm574_vm0, %v639_v37, 0.0 }
  0xd1   : > { %v599_v63 = vadd.f32 %v598_v55, %v597_v58 }
  0xd2   : > { %v515_v27 = vpop.f32.mrf.mxu2  ;;  %v651_v59 = vsel %vm574_vm0, %v632_v50, 0.0 }
  0xd3   : > { %v564_v28 = vpop.f32.mrf.mxu3  ;;  %v652_v4 = vadd.f32 %v651_v59, %v650_v62 }
  0xd4   : > { %v497_v29 = vpop.f32.mrf.mxu0  ;;  %v1208_v31 = vadd.f32 %v564_v28, %v515_v27  ;;  %v659_v27 = vsel %vm574_vm0, %v636_v15, 0.0  ;;  %v608_v28 = vsel %vm574_vm0, %v1187_v13, 0.0 }
  0xd5   : > { %v546_v30 = vpop.f32.mrf.mxu1 }
  0xd6   : > { %v547_v32 = vadd.f32 %v546_v30, %v497_v29  ;;  %587 = vst.msk [vmem:[%s1176_s25 + $0x60] sm:$0xff] %vm574_vm0, %v1208_v31  ;;  %v638_v29 = vmul.f32 %v1194_v19, %v1194_v19  ;;  %v614_v19 = vsel %vm574_vm0, %v1208_v31, 0.0 }
  0xd8   : > { %580 = vst.msk [vmem:[%s1176_s25 + $0x28] sm:$0xff] %vm574_vm0, %v547_v32  ;;  %v633_v56 = vmul.f32 %v547_v32, %v547_v32  ;;  %v600_v60 = vsel %vm574_vm0, %v547_v32, 0.0  ;;  %v663_v13 = vsel %vm574_vm0, %v638_v29, 0.0 }
  0xd9   : > { %v601_v5 = vadd.f32 %v600_v60, %v599_v63 }
  0xda   : > { %v517_v41 = vpop.f32.mrf.mxu2  ;;  %v653_v0 = vsel %vm574_vm0, %v633_v56, 0.0 }
  0xdb   : > { %v566_v42 = vpop.f32.mrf.mxu3  ;;  %v654_v12 = vadd.f32 %v653_v0, %v652_v4 }
  0xdc   : > { %v500_v45 = vpop.f32.mrf.mxu0  ;;  %v1220_v47 = vadd.f32 %v566_v42, %v517_v41  ;;  %v640_v41 = vmul.f32 %v1208_v31, %v1208_v31 }
  0xdd   : > { %v549_v46 = vpop.f32.mrf.mxu1 }
  0xde   : > { %v550_v51 = vadd.f32 %v549_v46, %v500_v45  ;;  %588 = vst.msk [vmem:[%s1176_s25 + $0x68] sm:$0xff] %vm574_vm0, %v1220_v47  ;;  %v641_v45 = vmul.f32 %v1220_v47, %v1220_v47  ;;  %v667_v49 = vsel %vm574_vm0, %v640_v41, 0.0  ;;  %v616_v25 = vsel %vm574_vm0, %v1220_v47, 0.0 }
  0xe0   : > { %581 = vst.msk [vmem:[%s1176_s25 + $0x30] sm:$0xff] %vm574_vm0, %v550_v51  ;;  %v634_v61 = vmul.f32 %v550_v51, %v550_v51  ;;  %v602_v1 = vsel %vm574_vm0, %v550_v51, 0.0  ;;  %v669_v53 = vsel %vm574_vm0, %v641_v45, 0.0 }
  0xe1   : > { %v603_v14 = vadd.f32 %v602_v1, %v601_v5 }
  0xe2   : > { %v520_v2 = vpop.f32.mrf.mxu2  ;;  %v655_v10 = vsel %vm574_vm0, %v634_v61, 0.0 }
  0xe3   : > { %v569_v3 = vpop.f32.mrf.mxu3  ;;  %v656_v18 = vadd.f32 %v655_v10, %v654_v12 }
  0xe4   : > { %v502_v6 = vpop.f32.mrf.mxu0  ;;  %v570_v9 = vadd.f32 %v569_v3, %v520_v2 }
  0xe5   : > { %v551_v8 = vpop.f32.mrf.mxu1 }
  0xe6   : > { %v552_v11 = vadd.f32 %v551_v8, %v502_v6  ;;  %589 = vst.msk [vmem:[%s1176_s25 + $0x70] sm:$0xff] %vm574_vm0, %v570_v9  ;;  %v642_v50 = vmul.f32 %v570_v9, %v570_v9  ;;  %v618_v54 = vsel %vm574_vm0, %v570_v9, 0.0 }
  0xe8   : > { %582 = vst.msk [vmem:[%s1176_s25 + $0x38] sm:$0xff] %vm574_vm0, %v552_v11  ;;  %v604_v16 = vsel %vm574_vm0, %v552_v11, 0.0  ;;  %v635_v17 = vmul.f32 %v552_v11, %v552_v11  ;;  %v671_v57 = vsel %vm574_vm0, %v642_v50, 0.0 }
  0xe9   : > { %v605_v20 = vadd.f32 %v604_v16, %v603_v14 }
  0xea   : > { %v657_v23 = vsel %vm574_vm0, %v635_v17, 0.0  ;;  %v522_v30 = vpop.f32.mrf.mxu2 }
  0xeb   : > { %v607_v24 = vadd.f32 %v606_v21, %v605_v20  ;;  %v658_v26 = vadd.f32 %v657_v23, %v656_v18  ;;  %v571_v32 = vpop.f32.mrf.mxu3 }
  0xec   : > { %v572_v34 = vadd.f32 %v571_v32, %v522_v30 }
  0xed   : > { %v609_v33 = vadd.f32 %v608_v28, %v607_v24  ;;  %v660_v7 = vadd.f32 %v659_v27, %v658_v26 }
  0xee   : > { %590 = vst.msk [vmem:[%s1176_s25 + $0x78] sm:$0xff] %vm574_vm0, %v572_v34  ;;  %v643_v55 = vmul.f32 %v572_v34, %v572_v34  ;;  %v620_v58 = vsel %vm574_vm0, %v572_v34, 0.0 }
  0xef   : > { %v611_v38 = vadd.f32 %v610_v36, %v609_v33  ;;  %v662_v39 = vadd.f32 %v661_v35, %v660_v7 }
  0xf0   : > { %v673_v61 = vsel %vm574_vm0, %v643_v55, 0.0 }
  0xf1   : > { %v664_v42 = vadd.f32 %v663_v13, %v662_v39  ;;  %v613_v43 = vadd.f32 %v612_v40, %v611_v38 }
  0xf3   : > { %v615_v46 = vadd.f32 %v614_v19, %v613_v43  ;;  %v666_v48 = vadd.f32 %v665_v44, %v664_v42 }
  0xf5   : > { %v617_v51 = vadd.f32 %v616_v25, %v615_v46  ;;  %v668_v52 = vadd.f32 %v667_v49, %v666_v48 }
  0xf7   : > { %v619_v56 = vadd.f32 %v618_v54, %v617_v51  ;;  %v670_v31 = vadd.f32 %v669_v53, %v668_v52 }
  0xf9   : > { %v672_v59 = vadd.f32 %v671_v57, %v670_v31  ;;  %v621_v60 = vadd.f32 %v620_v58, %v619_v56 }
  0xfb   : > { %v622_v47 = vrot.slane %v621_v60, 4  ;;  %v674_v62 = vadd.f32 %v673_v61, %v672_v59 }
  0xfd   : > { %v623_v63 = vadd.f32 %v622_v47, %v621_v60  ;;  %v675_v0 = vrot.slane %v674_v62, 4 }
  0xff   : > { %v624_v1 = vrot.slane %v623_v63, 2  ;;  %v676_v2 = vadd.f32 %v675_v0, %v674_v62 }
 0x101   : > { %v625_v3 = vadd.f32 %v624_v1, %v623_v63  ;;  %v677_v4 = vrot.slane %v676_v2, 2 }
 0x103   : > { %v626_v5 = vrot.slane %v625_v3, 1  ;;  %v678_v6 = vadd.f32 %v677_v4, %v676_v2 }
 0x105   : > { %v679_v8 = vrot.slane %v678_v6, 1  ;;  %v627_v9 = vadd.f32 %v626_v5, %v625_v3 }
 0x107   : > { %v680_v10 = vadd.f32 %v679_v8, %v678_v6 }
 0x109   : > { %v682_v11 = vsel %vm681_vm1, %v627_v9, %v680_v10 }
 0x10a   : > { %684 = vst.msk [vmem:[%s251_s29] sm:$0x3] %vm683_vm2, %v682_v11 }
 0x10b PF: > { %s14_s14 = sadd.s32 1, %s1067_s14   ;;  %s1295_s12 = smov %s1063_s13 }
 0x10c   : > { %p11_p5 = scmp.ge.s32.totalorder %s14_s14, 6   ;;  %s1296_s13 = smov %s1298_s15 }
 0x10e   :  { %13 = sbr.rel (!%p11_p5) target bundleno = 2 (0x2), region = 73 }

// kernel: generator_forward.14
= control target key start
LH: loop header
LB: loop body
LE: loop exit
PB: predicated region body
PF: predicated region fallthrough
CT: control target
= control target key end

     0   :  { %vm342_vm0 = vcmask 257024   ;;  %s1019_s0 = inlined_call_operand.vmem [shape: f32[512,32], index: 0, kind: input, shape index: {}]   ;;  %s1020_s1 = inlined_call_operand.vmem [shape: f32[1,32], index: 1, kind: input, shape index: {}]   ;;  %s1021_s2 = inlined_call_operand.vmem [shape: f32[1,32], index: 2, kind: input, shape index: {}]   ;;  %s1022_s3 = inlined_call_operand.vmem [shape: bf16[512,32], index: 3, kind: output, shape index: {}]  }
   0x1   :  { %v14_v0 = vld [vmem:[%s1019_s0] sm:$0xff]  ;;  %v15_v3 = vld [vmem:[%s1019_s0 + $0x8] sm:$0xff]  ;;  %v16_v6 = vld [vmem:[%s1019_s0 + $0x10] sm:$0xff] }
   0x2   :  { %v439_v1 = vld [vmem:[%s1020_s1] ss:$0 sm:$0xff]  ;;  %v17_v7 = vld [vmem:[%s1019_s0 + $0x18] sm:$0xff]  ;;  %v19_v12 = vld [vmem:[%s1019_s0 + $0x28] sm:$0xff] }
   0x3   :  { %v444_v2 = vld [vmem:[%s1021_s2] ss:$0 sm:$0xff]  ;;  %v82_v4 = vmul.f32 %v439_v1, %v14_v0  ;;  %v83_v5 = vmul.f32 %v439_v1, %v15_v3  ;;  %v84_v9 = vmul.f32 %v439_v1, %v16_v6  ;;  %v85_v10 = vmul.f32 %v439_v1, %v17_v7  ;;  %v20_v13 = vld [vmem:[%s1019_s0 + $0x30] sm:$0xff]  ;;  %v21_v14 = vld [vmem:[%s1019_s0 + $0x38] sm:$0xff] }
   0x4   :  { %v18_v8 = vld [vmem:[%s1019_s0 + $0x20] sm:$0xff]  ;;  %v87_v17 = vmul.f32 %v439_v1, %v19_v12  ;;  %v88_v18 = vmul.f32 %v439_v1, %v20_v13  ;;  %v89_v22 = vmul.f32 %v439_v1, %v21_v14  ;;  %v23_v32 = vld [vmem:[%s1019_s0 + $0x48] sm:$0xff]  ;;  %v24_v37 = vld [vmem:[%s1019_s0 + $0x50] sm:$0xff] }
   0x5   :  { %v86_v11 = vmul.f32 %v439_v1, %v18_v8  ;;  %v150_v15 = vadd.f32 %v444_v2, %v82_v4  ;;  %v151_v16 = vadd.f32 %v444_v2, %v83_v5  ;;  %v152_v19 = vadd.f32 %v444_v2, %v84_v9  ;;  %v22_v31 = vld [vmem:[%s1019_s0 + $0x40] sm:$0xff]  ;;  %v25_v38 = vld [vmem:[%s1019_s0 + $0x58] sm:$0xff]  ;;  %v27_v44 = vld [vmem:[%s1019_s0 + $0x68] sm:$0xff] }
   0x6   :  { %v153_v20 = vadd.f32 %v444_v2, %v85_v10  ;;  %v155_v25 = vadd.f32 %v444_v2, %v87_v17  ;;  %v156_v26 = vadd.f32 %v444_v2, %v88_v18  ;;  %v157_v30 = vadd.f32 %v444_v2, %v89_v22  ;;  %v26_v39 = vld [vmem:[%s1019_s0 + $0x60] sm:$0xff]  ;;  %v28_v45 = vld [vmem:[%s1019_s0 + $0x70] sm:$0xff]  ;;  %v29_v50 = vld [vmem:[%s1019_s0 + $0x78] sm:$0xff] }
   0x7   :  { %v154_v21 = vadd.f32 %v444_v2, %v86_v11  ;;  %v214_v23 = vmax.f32 %v150_v15, 0.0  ;;  %v215_v24 = vmax.f32 %v151_v16, 0.0  ;;  %v216_v27 = vmax.f32 %v152_v19, 0.0  ;;  %v30_v5 = vld [vmem:[%s1019_s0 + $0x80] sm:$0xff]  ;;  %v31_v6 = vld [vmem:[%s1019_s0 + $0x88] sm:$0xff]  ;;  %v32_v11 = vld [vmem:[%s1019_s0 + $0x90] sm:$0xff] }
   0x8   :  { %v217_v28 = vmax.f32 %v153_v20, 0.0  ;;  %v219_v35 = vmax.f32 %v155_v25, 0.0  ;;  %v220_v36 = vmax.f32 %v156_v26, 0.0  ;;  %v221_v43 = vmax.f32 %v157_v30, 0.0  ;;  %v33_v16 = vld [vmem:[%s1019_s0 + $0x98] sm:$0xff]  ;;  %v34_v17 = vld [vmem:[%s1019_s0 + $0xa0] sm:$0xff] }
   0x9   :  { %v218_v29 = vmax.f32 %v154_v21, 0.0  ;;  %v278_v33 = vpack.c.bf16 %v214_v23, %v214_v23  ;;  %v279_v34 = vpack.c.bf16 %v215_v24, %v215_v24  ;;  %v280_v40 = vpack.c.bf16 %v216_v27, %v216_v27  ;;  %v35_v22 = vld [vmem:[%s1019_s0 + $0xa8] sm:$0xff]  ;;  %v36_v23 = vld [vmem:[%s1019_s0 + $0xb0] sm:$0xff] }
   0xa   :  { %v281_v41 = vpack.c.bf16 %v217_v28, %v217_v28  ;;  %v283_v46 = vpack.c.bf16 %v219_v35, %v219_v35  ;;  %v284_v47 = vpack.c.bf16 %v220_v36, %v220_v36  ;;  %v90_v48 = vmul.f32 %v439_v1, %v22_v31  ;;  %v37_v28 = vld [vmem:[%s1019_s0 + $0xb8] sm:$0xff] }
   0xb   :  { %v282_v42 = vpack.c.bf16 %v218_v29, %v218_v29  ;;  %343 = vst.msk [vmem:[%s1022_s3] sm:$0xf] %vm342_vm0, %v278_v33  ;;  %v91_v49 = vmul.f32 %v439_v1, %v23_v32  ;;  %v285_v51 = vpack.c.bf16 %v221_v43, %v221_v43  ;;  %v92_v52 = vmul.f32 %v439_v1, %v24_v37 }
   0xc   :  { %344 = vst.msk [vmem:[%s1022_s3 + $0x4] sm:$0xf] %vm342_vm0, %v279_v34  ;;  %v93_v53 = vmul.f32 %v439_v1, %v25_v38  ;;  %v94_v54 = vmul.f32 %v439_v1, %v26_v39  ;;  %v158_v55 = vadd.f32 %v444_v2, %v90_v48  ;;  %v95_v57 = vmul.f32 %v439_v1, %v27_v44 }
   0xd   :  { %345 = vst.msk [vmem:[%s1022_s3 + $0x8] sm:$0xf] %vm342_vm0, %v280_v40  ;;  %v159_v56 = vadd.f32 %v444_v2, %v91_v49  ;;  %v96_v58 = vmul.f32 %v439_v1, %v28_v45  ;;  %v160_v59 = vadd.f32 %v444_v2, %v92_v52  ;;  %v97_v62 = vmul.f32 %v439_v1, %v29_v50  ;;  %v38_v45 = vld [vmem:[%s1019_s0 + $0xc0] sm:$0xff] }
   0xe   :  { %346 = vst.msk [vmem:[%s1022_s3 + $0xc] sm:$0xf] %vm342_vm0, %v281_v41  ;;  %v161_v60 = vadd.f32 %v444_v2, %v93_v53  ;;  %v162_v61 = vadd.f32 %v444_v2, %v94_v54  ;;  %v222_v63 = vmax.f32 %v158_v55, 0.0  ;;  %v163_v3 = vadd.f32 %v444_v2, %v95_v57  ;;  %v42_v57 = vld [vmem:[%s1019_s0 + $0xe0] sm:$0xff] }
   0xf   :  { %347 = vst.msk [vmem:[%s1022_s3 + $0x10] sm:$0xf] %vm342_vm0, %v282_v42  ;;  %v223_v0 = vmax.f32 %v159_v56, 0.0  ;;  %v164_v4 = vadd.f32 %v444_v2, %v96_v58  ;;  %v224_v7 = vmax.f32 %v160_v59, 0.0  ;;  %v165_v10 = vadd.f32 %v444_v2, %v97_v62  ;;  %v41_v56 = vld [vmem:[%s1019_s0 + $0xd8] sm:$0xff]  ;;  %v43_v62 = vld [vmem:[%s1019_s0 + $0xe8] sm:$0xff] }
  0x10   :  { %348 = vst.msk [vmem:[%s1022_s3 + $0x14] sm:$0xf] %vm342_vm0, %v283_v46  ;;  %v225_v8 = vmax.f32 %v161_v60, 0.0  ;;  %v226_v9 = vmax.f32 %v162_v61, 0.0  ;;  %v286_v12 = vpack.c.bf16 %v222_v63, %v222_v63  ;;  %v227_v14 = vmax.f32 %v163_v3, 0.0  ;;  %v39_v46 = vld [vmem:[%s1019_s0 + $0xc8] sm:$0xff] }
  0x11   :  { %349 = vst.msk [vmem:[%s1022_s3 + $0x18] sm:$0xf] %vm342_vm0, %v284_v47  ;;  %v287_v13 = vpack.c.bf16 %v223_v0, %v223_v0  ;;  %v228_v15 = vmax.f32 %v164_v4, 0.0  ;;  %v288_v18 = vpack.c.bf16 %v224_v7, %v224_v7  ;;  %v229_v21 = vmax.f32 %v165_v10, 0.0  ;;  %v44_v63 = vld [vmem:[%s1019_s0 + $0xf0] sm:$0xff] }
  0x12   :  { %350 = vst.msk [vmem:[%s1022_s3 + $0x1c] sm:$0xf] %vm342_vm0, %v285_v51  ;;  %v289_v19 = vpack.c.bf16 %v225_v8, %v225_v8  ;;  %v290_v20 = vpack.c.bf16 %v226_v9, %v226_v9  ;;  %v291_v24 = vpack.c.bf16 %v227_v14, %v227_v14  ;;  %v98_v26 = vmul.f32 %v439_v1, %v30_v5  ;;  %v40_v51 = vld [vmem:[%s1019_s0 + $0xd0] sm:$0xff] }
  0x13   :  { %351 = vst.msk [vmem:[%s1022_s3 + $0x20] sm:$0xf] %vm342_vm0, %v286_v12  ;;  %v292_v25 = vpack.c.bf16 %v228_v15, %v228_v15  ;;  %v99_v27 = vmul.f32 %v439_v1, %v31_v6  ;;  %v293_v29 = vpack.c.bf16 %v229_v21, %v229_v21  ;;  %v100_v30 = vmul.f32 %v439_v1, %v32_v11  ;;  %v45_v6 = vld [vmem:[%s1019_s0 + $0xf8] sm:$0xff] }
  0x14   :  { %352 = vst.msk [vmem:[%s1022_s3 + $0x24] sm:$0xf] %vm342_vm0, %v287_v13  ;;  %v101_v31 = vmul.f32 %v439_v1, %v33_v16  ;;  %v102_v32 = vmul.f32 %v439_v1, %v34_v17  ;;  %v166_v33 = vadd.f32 %v444_v2, %v98_v26  ;;  %v103_v35 = vmul.f32 %v439_v1, %v35_v22 }
  0x15   :  { %353 = vst.msk [vmem:[%s1022_s3 + $0x28] sm:$0xf] %vm342_vm0, %v288_v18  ;;  %v167_v34 = vadd.f32 %v444_v2, %v99_v27  ;;  %v104_v36 = vmul.f32 %v439_v1, %v36_v23  ;;  %v168_v37 = vadd.f32 %v444_v2, %v100_v30  ;;  %v105_v40 = vmul.f32 %v439_v1, %v37_v28  ;;  %v46_v23 = vld [vmem:[%s1019_s0 + $0x100] sm:$0xff] }
  0x16   :  { %354 = vst.msk [vmem:[%s1022_s3 + $0x2c] sm:$0xf] %vm342_vm0, %v289_v19  ;;  %v169_v38 = vadd.f32 %v444_v2, %v101_v31  ;;  %v170_v39 = vadd.f32 %v444_v2, %v102_v32  ;;  %v230_v41 = vmax.f32 %v166_v33, 0.0  ;;  %v171_v43 = vadd.f32 %v444_v2, %v103_v35  ;;  %v50_v35 = vld [vmem:[%s1019_s0 + $0x120] sm:$0xff] }
  0x17   :  { %355 = vst.msk [vmem:[%s1022_s3 + $0x30] sm:$0xf] %vm342_vm0, %v290_v20  ;;  %v231_v42 = vmax.f32 %v167_v34, 0.0  ;;  %v172_v44 = vadd.f32 %v444_v2, %v104_v36  ;;  %v232_v47 = vmax.f32 %v168_v37, 0.0  ;;  %v173_v50 = vadd.f32 %v444_v2, %v105_v40  ;;  %v49_v34 = vld [vmem:[%s1019_s0 + $0x118] sm:$0xff]  ;;  %v51_v40 = vld [vmem:[%s1019_s0 + $0x128] sm:$0xff] }
  0x18   :  { %356 = vst.msk [vmem:[%s1022_s3 + $0x34] sm:$0xf] %vm342_vm0, %v291_v24  ;;  %v233_v48 = vmax.f32 %v169_v38, 0.0  ;;  %v234_v49 = vmax.f32 %v170_v39, 0.0  ;;  %v294_v52 = vpack.c.bf16 %v230_v41, %v230_v41  ;;  %v235_v54 = vmax.f32 %v171_v43, 0.0  ;;  %v47_v24 = vld [vmem:[%s1019_s0 + $0x108] sm:$0xff] }
  0x19   :  { %357 = vst.msk [vmem:[%s1022_s3 + $0x38] sm:$0xf] %vm342_vm0, %v292_v25  ;;  %v295_v53 = vpack.c.bf16 %v231_v42, %v231_v42  ;;  %v236_v55 = vmax.f32 %v172_v44, 0.0  ;;  %v296_v58 = vpack.c.bf16 %v232_v47, %v232_v47  ;;  %v237_v61 = vmax.f32 %v173_v50, 0.0  ;;  %v52_v41 = vld [vmem:[%s1019_s0 + $0x130] sm:$0xff] }
  0x1a   :  { %358 = vst.msk [vmem:[%s1022_s3 + $0x3c] sm:$0xf] %vm342_vm0, %v293_v29  ;;  %v297_v59 = vpack.c.bf16 %v233_v48, %v233_v48  ;;  %v298_v60 = vpack.c.bf16 %v234_v49, %v234_v49  ;;  %v299_v0 = vpack.c.bf16 %v235_v54, %v235_v54  ;;  %v106_v4 = vmul.f32 %v439_v1, %v38_v45  ;;  %v48_v29 = vld [vmem:[%s1019_s0 + $0x110] sm:$0xff] }
  0x1b   :  { %359 = vst.msk [vmem:[%s1022_s3 + $0x40] sm:$0xf] %vm342_vm0, %v294_v52  ;;  %v300_v3 = vpack.c.bf16 %v236_v55, %v236_v55  ;;  %v107_v5 = vmul.f32 %v439_v1, %v39_v46  ;;  %v301_v7 = vpack.c.bf16 %v237_v61, %v237_v61  ;;  %v108_v8 = vmul.f32 %v439_v1, %v40_v51  ;;  %v53_v46 = vld [vmem:[%s1019_s0 + $0x138] sm:$0xff] }
  0x1c   :  { %360 = vst.msk [vmem:[%s1022_s3 + $0x44] sm:$0xf] %vm342_vm0, %v295_v53  ;;  %v109_v9 = vmul.f32 %v439_v1, %v41_v56  ;;  %v110_v10 = vmul.f32 %v439_v1, %v42_v57  ;;  %v174_v11 = vadd.f32 %v444_v2, %v106_v4  ;;  %v111_v13 = vmul.f32 %v439_v1, %v43_v62 }
  0x1d   :  { %361 = vst.msk [vmem:[%s1022_s3 + $0x48] sm:$0xf] %vm342_vm0, %v296_v58  ;;  %v175_v12 = vadd.f32 %v444_v2, %v107_v5  ;;  %v112_v14 = vmul.f32 %v439_v1, %v44_v63  ;;  %v176_v15 = vadd.f32 %v444_v2, %v108_v8  ;;  %v113_v18 = vmul.f32 %v439_v1, %v45_v6  ;;  %v54_v63 = vld [vmem:[%s1019_s0 + $0x140] sm:$0xff] }
  0x1e   :  { %362 = vst.msk [vmem:[%s1022_s3 + $0x4c] sm:$0xf] %vm342_vm0, %v297_v59  ;;  %v177_v16 = vadd.f32 %v444_v2, %v109_v9  ;;  %v178_v17 = vadd.f32 %v444_v2, %v110_v10  ;;  %v238_v19 = vmax.f32 %v174_v11, 0.0  ;;  %v179_v21 = vadd.f32 %v444_v2, %v111_v13  ;;  %v58_v13 = vld [vmem:[%s1019_s0 + $0x160] sm:$0xff] }
  0x1f   :  { %363 = vst.msk [vmem:[%s1022_s3 + $0x50] sm:$0xf] %vm342_vm0, %v298_v60  ;;  %v239_v20 = vmax.f32 %v175_v12, 0.0  ;;  %v180_v22 = vadd.f32 %v444_v2, %v112_v14  ;;  %v240_v25 = vmax.f32 %v176_v15, 0.0  ;;  %v181_v28 = vadd.f32 %v444_v2, %v113_v18  ;;  %v57_v12 = vld [vmem:[%s1019_s0 + $0x158] sm:$0xff]  ;;  %v59_v18 = vld [vmem:[%s1019_s0 + $0x168] sm:$0xff] }
  0x20   :  { %364 = vst.msk [vmem:[%s1022_s3 + $0x54] sm:$0xf] %vm342_vm0, %v299_v0  ;;  %v241_v26 = vmax.f32 %v177_v16, 0.0  ;;  %v242_v27 = vmax.f32 %v178_v17, 0.0  ;;  %v302_v30 = vpack.c.bf16 %v238_v19, %v238_v19  ;;  %v243_v32 = vmax.f32 %v179_v21, 0.0  ;;  %v55_v0 = vld [vmem:[%s1019_s0 + $0x148] sm:$0xff] }
  0x21   :  { %365 = vst.msk [vmem:[%s1022_s3 + $0x58] sm:$0xf] %vm342_vm0, %v300_v3  ;;  %v303_v31 = vpack.c.bf16 %v239_v20, %v239_v20  ;;  %v244_v33 = vmax.f32 %v180_v22, 0.0  ;;  %v304_v36 = vpack.c.bf16 %v240_v25, %v240_v25  ;;  %v245_v39 = vmax.f32 %v181_v28, 0.0  ;;  %v60_v19 = vld [vmem:[%s1019_s0 + $0x170] sm:$0xff] }
  0x22   :  { %366 = vst.msk [vmem:[%s1022_s3 + $0x5c] sm:$0xf] %vm342_vm0, %v301_v7  ;;  %v305_v37 = vpack.c.bf16 %v241_v26, %v241_v26  ;;  %v306_v38 = vpack.c.bf16 %v242_v27, %v242_v27  ;;  %v307_v42 = vpack.c.bf16 %v243_v32, %v243_v32  ;;  %v114_v44 = vmul.f32 %v439_v1, %v46_v23  ;;  %v56_v7 = vld [vmem:[%s1019_s0 + $0x150] sm:$0xff] }
  0x23   :  { %367 = vst.msk [vmem:[%s1022_s3 + $0x60] sm:$0xf] %vm342_vm0, %v302_v30  ;;  %v308_v43 = vpack.c.bf16 %v244_v33, %v244_v33  ;;  %v115_v45 = vmul.f32 %v439_v1, %v47_v24  ;;  %v309_v47 = vpack.c.bf16 %v245_v39, %v245_v39  ;;  %v116_v48 = vmul.f32 %v439_v1, %v48_v29  ;;  %v61_v24 = vld [vmem:[%s1019_s0 + $0x178] sm:$0xff] }
  0x24   :  { %368 = vst.msk [vmem:[%s1022_s3 + $0x64] sm:$0xf] %vm342_vm0, %v303_v31  ;;  %v117_v49 = vmul.f32 %v439_v1, %v49_v34  ;;  %v118_v50 = vmul.f32 %v439_v1, %v50_v35  ;;  %v182_v51 = vadd.f32 %v444_v2, %v114_v44  ;;  %v119_v53 = vmul.f32 %v439_v1, %v51_v40 }
  0x25   :  { %369 = vst.msk [vmem:[%s1022_s3 + $0x68] sm:$0xf] %vm342_vm0, %v304_v36  ;;  %v183_v52 = vadd.f32 %v444_v2, %v115_v45  ;;  %v120_v54 = vmul.f32 %v439_v1, %v52_v41  ;;  %v184_v55 = vadd.f32 %v444_v2, %v116_v48  ;;  %v121_v58 = vmul.f32 %v439_v1, %v53_v46  ;;  %v62_v41 = vld [vmem:[%s1019_s0 + $0x180] sm:$0xff] }
  0x26   :  { %370 = vst.msk [vmem:[%s1022_s3 + $0x6c] sm:$0xf] %vm342_vm0, %v305_v37  ;;  %v185_v56 = vadd.f32 %v444_v2, %v117_v49  ;;  %v186_v57 = vadd.f32 %v444_v2, %v118_v50  ;;  %v246_v59 = vmax.f32 %v182_v51, 0.0  ;;  %v187_v61 = vadd.f32 %v444_v2, %v119_v53  ;;  %v66_v53 = vld [vmem:[%s1019_s0 + $0x1a0] sm:$0xff] }
  0x27   :  { %371 = vst.msk [vmem:[%s1022_s3 + $0x70] sm:$0xf] %vm342_vm0, %v306_v38  ;;  %v247_v60 = vmax.f32 %v183_v52, 0.0  ;;  %v188_v62 = vadd.f32 %v444_v2, %v120_v54  ;;  %v248_v3 = vmax.f32 %v184_v55, 0.0  ;;  %v189_v6 = vadd.f32 %v444_v2, %v121_v58  ;;  %v65_v52 = vld [vmem:[%s1019_s0 + $0x198] sm:$0xff]  ;;  %v67_v58 = vld [vmem:[%s1019_s0 + $0x1a8] sm:$0xff] }
  0x28   :  { %372 = vst.msk [vmem:[%s1022_s3 + $0x74] sm:$0xf] %vm342_vm0, %v307_v42  ;;  %v249_v4 = vmax.f32 %v185_v56, 0.0  ;;  %v250_v5 = vmax.f32 %v186_v57, 0.0  ;;  %v310_v8 = vpack.c.bf16 %v246_v59, %v246_v59  ;;  %v251_v10 = vmax.f32 %v187_v61, 0.0  ;;  %v63_v42 = vld [vmem:[%s1019_s0 + $0x188] sm:$0xff] }
  0x29   :  { %373 = vst.msk [vmem:[%s1022_s3 + $0x78] sm:$0xf] %vm342_vm0, %v308_v43  ;;  %v311_v9 = vpack.c.bf16 %v247_v60, %v247_v60  ;;  %v252_v11 = vmax.f32 %v188_v62, 0.0  ;;  %v312_v14 = vpack.c.bf16 %v248_v3, %v248_v3  ;;  %v253_v17 = vmax.f32 %v189_v6, 0.0  ;;  %v68_v59 = vld [vmem:[%s1019_s0 + $0x1b0] sm:$0xff] }
  0x2a   :  { %374 = vst.msk [vmem:[%s1022_s3 + $0x7c] sm:$0xf] %vm342_vm0, %v309_v47  ;;  %v313_v15 = vpack.c.bf16 %v249_v4, %v249_v4  ;;  %v314_v16 = vpack.c.bf16 %v250_v5, %v250_v5  ;;  %v315_v20 = vpack.c.bf16 %v251_v10, %v251_v10  ;;  %v122_v22 = vmul.f32 %v439_v1, %v54_v63  ;;  %v64_v47 = vld [vmem:[%s1019_s0 + $0x190] sm:$0xff] }
  0x2b   :  { %375 = vst.msk [vmem:[%s1022_s3 + $0x80] sm:$0xf] %vm342_vm0, %v310_v8  ;;  %v316_v21 = vpack.c.bf16 %v252_v11, %v252_v11  ;;  %v123_v23 = vmul.f32 %v439_v1, %v55_v0  ;;  %v317_v25 = vpack.c.bf16 %v253_v17, %v253_v17  ;;  %v124_v26 = vmul.f32 %v439_v1, %v56_v7  ;;  %v69_v0 = vld [vmem:[%s1019_s0 + $0x1b8] sm:$0xff] }
  0x2c   :  { %376 = vst.msk [vmem:[%s1022_s3 + $0x84] sm:$0xf] %vm342_vm0, %v311_v9  ;;  %v125_v27 = vmul.f32 %v439_v1, %v57_v12  ;;  %v126_v28 = vmul.f32 %v439_v1, %v58_v13  ;;  %v190_v29 = vadd.f32 %v444_v2, %v122_v22  ;;  %v127_v31 = vmul.f32 %v439_v1, %v59_v18 }
  0x2d   :  { %377 = vst.msk [vmem:[%s1022_s3 + $0x88] sm:$0xf] %vm342_vm0, %v312_v14  ;;  %v191_v30 = vadd.f32 %v444_v2, %v123_v23  ;;  %v128_v32 = vmul.f32 %v439_v1, %v60_v19  ;;  %v192_v33 = vadd.f32 %v444_v2, %v124_v26  ;;  %v129_v36 = vmul.f32 %v439_v1, %v61_v24  ;;  %v70_v19 = vld [vmem:[%s1019_s0 + $0x1c0] sm:$0xff] }
  0x2e   :  { %378 = vst.msk [vmem:[%s1022_s3 + $0x8c] sm:$0xf] %vm342_vm0, %v313_v15  ;;  %v193_v34 = vadd.f32 %v444_v2, %v125_v27  ;;  %v194_v35 = vadd.f32 %v444_v2, %v126_v28  ;;  %v254_v37 = vmax.f32 %v190_v29, 0.0  ;;  %v195_v39 = vadd.f32 %v444_v2, %v127_v31  ;;  %v74_v31 = vld [vmem:[%s1019_s0 + $0x1e0] sm:$0xff] }
  0x2f   :  { %379 = vst.msk [vmem:[%s1022_s3 + $0x90] sm:$0xf] %vm342_vm0, %v314_v16  ;;  %v255_v38 = vmax.f32 %v191_v30, 0.0  ;;  %v196_v40 = vadd.f32 %v444_v2, %v128_v32  ;;  %v256_v43 = vmax.f32 %v192_v33, 0.0  ;;  %v197_v46 = vadd.f32 %v444_v2, %v129_v36  ;;  %v73_v30 = vld [vmem:[%s1019_s0 + $0x1d8] sm:$0xff]  ;;  %v75_v36 = vld [vmem:[%s1019_s0 + $0x1e8] sm:$0xff] }
  0x30   :  { %380 = vst.msk [vmem:[%s1022_s3 + $0x94] sm:$0xf] %vm342_vm0, %v315_v20  ;;  %v257_v44 = vmax.f32 %v193_v34, 0.0  ;;  %v258_v45 = vmax.f32 %v194_v35, 0.0  ;;  %v318_v48 = vpack.c.bf16 %v254_v37, %v254_v37  ;;  %v259_v50 = vmax.f32 %v195_v39, 0.0  ;;  %v71_v20 = vld [vmem:[%s1019_s0 + $0x1c8] sm:$0xff] }
  0x31   :  { %381 = vst.msk [vmem:[%s1022_s3 + $0x98] sm:$0xf] %vm342_vm0, %v316_v21  ;;  %v319_v49 = vpack.c.bf16 %v255_v38, %v255_v38  ;;  %v260_v51 = vmax.f32 %v196_v40, 0.0  ;;  %v320_v54 = vpack.c.bf16 %v256_v43, %v256_v43  ;;  %v261_v57 = vmax.f32 %v197_v46, 0.0  ;;  %v76_v37 = vld [vmem:[%s1019_s0 + $0x1f0] sm:$0xff] }
  0x32   :  { %382 = vst.msk [vmem:[%s1022_s3 + $0x9c] sm:$0xf] %vm342_vm0, %v317_v25  ;;  %v321_v55 = vpack.c.bf16 %v257_v44, %v257_v44  ;;  %v322_v56 = vpack.c.bf16 %v258_v45, %v258_v45  ;;  %v323_v60 = vpack.c.bf16 %v259_v50, %v259_v50  ;;  %v130_v62 = vmul.f32 %v439_v1, %v62_v41  ;;  %v72_v25 = vld [vmem:[%s1019_s0 + $0x1d0] sm:$0xff] }
  0x33   :  { %383 = vst.msk [vmem:[%s1022_s3 + $0xa0] sm:$0xf] %vm342_vm0, %v318_v48  ;;  %v324_v61 = vpack.c.bf16 %v260_v51, %v260_v51  ;;  %v131_v63 = vmul.f32 %v439_v1, %v63_v42  ;;  %v325_v3 = vpack.c.bf16 %v261_v57, %v261_v57  ;;  %v132_v4 = vmul.f32 %v439_v1, %v64_v47  ;;  %v77_v42 = vld [vmem:[%s1019_s0 + $0x1f8] sm:$0xff] }
  0x34   :  { %384 = vst.msk [vmem:[%s1022_s3 + $0xa4] sm:$0xf] %vm342_vm0, %v319_v49  ;;  %v133_v5 = vmul.f32 %v439_v1, %v65_v52  ;;  %v134_v6 = vmul.f32 %v439_v1, %v66_v53  ;;  %v198_v7 = vadd.f32 %v444_v2, %v130_v62  ;;  %v135_v9 = vmul.f32 %v439_v1, %v67_v58 }
  0x35   :  { %385 = vst.msk [vmem:[%s1022_s3 + $0xa8] sm:$0xf] %vm342_vm0, %v320_v54  ;;  %v199_v8 = vadd.f32 %v444_v2, %v131_v63  ;;  %v136_v10 = vmul.f32 %v439_v1, %v68_v59  ;;  %v200_v11 = vadd.f32 %v444_v2, %v132_v4  ;;  %v137_v14 = vmul.f32 %v439_v1, %v69_v0 }
  0x36   :  { %386 = vst.msk [vmem:[%s1022_s3 + $0xac] sm:$0xf] %vm342_vm0, %v321_v55  ;;  %v201_v12 = vadd.f32 %v444_v2, %v133_v5  ;;  %v202_v13 = vadd.f32 %v444_v2, %v134_v6  ;;  %v262_v15 = vmax.f32 %v198_v7, 0.0  ;;  %v203_v17 = vadd.f32 %v444_v2, %v135_v9 }
  0x37   :  { %387 = vst.msk [vmem:[%s1022_s3 + $0xb0] sm:$0xf] %vm342_vm0, %v322_v56  ;;  %v263_v16 = vmax.f32 %v199_v8, 0.0  ;;  %v204_v18 = vadd.f32 %v444_v2, %v136_v10  ;;  %v264_v21 = vmax.f32 %v200_v11, 0.0  ;;  %v205_v24 = vadd.f32 %v444_v2, %v137_v14 }
  0x38   :  { %388 = vst.msk [vmem:[%s1022_s3 + $0xb4] sm:$0xf] %vm342_vm0, %v323_v60  ;;  %v265_v22 = vmax.f32 %v201_v12, 0.0  ;;  %v266_v23 = vmax.f32 %v202_v13, 0.0  ;;  %v326_v26 = vpack.c.bf16 %v262_v15, %v262_v15  ;;  %v267_v28 = vmax.f32 %v203_v17, 0.0 }
  0x39   :  { %389 = vst.msk [vmem:[%s1022_s3 + $0xb8] sm:$0xf] %vm342_vm0, %v324_v61  ;;  %v327_v27 = vpack.c.bf16 %v263_v16, %v263_v16  ;;  %v268_v29 = vmax.f32 %v204_v18, 0.0  ;;  %v328_v32 = vpack.c.bf16 %v264_v21, %v264_v21  ;;  %v269_v35 = vmax.f32 %v205_v24, 0.0 }
  0x3a   :  { %390 = vst.msk [vmem:[%s1022_s3 + $0xbc] sm:$0xf] %vm342_vm0, %v325_v3  ;;  %v329_v33 = vpack.c.bf16 %v265_v22, %v265_v22  ;;  %v330_v34 = vpack.c.bf16 %v266_v23, %v266_v23  ;;  %v331_v38 = vpack.c.bf16 %v267_v28, %v267_v28  ;;  %v138_v40 = vmul.f32 %v439_v1, %v70_v19 }
  0x3b   :  { %391 = vst.msk [vmem:[%s1022_s3 + $0xc0] sm:$0xf] %vm342_vm0, %v326_v26  ;;  %v332_v39 = vpack.c.bf16 %v268_v29, %v268_v29  ;;  %v139_v41 = vmul.f32 %v439_v1, %v71_v20  ;;  %v333_v43 = vpack.c.bf16 %v269_v35, %v269_v35  ;;  %v140_v44 = vmul.f32 %v439_v1, %v72_v25 }
  0x3c   :  { %392 = vst.msk [vmem:[%s1022_s3 + $0xc4] sm:$0xf] %vm342_vm0, %v327_v27  ;;  %v141_v45 = vmul.f32 %v439_v1, %v73_v30  ;;  %v142_v46 = vmul.f32 %v439_v1, %v74_v31  ;;  %v206_v47 = vadd.f32 %v444_v2, %v138_v40  ;;  %v143_v49 = vmul.f32 %v439_v1, %v75_v36 }
  0x3d   :  { %393 = vst.msk [vmem:[%s1022_s3 + $0xc8] sm:$0xf] %vm342_vm0, %v328_v32  ;;  %v207_v48 = vadd.f32 %v444_v2, %v139_v41  ;;  %v144_v50 = vmul.f32 %v439_v1, %v76_v37  ;;  %v208_v51 = vadd.f32 %v444_v2, %v140_v44  ;;  %v145_v54 = vmul.f32 %v439_v1, %v77_v42 }
  0x3e   :  { %394 = vst.msk [vmem:[%s1022_s3 + $0xcc] sm:$0xf] %vm342_vm0, %v329_v33  ;;  %v209_v52 = vadd.f32 %v444_v2, %v141_v45  ;;  %v210_v53 = vadd.f32 %v444_v2, %v142_v46  ;;  %v270_v55 = vmax.f32 %v206_v47, 0.0  ;;  %v211_v57 = vadd.f32 %v444_v2, %v143_v49 }
  0x3f   :  { %395 = vst.msk [vmem:[%s1022_s3 + $0xd0] sm:$0xf] %vm342_vm0, %v330_v34  ;;  %v271_v56 = vmax.f32 %v207_v48, 0.0  ;;  %v212_v58 = vadd.f32 %v444_v2, %v144_v50  ;;  %v272_v59 = vmax.f32 %v208_v51, 0.0  ;;  %v213_v1 = vadd.f32 %v444_v2, %v145_v54 }
  0x40   :  { %396 = vst.msk [vmem:[%s1022_s3 + $0xd4] sm:$0xf] %vm342_vm0, %v331_v38  ;;  %v273_v60 = vmax.f32 %v209_v52, 0.0  ;;  %v274_v61 = vmax.f32 %v210_v53, 0.0  ;;  %v334_v62 = vpack.c.bf16 %v270_v55, %v270_v55  ;;  %v275_v0 = vmax.f32 %v211_v57, 0.0 }
  0x41   :  { %397 = vst.msk [vmem:[%s1022_s3 + $0xd8] sm:$0xf] %vm342_vm0, %v332_v39  ;;  %v335_v63 = vpack.c.bf16 %v271_v56, %v271_v56  ;;  %v276_v3 = vmax.f32 %v212_v58, 0.0  ;;  %v336_v4 = vpack.c.bf16 %v272_v59, %v272_v59  ;;  %v277_v6 = vmax.f32 %v213_v1, 0.0 }
  0x42   :  { %398 = vst.msk [vmem:[%s1022_s3 + $0xdc] sm:$0xf] %vm342_vm0, %v333_v43  ;;  %v337_v5 = vpack.c.bf16 %v273_v60, %v273_v60  ;;  %v338_v2 = vpack.c.bf16 %v274_v61, %v274_v61  ;;  %v339_v7 = vpack.c.bf16 %v275_v0, %v275_v0 }
  0x43   :  { %399 = vst.msk [vmem:[%s1022_s3 + $0xe0] sm:$0xf] %vm342_vm0, %v334_v62  ;;  %v340_v8 = vpack.c.bf16 %v276_v3, %v276_v3  ;;  %v341_v9 = vpack.c.bf16 %v277_v6, %v277_v6 }
  0x44   :  { %400 = vst.msk [vmem:[%s1022_s3 + $0xe4] sm:$0xf] %vm342_vm0, %v335_v63 }
  0x45   :  { %401 = vst.msk [vmem:[%s1022_s3 + $0xe8] sm:$0xf] %vm342_vm0, %v336_v4 }
  0x46   :  { %402 = vst.msk [vmem:[%s1022_s3 + $0xec] sm:$0xf] %vm342_vm0, %v337_v5 }
  0x47   :  { %403 = vst.msk [vmem:[%s1022_s3 + $0xf0] sm:$0xf] %vm342_vm0, %v338_v2 }
  0x48   :  { %404 = vst.msk [vmem:[%s1022_s3 + $0xf4] sm:$0xf] %vm342_vm0, %v339_v7 }
  0x49   :  { %405 = vst.msk [vmem:[%s1022_s3 + $0xf8] sm:$0xf] %vm342_vm0, %v340_v8 }
  0x4a   :  { %406 = vst.msk [vmem:[%s1022_s3 + $0xfc] sm:$0xf] %vm342_vm0, %v341_v9 }

// kernel: generator_forward.15
= control target key start
LH: loop header
LB: loop body
LE: loop exit
PB: predicated region body
PF: predicated region fallthrough
CT: control target
= control target key end

     0   :  { %s1586_s12 = smov 0   ;;  %s1588_s13 = smov 0   ;;  %s2227_s0 = inlined_call_operand.vmem [shape: bf16[4,512,128], index: 0, kind: input, shape index: {}]   ;;  %s2228_s1 = inlined_call_operand.vmem [shape: bf16[4,128,16], index: 1, kind: input, shape index: {}]   ;;  %s2229_s2 = inlined_call_operand.vmem [shape: f32[4,512,16], index: 2, kind: output, shape index: {0}]   ;;  %s2230_s3 = inlined_call_operand.vmem [shape: f32[4,1,2,16], index: 3, kind: output, shape index: {1}]  }
   0x1   :  { %s1590_s14 = smov 0  }
   0x2 LB: > { %s26_s15 = sadd.s32 1, %s1560_s13  ;;  %p1281_p0 = scmp.ge.s32.totalorder %s1564_s14, 1  ;;  %s1564_s14 = sphi %s1590_s14, %s14_s14   ;;  %s1560_s13 = sphi %s1588_s13, %s2232_s13   ;;  %s1556_s12 = sphi %s1586_s12, %s2231_s12  }
   0x3   : > { %p28_p1 = scmp.ge.s32.totalorder %s26_s15, 4  ;;  %p173_p2 = scmp.lt.s32.totalorder %s1564_s14, 5 }
   0x5   : > { %s2234_s15 = smov (%p28_p1, %s26_s15), 0  ;;  %p174_p3 = pnand %p1281_p0, %p173_p2 }
   0x6   : > { %p218_p4 = scmp.lt.s32.totalorder (!%p174_p3), %s1556_s12, 3 }
   0x7   : > { %177 = sbr.rel (%p174_p3) target bundleno = 408 (0x198), region = 28 }
   0xc   : > { %s2236_s12 = smov (!%p218_p4, %s1556_s12), 3  ;;  %vm738_vm0 = vcmask 130048   ;;  %vm1133_vm1 = vcmask 1040384   ;;  %vm1135_vm2 = vcmask 123904  }
   0xd   : > { %s1452_s16 = sshll.u32 %s2236_s12, 6  ;;  %s1451_s20 = sshll.u32 %s2236_s12, 8 }
   0xe   : > { %s1610_s19 = scalar_lea.vmem %s2228_s1, %s1452_s16  ;;  %s1623_s23 = scalar_lea.vmem %s2227_s0, %s1451_s20 }
   0xf   : > { %v1493_v0 = vld [vmem:[%s1610_s19 + $0x38] sm:$0xff]  ;;  %v1492_v1 = vld [vmem:[%s1610_s19 + $0x30] sm:$0xff]  ;;  %v1491_v2 = vld [vmem:[%s1610_s19 + $0x28] sm:$0xff]  ;;  %s1453_s24 = sshll.u32 %s2236_s12, 9  ;;  %s1288_s28 = sshll.u32 %s2236_s12, 1 }
  0x10   : > { %569 = vmatpush.bf16.msra.mxu0 %v1493_v0  ;;  %1494 = vmatpush.bf16.msra.mxu1 %v1493_v0  ;;  %v1490_v3 = vld [vmem:[%s1610_s19 + $0x20] sm:$0xff]  ;;  %v1489_v4 = vld [vmem:[%s1610_s19 + $0x18] sm:$0xff]  ;;  %v1488_v5 = vld [vmem:[%s1610_s19 + $0x10] sm:$0xff]  ;;  %s1658_s27 = scalar_lea.vmem %s2229_s2, %s1453_s24  ;;  %s248_s4 = scalar_lea.vmem %s2230_s3, %s1288_s28 }
  0x11   : > { %1495 = vmatpush.bf16.msra.mxu2 %v1493_v0  ;;  %1496 = vmatpush.bf16.msra.mxu3 %v1493_v0  ;;  %v1487_v6 = vld [vmem:[%s1610_s19 + $0x8] sm:$0xff]  ;;  %v1486_v7 = vld [vmem:[%s1610_s19] sm:$0xff]  ;;  %v1456_v13 = vld [vmem:[%s1623_s23 + $0x10] sm:$0xff] }
  0x12   : > { %v1454_v8 = vld [vmem:[%s1623_s23] sm:$0xff]  ;;  %v1455_v10 = vld [vmem:[%s1623_s23 + $0x8] sm:$0xff]  ;;  %v1464_v14 = vld [vmem:[%s1623_s23 + $0x50] sm:$0xff] }
  0x13   : > { %v1462_v9 = vld [vmem:[%s1623_s23 + $0x40] sm:$0xff]  ;;  %v1463_v11 = vld [vmem:[%s1623_s23 + $0x48] sm:$0xff]  ;;  %v1457_v16 = vld [vmem:[%s1623_s23 + $0x18] sm:$0xff] }
  0x14   : > { %570 = vmatpush.bf16.msra.mxu0 %v1492_v1  ;;  %1497 = vmatpush.bf16.msra.mxu1 %v1492_v1  ;;  %v1470_v12 = vld [vmem:[%s1623_s23 + $0x80] sm:$0xff]  ;;  %v1471_v15 = vld [vmem:[%s1623_s23 + $0x88] sm:$0xff]  ;;  %v1465_v17 = vld [vmem:[%s1623_s23 + $0x58] sm:$0xff] }
  0x15   : > { %1498 = vmatpush.bf16.msra.mxu2 %v1492_v1  ;;  %1499 = vmatpush.bf16.msra.mxu3 %v1492_v1  ;;  %v1472_v18 = vld [vmem:[%s1623_s23 + $0x90] sm:$0xff]  ;;  %v1478_v19 = vld [vmem:[%s1623_s23 + $0xc0] sm:$0xff]  ;;  %v1473_v22 = vld [vmem:[%s1623_s23 + $0x98] sm:$0xff] }
  0x16   : > { %v1458_v20 = vld [vmem:[%s1623_s23 + $0x20] sm:$0xff]  ;;  %v1479_v23 = vld [vmem:[%s1623_s23 + $0xc8] sm:$0xff]  ;;  %v1480_v27 = vld [vmem:[%s1623_s23 + $0xd0] sm:$0xff] }
  0x17   : > { %v1466_v21 = vld [vmem:[%s1623_s23 + $0x60] sm:$0xff]  ;;  %v1459_v24 = vld [vmem:[%s1623_s23 + $0x28] sm:$0xff]  ;;  %v1460_v28 = vld [vmem:[%s1623_s23 + $0x30] sm:$0xff] }
  0x18   : > { %571 = vmatpush.bf16.msra.mxu0 %v1491_v2  ;;  %1500 = vmatpush.bf16.msra.mxu1 %v1491_v2  ;;  %v1467_v25 = vld [vmem:[%s1623_s23 + $0x68] sm:$0xff]  ;;  %v1474_v26 = vld [vmem:[%s1623_s23 + $0xa0] sm:$0xff]  ;;  %v1468_v29 = vld [vmem:[%s1623_s23 + $0x70] sm:$0xff] }
  0x19   : > { %1501 = vmatpush.bf16.msra.mxu2 %v1491_v2  ;;  %1502 = vmatpush.bf16.msra.mxu3 %v1491_v2  ;;  %v1475_v30 = vld [vmem:[%s1623_s23 + $0xa8] sm:$0xff]  ;;  %v1481_v31 = vld [vmem:[%s1623_s23 + $0xd8] sm:$0xff]  ;;  %v1476_v34 = vld [vmem:[%s1623_s23 + $0xb0] sm:$0xff] }
  0x1a   : > { %v1461_v32 = vld [vmem:[%s1623_s23 + $0x38] sm:$0xff]  ;;  %v1482_v35 = vld [vmem:[%s1623_s23 + $0xe0] sm:$0xff]  ;;  %v1483_v39 = vld [vmem:[%s1623_s23 + $0xe8] sm:$0xff] }
  0x1b   : > { %v1469_v33 = vld [vmem:[%s1623_s23 + $0x78] sm:$0xff]  ;;  %v1484_v56 = vld [vmem:[%s1623_s23 + $0xf0] sm:$0xff] }
  0x1c   : > { %572 = vmatpush.bf16.msra.mxu0 %v1490_v3  ;;  %1503 = vmatpush.bf16.msra.mxu1 %v1490_v3  ;;  %v1477_v38 = vld [vmem:[%s1623_s23 + $0xb8] sm:$0xff] }
  0x1d   : > { %1504 = vmatpush.bf16.msra.mxu2 %v1490_v3  ;;  %1505 = vmatpush.bf16.msra.mxu3 %v1490_v3 }
  0x20   : > { %573 = vmatpush.bf16.msra.mxu0 %v1489_v4  ;;  %1506 = vmatpush.bf16.msra.mxu1 %v1489_v4 }
  0x21   : > { %1507 = vmatpush.bf16.msra.mxu2 %v1489_v4  ;;  %1508 = vmatpush.bf16.msra.mxu3 %v1489_v4 }
  0x24   : > { %574 = vmatpush.bf16.msra.mxu0 %v1488_v5  ;;  %1509 = vmatpush.bf16.msra.mxu1 %v1488_v5 }
  0x25   : > { %1510 = vmatpush.bf16.msra.mxu2 %v1488_v5  ;;  %1511 = vmatpush.bf16.msra.mxu3 %v1488_v5 }
  0x28   : > { %575 = vmatpush.bf16.msra.mxu0 %v1487_v6  ;;  %1512 = vmatpush.bf16.msra.mxu1 %v1487_v6 }
  0x29   : > { %1513 = vmatpush.bf16.msra.mxu2 %v1487_v6  ;;  %1514 = vmatpush.bf16.msra.mxu3 %v1487_v6 }
  0x2c   : > { %576 = vmatpush.bf16.msra.mxu0 %v1486_v7  ;;  %1515 = vmatpush.bf16.msra.mxu1 %v1486_v7 }
  0x2d   : > { %1516 = vmatpush.bf16.msra.mxu2 %v1486_v7  ;;  %1517 = vmatpush.bf16.msra.mxu3 %v1486_v7 }
  0x2f   : > { %577 = vmatmul.bf16.vlgmr.msra.gmra.mxu0 %v1454_v8  ;;  %617 = vmatmul.bf16.vlgmr.msra.gmra.mxu1 %v1462_v9  ;;  %v1485_v9 = vld [vmem:[%s1623_s23 + $0xf8] sm:$0xff] }
  0x30   : > { %657 = vmatmul.bf16.vlgmr.msra.gmra.mxu2 %v1470_v12  ;;  %697 = vmatmul.bf16.vlgmr.msra.gmra.mxu3 %v1478_v19 }
  0x3f   : > { %582 = vmatmul.bf16.gmra.mxu0 %v1455_v10  ;;  %622 = vmatmul.bf16.gmra.mxu1 %v1463_v11 }
  0x40   : > { %662 = vmatmul.bf16.gmra.mxu2 %v1471_v15  ;;  %702 = vmatmul.bf16.gmra.mxu3 %v1479_v23 }
  0x4f   : > { %587 = vmatmul.bf16.gmra.mxu0 %v1456_v13  ;;  %627 = vmatmul.bf16.gmra.mxu1 %v1464_v14 }
  0x50   : > { %667 = vmatmul.bf16.gmra.mxu2 %v1472_v18  ;;  %707 = vmatmul.bf16.gmra.mxu3 %v1480_v27 }
  0x5f   : > { %592 = vmatmul.bf16.gmra.mxu0 %v1457_v16  ;;  %632 = vmatmul.bf16.gmra.mxu1 %v1465_v17 }
  0x60   : > { %672 = vmatmul.bf16.gmra.mxu2 %v1473_v22  ;;  %712 = vmatmul.bf16.gmra.mxu3 %v1481_v31 }
  0x6f   : > { %597 = vmatmul.bf16.gmra.mxu0 %v1458_v20  ;;  %637 = vmatmul.bf16.gmra.mxu1 %v1466_v21 }
  0x70   : > { %677 = vmatmul.bf16.gmra.mxu2 %v1474_v26  ;;  %717 = vmatmul.bf16.gmra.mxu3 %v1482_v35 }
  0x7f   : > { %602 = vmatmul.bf16.gmra.mxu0 %v1459_v24  ;;  %642 = vmatmul.bf16.gmra.mxu1 %v1467_v25 }
  0x80   : > { %682 = vmatmul.bf16.gmra.mxu2 %v1475_v30  ;;  %722 = vmatmul.bf16.gmra.mxu3 %v1483_v39 }
  0x8f   : > { %607 = vmatmul.bf16.gmra.mxu0 %v1460_v28  ;;  %647 = vmatmul.bf16.gmra.mxu1 %v1468_v29 }
  0x90   : > { %687 = vmatmul.bf16.gmra.mxu2 %v1476_v34  ;;  %727 = vmatmul.bf16.gmra.mxu3 %v1484_v56 }
  0x9f   : > { %612 = vmatmul.bf16.gmra.mxu0 %v1461_v32  ;;  %652 = vmatmul.bf16.gmra.mxu1 %v1469_v33 }
  0xa0   : > { %692 = vmatmul.bf16.gmra.mxu2 %v1477_v38  ;;  %732 = vmatmul.bf16.gmra.mxu3 %v1485_v9 }
  0xac   : > { %v578_v36 = vpop.f32.mrf.mxu0  ;;  %v1660_v37 = vpop.f32.mrf.mxu1 }
  0xad   : > { %739 = vst.msk [vmem:[%s1658_s27] sm:$0xff] %vm738_vm0, %v578_v36  ;;  %v936_v40 = vmul.f32 %v578_v36, %v578_v36  ;;  %v803_v43 = vsel %vm738_vm0, %v578_v36, 0.0 }
  0xae   : > { %755 = vst.msk [vmem:[%s1658_s27 + $0x80] sm:$0xff] %vm738_vm0, %v1660_v37 }
  0xaf   : > { %v1000_v47 = vsel %vm738_vm0, %v936_v40, 0.0 }
  0xb3   : > { %v1695_v62 = vpop.f32.mrf.mxu2  ;;  %v1753_v20 = vpop.f32.mrf.mxu3 }
  0xb4   : > { %v580_v41 = vpop.f32.mrf.mxu0  ;;  %v1669_v42 = vpop.f32.mrf.mxu1  ;;  %771 = vst.msk [vmem:[%s1658_s27 + $0x100] sm:$0xff] %vm738_vm0, %v1695_v62 }
  0xb5   : > { %740 = vst.msk [vmem:[%s1658_s27 + $0x8] sm:$0xff] %vm738_vm0, %v580_v41  ;;  %v804_v44 = vsel %vm738_vm0, %v580_v41, 0.0  ;;  %v937_v45 = vmul.f32 %v580_v41, %v580_v41 }
  0xb6   : > { %v805_v46 = vadd.f32 %v804_v44, %v803_v43  ;;  %756 = vst.msk [vmem:[%s1658_s27 + $0x88] sm:$0xff] %vm738_vm0, %v1669_v42 }
  0xb7   : > { %v1001_v48 = vsel %vm738_vm0, %v937_v45, 0.0  ;;  %787 = vst.msk [vmem:[%s1658_s27 + $0x180] sm:$0xff] %vm738_vm0, %v1753_v20 }
  0xb8   : > { %v1002_v49 = vadd.f32 %v1001_v48, %v1000_v47 }
  0xbb   : > { %v1709_v6 = vpop.f32.mrf.mxu2  ;;  %v1770_v24 = vpop.f32.mrf.mxu3 }
  0xbc   : > { %v583_v50 = vpop.f32.mrf.mxu0  ;;  %v1680_v51 = vpop.f32.mrf.mxu1  ;;  %772 = vst.msk [vmem:[%s1658_s27 + $0x108] sm:$0xff] %vm738_vm0, %v1709_v6 }
  0xbd   : > { %741 = vst.msk [vmem:[%s1658_s27 + $0x10] sm:$0xff] %vm738_vm0, %v583_v50  ;;  %v806_v52 = vsel %vm738_vm0, %v583_v50, 0.0  ;;  %v938_v53 = vmul.f32 %v583_v50, %v583_v50 }
  0xbe   : > { %v807_v54 = vadd.f32 %v806_v52, %v805_v46  ;;  %757 = vst.msk [vmem:[%s1658_s27 + $0x90] sm:$0xff] %vm738_vm0, %v1680_v51 }
  0xbf   : > { %v1003_v55 = vsel %vm738_vm0, %v938_v53, 0.0  ;;  %788 = vst.msk [vmem:[%s1658_s27 + $0x188] sm:$0xff] %vm738_vm0, %v1770_v24 }
  0xc0   : > { %v1004_v57 = vadd.f32 %v1003_v55, %v1002_v49 }
  0xc3   : > { %v1727_v13 = vpop.f32.mrf.mxu2  ;;  %v1787_v28 = vpop.f32.mrf.mxu3 }
  0xc4   : > { %v585_v58 = vpop.f32.mrf.mxu0  ;;  %v1690_v59 = vpop.f32.mrf.mxu1  ;;  %773 = vst.msk [vmem:[%s1658_s27 + $0x110] sm:$0xff] %vm738_vm0, %v1727_v13 }
  0xc5   : > { %742 = vst.msk [vmem:[%s1658_s27 + $0x18] sm:$0xff] %vm738_vm0, %v585_v58  ;;  %v808_v60 = vsel %vm738_vm0, %v585_v58, 0.0  ;;  %v939_v61 = vmul.f32 %v585_v58, %v585_v58 }
  0xc6   : > { %v809_v63 = vadd.f32 %v808_v60, %v807_v54  ;;  %758 = vst.msk [vmem:[%s1658_s27 + $0x98] sm:$0xff] %vm738_vm0, %v1690_v59 }
  0xc7   : > { %v1005_v0 = vsel %vm738_vm0, %v939_v61, 0.0  ;;  %789 = vst.msk [vmem:[%s1658_s27 + $0x190] sm:$0xff] %vm738_vm0, %v1787_v28 }
  0xc8   : > { %v1006_v1 = vadd.f32 %v1005_v0, %v1004_v57 }
  0xcb   : > { %v1739_v16 = vpop.f32.mrf.mxu2  ;;  %v1804_v32 = vpop.f32.mrf.mxu3 }
  0xcc   : > { %v588_v2 = vpop.f32.mrf.mxu0  ;;  %v1704_v3 = vpop.f32.mrf.mxu1  ;;  %774 = vst.msk [vmem:[%s1658_s27 + $0x118] sm:$0xff] %vm738_vm0, %v1739_v16 }
  0xcd   : > { %743 = vst.msk [vmem:[%s1658_s27 + $0x20] sm:$0xff] %vm738_vm0, %v588_v2  ;;  %v810_v4 = vsel %vm738_vm0, %v588_v2, 0.0  ;;  %v940_v5 = vmul.f32 %v588_v2, %v588_v2 }
  0xce   : > { %v1711_v7 = vadd.f32 %v810_v4, %v809_v63  ;;  %759 = vst.msk [vmem:[%s1658_s27 + $0xa0] sm:$0xff] %vm738_vm0, %v1704_v3 }
  0xcf   : > { %v1007_v8 = vsel %vm738_vm0, %v940_v5, 0.0  ;;  %790 = vst.msk [vmem:[%s1658_s27 + $0x198] sm:$0xff] %vm738_vm0, %v1804_v32 }
  0xd0   : > { %v1721_v10 = vadd.f32 %v1007_v8, %v1006_v1 }
  0xd3   : > { %v1751_v19 = vpop.f32.mrf.mxu2  ;;  %v1821_v36 = vpop.f32.mrf.mxu3 }
  0xd4   : > { %v590_v11 = vpop.f32.mrf.mxu0  ;;  %v1723_v12 = vpop.f32.mrf.mxu1  ;;  %775 = vst.msk [vmem:[%s1658_s27 + $0x120] sm:$0xff] %vm738_vm0, %v1751_v19 }
  0xd5   : > { %744 = vst.msk [vmem:[%s1658_s27 + $0x28] sm:$0xff] %vm738_vm0, %v590_v11  ;;  %v941_v40 = vmul.f32 %v590_v11, %v590_v11  ;;  %v812_v44 = vsel %vm738_vm0, %v590_v11, 0.0 }
  0xd6   : > { %760 = vst.msk [vmem:[%s1658_s27 + $0xa8] sm:$0xff] %vm738_vm0, %v1723_v12  ;;  %v813_v49 = vadd.f32 %v812_v44, %v1711_v7 }
  0xd7   : > { %791 = vst.msk [vmem:[%s1658_s27 + $0x1a0] sm:$0xff] %vm738_vm0, %v1821_v36  ;;  %v1009_v46 = vsel %vm738_vm0, %v941_v40, 0.0 }
  0xd8   : > { %v1010_v54 = vadd.f32 %v1009_v46, %v1721_v10 }
  0xdb   : > { %v1768_v23 = vpop.f32.mrf.mxu2  ;;  %v1838_v43 = vpop.f32.mrf.mxu3 }
  0xdc   : > { %v593_v14 = vpop.f32.mrf.mxu0  ;;  %v1735_v15 = vpop.f32.mrf.mxu1  ;;  %776 = vst.msk [vmem:[%s1658_s27 + $0x128] sm:$0xff] %vm738_vm0, %v1768_v23 }
  0xdd   : > { %745 = vst.msk [vmem:[%s1658_s27 + $0x30] sm:$0xff] %vm738_vm0, %v593_v14  ;;  %v942_v45 = vmul.f32 %v593_v14, %v593_v14  ;;  %v814_v47 = vsel %vm738_vm0, %v593_v14, 0.0 }
  0xde   : > { %761 = vst.msk [vmem:[%s1658_s27 + $0xb0] sm:$0xff] %vm738_vm0, %v1735_v15  ;;  %v815_v55 = vadd.f32 %v814_v47, %v813_v49 }
  0xdf   : > { %792 = vst.msk [vmem:[%s1658_s27 + $0x1a8] sm:$0xff] %vm738_vm0, %v1838_v43  ;;  %v1011_v50 = vsel %vm738_vm0, %v942_v45, 0.0 }
  0xe0   : > { %v1012_v1 = vadd.f32 %v1011_v50, %v1010_v54 }
  0xe3   : > { %v1785_v27 = vpop.f32.mrf.mxu2  ;;  %v1864_v0 = vpop.f32.mrf.mxu3 }
  0xe4   : > { %v595_v17 = vpop.f32.mrf.mxu0  ;;  %v1747_v18 = vpop.f32.mrf.mxu1  ;;  %777 = vst.msk [vmem:[%s1658_s27 + $0x130] sm:$0xff] %vm738_vm0, %v1785_v27 }
  0xe5   : > { %746 = vst.msk [vmem:[%s1658_s27 + $0x38] sm:$0xff] %vm738_vm0, %v595_v17  ;;  %v943_v48 = vmul.f32 %v595_v17, %v595_v17  ;;  %v816_v52 = vsel %vm738_vm0, %v595_v17, 0.0 }
  0xe6   : > { %762 = vst.msk [vmem:[%s1658_s27 + $0xb8] sm:$0xff] %vm738_vm0, %v1747_v18  ;;  %v817_v2 = vadd.f32 %v816_v52, %v815_v55 }
  0xe7   : > { %v1013_v58 = vsel %vm738_vm0, %v943_v48, 0.0  ;;  %793 = vst.msk [vmem:[%s1658_s27 + $0x1b0] sm:$0xff] %vm738_vm0, %v1864_v0 }
  0xe8   : > { %v1014_v8 = vadd.f32 %v1013_v58, %v1012_v1 }
  0xeb   : > { %v1802_v31 = vpop.f32.mrf.mxu2 }
  0xec   : > { %v598_v21 = vpop.f32.mrf.mxu0  ;;  %v1764_v22 = vpop.f32.mrf.mxu1  ;;  %778 = vst.msk [vmem:[%s1658_s27 + $0x138] sm:$0xff] %vm738_vm0, %v1802_v31 }
  0xed   : > { %747 = vst.msk [vmem:[%s1658_s27 + $0x40] sm:$0xff] %vm738_vm0, %v598_v21  ;;  %v944_v53 = vmul.f32 %v598_v21, %v598_v21  ;;  %v818_v60 = vsel %vm738_vm0, %v598_v21, 0.0 }
  0xee   : > { %763 = vst.msk [vmem:[%s1658_s27 + $0xc0] sm:$0xff] %vm738_vm0, %v1764_v22  ;;  %v819_v9 = vadd.f32 %v818_v60, %v817_v2 }
  0xef   : > { %v1015_v4 = vsel %vm738_vm0, %v944_v53, 0.0  ;;  %v1889_v53 = vpop.f32.mrf.mxu3 }
  0xf0   : > { %v1016_v17 = vadd.f32 %v1015_v4, %v1014_v8  ;;  %794 = vst.msk [vmem:[%s1658_s27 + $0x1b8] sm:$0xff] %vm738_vm0, %v1889_v53 }
  0xf3   : > { %v1819_v35 = vpop.f32.mrf.mxu2 }
  0xf4   : > { %v600_v25 = vpop.f32.mrf.mxu0  ;;  %v1781_v26 = vpop.f32.mrf.mxu1  ;;  %779 = vst.msk [vmem:[%s1658_s27 + $0x140] sm:$0xff] %vm738_vm0, %v1819_v35 }
  0xf5   : > { %748 = vst.msk [vmem:[%s1658_s27 + $0x48] sm:$0xff] %vm738_vm0, %v600_v25  ;;  %v945_v61 = vmul.f32 %v600_v25, %v600_v25  ;;  %v820_v5 = vsel %vm738_vm0, %v600_v25, 0.0 }
  0xf6   : > { %764 = vst.msk [vmem:[%s1658_s27 + $0xc8] sm:$0xff] %vm738_vm0, %v1781_v26  ;;  %v821_v21 = vadd.f32 %v820_v5, %v819_v9 }
  0xf7   : > { %v1017_v10 = vsel %vm738_vm0, %v945_v61, 0.0 }
  0xf8   : > { %v1018_v45 = vadd.f32 %v1017_v10, %v1016_v17 }
  0xfb   : > { %v1836_v41 = vpop.f32.mrf.mxu2 }
  0xfc   : > { %v603_v29 = vpop.f32.mrf.mxu0  ;;  %v1798_v30 = vpop.f32.mrf.mxu1  ;;  %780 = vst.msk [vmem:[%s1658_s27 + $0x148] sm:$0xff] %vm738_vm0, %v1836_v41 }
  0xfd   : > { %749 = vst.msk [vmem:[%s1658_s27 + $0x50] sm:$0xff] %vm738_vm0, %v603_v29  ;;  %v946_v7 = vmul.f32 %v603_v29, %v603_v29  ;;  %v822_v11 = vsel %vm738_vm0, %v603_v29, 0.0 }
  0xfe   : > { %765 = vst.msk [vmem:[%s1658_s27 + $0xd0] sm:$0xff] %vm738_vm0, %v1798_v30  ;;  %v823_v46 = vadd.f32 %v822_v11, %v821_v21  ;;  %v952_v11 = vmul.f32 %v1660_v37, %v1660_v37 }
  0xff   : > { %v1019_v25 = vsel %vm738_vm0, %v946_v7, 0.0 }
 0x103   : > { %v1862_v63 = vpop.f32.mrf.mxu2 }
 0x104   : > { %v605_v33 = vpop.f32.mrf.mxu0  ;;  %v1815_v34 = vpop.f32.mrf.mxu1  ;;  %781 = vst.msk [vmem:[%s1658_s27 + $0x150] sm:$0xff] %vm738_vm0, %v1862_v63 }
 0x105   : > { %750 = vst.msk [vmem:[%s1658_s27 + $0x58] sm:$0xff] %vm738_vm0, %v605_v33  ;;  %v947_v14 = vmul.f32 %v605_v33, %v605_v33  ;;  %v824_v40 = vsel %vm738_vm0, %v605_v33, 0.0  ;;  %v1020_v33 = vadd.f32 %v1019_v25, %v1018_v45  ;;  %v1914_v25 = vpop.f32.mrf.mxu3  ;;  %v834_v45 = vsel %vm738_vm0, %v1660_v37, 0.0 }
 0x106   : > { %766 = vst.msk [vmem:[%s1658_s27 + $0xd8] sm:$0xff] %vm738_vm0, %v1815_v34  ;;  %v825_v54 = vadd.f32 %v824_v40, %v823_v46  ;;  %v953_v46 = vmul.f32 %v1669_v42, %v1669_v42  ;;  %v954_v37 = vmul.f32 %v1680_v51, %v1680_v51 }
 0x107   : > { %v1021_v49 = vsel %vm738_vm0, %v947_v14, 0.0  ;;  %795 = vst.msk [vmem:[%s1658_s27 + $0x1c0] sm:$0xff] %vm738_vm0, %v1914_v25 }
 0x10b   : > { %v1887_v52 = vpop.f32.mrf.mxu2 }
 0x10c   : > { %v608_v38 = vpop.f32.mrf.mxu0  ;;  %v1832_v39 = vpop.f32.mrf.mxu1  ;;  %782 = vst.msk [vmem:[%s1658_s27 + $0x158] sm:$0xff] %vm738_vm0, %v1887_v52 }
 0x10d   : > { %751 = vst.msk [vmem:[%s1658_s27 + $0x60] sm:$0xff] %vm738_vm0, %v608_v38  ;;  %v948_v44 = vmul.f32 %v608_v38, %v608_v38  ;;  %v826_v29 = vsel %vm738_vm0, %v608_v38, 0.0  ;;  %v1022_v38 = vadd.f32 %v1021_v49, %v1020_v33  ;;  %v836_v33 = vsel %vm738_vm0, %v1669_v42, 0.0 }
 0x10e   : > { %767 = vst.msk [vmem:[%s1658_s27 + $0xe0] sm:$0xff] %vm738_vm0, %v1832_v39  ;;  %v827_v61 = vadd.f32 %v826_v29, %v825_v54  ;;  %v840_v42 = vsel %vm738_vm0, %v1690_v59, 0.0 }
 0x10f   : > { %v1023_v55 = vsel %vm738_vm0, %v948_v44, 0.0 }
 0x110   : > { %v1024_v4 = vadd.f32 %v1023_v55, %v1022_v38  ;;  %v955_v38 = vmul.f32 %v1690_v59, %v1690_v59  ;;  %v957_v59 = vmul.f32 %v1723_v12, %v1723_v12 }
 0x113   : > { %v1912_v21 = vpop.f32.mrf.mxu2 }
 0x114   : > { %v610_v56 = vpop.f32.mrf.mxu0  ;;  %v1856_v57 = vpop.f32.mrf.mxu1  ;;  %783 = vst.msk [vmem:[%s1658_s27 + $0x160] sm:$0xff] %vm738_vm0, %v1912_v21 }
 0x115   : > { %752 = vst.msk [vmem:[%s1658_s27 + $0x68] sm:$0xff] %vm738_vm0, %v610_v56  ;;  %v949_v50 = vmul.f32 %v610_v56, %v610_v56  ;;  %v828_v58 = vsel %vm738_vm0, %v610_v56, 0.0 }
 0x116   : > { %768 = vst.msk [vmem:[%s1658_s27 + $0xe8] sm:$0xff] %vm738_vm0, %v1856_v57  ;;  %v829_v5 = vadd.f32 %v828_v58, %v827_v61  ;;  %v1033_v58 = vsel %vm738_vm0, %v953_v46, 0.0 }
 0x117   : > { %v1025_v1 = vsel %vm738_vm0, %v949_v50, 0.0  ;;  %v1031_v50 = vsel %vm738_vm0, %v952_v11, 0.0 }
 0x118   : > { %v1026_v56 = vadd.f32 %v1025_v1, %v1024_v4  ;;  %v956_v4 = vmul.f32 %v1704_v3, %v1704_v3 }
 0x11c   : > { %v613_v47 = vpop.f32.mrf.mxu0  ;;  %v1881_v48 = vpop.f32.mrf.mxu1 }
 0x11d   : > { %753 = vst.msk [vmem:[%s1658_s27 + $0x70] sm:$0xff] %vm738_vm0, %v613_v47  ;;  %v950_v60 = vmul.f32 %v613_v47, %v613_v47  ;;  %v830_v2 = vsel %vm738_vm0, %v613_v47, 0.0 }
 0x11e   : > { %769 = vst.msk [vmem:[%s1658_s27 + $0xf0] sm:$0xff] %vm738_vm0, %v1881_v48  ;;  %v831_v8 = vadd.f32 %v830_v2, %v829_v5  ;;  %v1035_v2 = vsel %vm738_vm0, %v954_v37, 0.0  ;;  %v1945_v5 = vpop.f32.mrf.mxu2  ;;  %v960_v37 = vmul.f32 %v1764_v22, %v1764_v22 }
 0x11f   : > { %v1027_v7 = vsel %vm738_vm0, %v950_v60, 0.0  ;;  %v838_v60 = vsel %vm738_vm0, %v1680_v51, 0.0  ;;  %784 = vst.msk [vmem:[%s1658_s27 + $0x168] sm:$0xff] %vm738_vm0, %v1945_v5  ;;  %v1037_v51 = vsel %vm738_vm0, %v955_v38, 0.0  ;;  %v850_v38 = vsel %vm738_vm0, %v1764_v22, 0.0 }
 0x120   : > { %v1028_v40 = vadd.f32 %v1027_v7, %v1026_v56  ;;  %v1947_v7 = vpop.f32.mrf.mxu3 }
 0x121   : > { %796 = vst.msk [vmem:[%s1658_s27 + $0x1c8] sm:$0xff] %vm738_vm0, %v1947_v7 }
 0x124   : > { %v615_v9 = vpop.f32.mrf.mxu0  ;;  %v1905_v10 = vpop.f32.mrf.mxu1 }
 0x125   : > { %754 = vst.msk [vmem:[%s1658_s27 + $0x78] sm:$0xff] %vm738_vm0, %v615_v9  ;;  %v832_v14 = vsel %vm738_vm0, %v615_v9, 0.0  ;;  %v951_v17 = vmul.f32 %v615_v9, %v615_v9  ;;  %v842_v9 = vsel %vm738_vm0, %v1704_v3, 0.0  ;;  %v1041_v3 = vsel %vm738_vm0, %v957_v59, 0.0 }
 0x126   : > { %v833_v44 = vadd.f32 %v832_v14, %v831_v8  ;;  %770 = vst.msk [vmem:[%s1658_s27 + $0xf8] sm:$0xff] %vm738_vm0, %v1905_v10 }
 0x127   : > { %v1029_v47 = vsel %vm738_vm0, %v951_v17, 0.0  ;;  %v1039_v17 = vsel %vm738_vm0, %v956_v4, 0.0  ;;  %v962_v4 = vmul.f32 %v1798_v30, %v1798_v30 }
 0x128   : > { %v835_v49 = vadd.f32 %v834_v45, %v833_v44  ;;  %v1030_v29 = vadd.f32 %v1029_v47, %v1028_v40  ;;  %v844_v40 = vsel %vm738_vm0, %v1723_v12, 0.0  ;;  %v958_v44 = vmul.f32 %v1735_v15, %v1735_v15 }
 0x129   : > { %v846_v47 = vsel %vm738_vm0, %v1735_v15, 0.0  ;;  %v848_v12 = vsel %vm738_vm0, %v1747_v18, 0.0 }
 0x12a   : > { %v837_v54 = vadd.f32 %v836_v33, %v835_v49  ;;  %v1032_v55 = vadd.f32 %v1031_v50, %v1030_v29  ;;  %v959_v49 = vmul.f32 %v1747_v18, %v1747_v18  ;;  %v1043_v33 = vsel %vm738_vm0, %v958_v44, 0.0 }
 0x12b   : > { %v961_v18 = vmul.f32 %v1781_v26, %v1781_v26 }
 0x12c   : > { %v839_v61 = vadd.f32 %v838_v60, %v837_v54  ;;  %v1034_v1 = vadd.f32 %v1033_v58, %v1032_v55  ;;  %v1975_v54 = vpop.f32.mrf.mxu2  ;;  %v1977_v55 = vpop.f32.mrf.mxu3  ;;  %v1045_v15 = vsel %vm738_vm0, %v959_v49, 0.0 }
 0x12d   : > { %785 = vst.msk [vmem:[%s1658_s27 + $0x170] sm:$0xff] %vm738_vm0, %v1975_v54  ;;  %v1049_v22 = vsel %vm738_vm0, %v961_v18, 0.0  ;;  %v968_v18 = vmul.f32 %v1695_v62, %v1695_v62 }
 0x12e   : > { %v841_v56 = vadd.f32 %v840_v42, %v839_v61  ;;  %v1036_v8 = vadd.f32 %v1035_v2, %v1034_v1  ;;  %797 = vst.msk [vmem:[%s1658_s27 + $0x1d0] sm:$0xff] %vm738_vm0, %v1977_v55  ;;  %v1047_v2 = vsel %vm738_vm0, %v960_v37, 0.0  ;;  %v852_v42 = vsel %vm738_vm0, %v1781_v26, 0.0 }
 0x12f   : > { %v856_v26 = vsel %vm738_vm0, %v1815_v34, 0.0 }
 0x130   : > { %v843_v11 = vadd.f32 %v842_v9, %v841_v56  ;;  %v1038_v14 = vadd.f32 %v1037_v51, %v1036_v8  ;;  %v854_v51 = vsel %vm738_vm0, %v1798_v30, 0.0  ;;  %v963_v9 = vmul.f32 %v1815_v34, %v1815_v34 }
 0x131   : > { %v965_v34 = vmul.f32 %v1856_v57, %v1856_v57 }
 0x132   : > { %v845_v45 = vadd.f32 %v844_v40, %v843_v11  ;;  %v1040_v46 = vadd.f32 %v1039_v17, %v1038_v14  ;;  %v1051_v14 = vsel %vm738_vm0, %v962_v4, 0.0  ;;  %v964_v17 = vmul.f32 %v1832_v39, %v1832_v39 }
 0x133   : > { %v1053_v30 = vsel %vm738_vm0, %v963_v9, 0.0  ;;  %v969_v4 = vmul.f32 %v1709_v6, %v1709_v6  ;;  %v970_v9 = vmul.f32 %v1727_v13, %v1727_v13 }
 0x134   : > { %v1042_v29 = vadd.f32 %v1041_v3, %v1040_v46  ;;  %v847_v50 = vadd.f32 %v846_v47, %v845_v45  ;;  %v2005_v40 = vpop.f32.mrf.mxu2  ;;  %v2007_v44 = vpop.f32.mrf.mxu3  ;;  %v858_v3 = vsel %vm738_vm0, %v1832_v39, 0.0  ;;  %v1057_v39 = vsel %vm738_vm0, %v965_v34, 0.0 }
 0x135   : > { %786 = vst.msk [vmem:[%s1658_s27 + $0x178] sm:$0xff] %vm738_vm0, %v2005_v40 }
 0x136   : > { %v849_v58 = vadd.f32 %v848_v12, %v847_v50  ;;  %v1044_v60 = vadd.f32 %v1043_v33, %v1042_v29  ;;  %798 = vst.msk [vmem:[%s1658_s27 + $0x1d8] sm:$0xff] %vm738_vm0, %v2007_v44  ;;  %v1055_v29 = vsel %vm738_vm0, %v964_v17, 0.0  ;;  %v860_v50 = vsel %vm738_vm0, %v1856_v57, 0.0 }
 0x137   : > { %v966_v33 = vmul.f32 %v1881_v48, %v1881_v48 }
 0x138   : > { %v851_v61 = vadd.f32 %v850_v38, %v849_v58  ;;  %v1046_v1 = vadd.f32 %v1045_v15, %v1044_v60  ;;  %v862_v58 = vsel %vm738_vm0, %v1881_v48, 0.0  ;;  %v967_v60 = vmul.f32 %v1905_v10, %v1905_v10 }
 0x139   : > { %v1059_v57 = vsel %vm738_vm0, %v966_v33, 0.0  ;;  %v866_v48 = vsel %vm738_vm0, %v1695_v62, 0.0  ;;  %v1065_v62 = vsel %vm738_vm0, %v969_v4, 0.0  ;;  %v882_v4 = vsel %vm738_vm0, %v1819_v35, 0.0 }
 0x13a   : > { %v853_v56 = vadd.f32 %v852_v42, %v851_v61  ;;  %v1048_v8 = vadd.f32 %v1047_v2, %v1046_v1  ;;  %v864_v61 = vsel %vm738_vm0, %v1905_v10, 0.0  ;;  %v868_v10 = vsel %vm738_vm0, %v1709_v6, 0.0 }
 0x13b   : > { %v872_v6 = vsel %vm738_vm0, %v1739_v16, 0.0 }
 0x13c   : > { %v855_v59 = vadd.f32 %v854_v51, %v853_v56  ;;  %v1050_v11 = vadd.f32 %v1049_v22, %v1048_v8  ;;  %v2035_v1 = vpop.f32.mrf.mxu3  ;;  %v1061_v56 = vsel %vm738_vm0, %v967_v60, 0.0  ;;  %v1063_v51 = vsel %vm738_vm0, %v968_v18, 0.0 }
 0x13d   : > { %799 = vst.msk [vmem:[%s1658_s27 + $0x1e0] sm:$0xff] %vm738_vm0, %v2035_v1 }
 0x13e   : > { %v857_v45 = vadd.f32 %v856_v26, %v855_v59  ;;  %v1052_v46 = vadd.f32 %v1051_v14, %v1050_v11  ;;  %v870_v14 = vsel %vm738_vm0, %v1727_v13, 0.0  ;;  %v971_v26 = vmul.f32 %v1739_v16, %v1739_v16 }
 0x140   : > { %v859_v47 = vadd.f32 %v858_v3, %v857_v45  ;;  %v1054_v49 = vadd.f32 %v1053_v30, %v1052_v46  ;;  %v1067_v46 = vsel %vm738_vm0, %v970_v9, 0.0  ;;  %v972_v30 = vmul.f32 %v1751_v19, %v1751_v19 }
 0x141   : > { %v1069_v13 = vsel %vm738_vm0, %v971_v26, 0.0 }
 0x142   : > { %v1056_v12 = vadd.f32 %v1055_v29, %v1054_v49  ;;  %v861_v37 = vadd.f32 %v860_v50, %v859_v47  ;;  %v874_v49 = vsel %vm738_vm0, %v1751_v19, 0.0  ;;  %v973_v29 = vmul.f32 %v1768_v23, %v1768_v23 }
 0x143   : > { %v1071_v33 = vsel %vm738_vm0, %v972_v30, 0.0  ;;  %v878_v19 = vsel %vm738_vm0, %v1785_v27, 0.0 }
 0x144   : > { %v1058_v15 = vadd.f32 %v1057_v39, %v1056_v12  ;;  %v863_v38 = vadd.f32 %v862_v58, %v861_v37  ;;  %v2060_v3 = vpop.f32.mrf.mxu3  ;;  %v876_v12 = vsel %vm738_vm0, %v1768_v23, 0.0  ;;  %v974_v37 = vmul.f32 %v1785_v27, %v1785_v27 }
 0x145   : > { %800 = vst.msk [vmem:[%s1658_s27 + $0x1e8] sm:$0xff] %vm738_vm0, %v2060_v3  ;;  %v1073_v60 = vsel %vm738_vm0, %v973_v29, 0.0  ;;  %v880_v23 = vsel %vm738_vm0, %v1802_v31, 0.0  ;;  %v892_v29 = vsel %vm738_vm0, %v1945_v5, 0.0 }
 0x146   : > { %v1060_v2 = vadd.f32 %v1059_v57, %v1058_v15  ;;  %v865_v42 = vadd.f32 %v864_v61, %v863_v38  ;;  %v975_v15 = vmul.f32 %v1802_v31, %v1802_v31  ;;  %v1075_v57 = vsel %vm738_vm0, %v974_v37, 0.0 }
 0x147   : > { %v976_v61 = vmul.f32 %v1819_v35, %v1819_v35  ;;  %v886_v35 = vsel %vm738_vm0, %v1862_v63, 0.0  ;;  %v983_v37 = vmul.f32 %v2005_v40, %v2005_v40 }
 0x148   : > { %v867_v8 = vadd.f32 %v866_v48, %v865_v42  ;;  %v1062_v22 = vadd.f32 %v1061_v56, %v1060_v2  ;;  %v1077_v27 = vsel %vm738_vm0, %v975_v15, 0.0  ;;  %v977_v56 = vmul.f32 %v1836_v41, %v1836_v41 }
 0x14a   : > { %v869_v59 = vadd.f32 %v868_v10, %v867_v8  ;;  %v1064_v11 = vadd.f32 %v1063_v51, %v1062_v22  ;;  %v1079_v22 = vsel %vm738_vm0, %v976_v61, 0.0  ;;  %v884_v51 = vsel %vm738_vm0, %v1836_v41, 0.0 }
 0x14b   : > { %v978_v10 = vmul.f32 %v1862_v63, %v1862_v63  ;;  %v888_v41 = vsel %vm738_vm0, %v1887_v52, 0.0 }
 0x14c   : > { %v871_v17 = vadd.f32 %v870_v14, %v869_v59  ;;  %v1066_v45 = vadd.f32 %v1065_v62, %v1064_v11  ;;  %v2085_v2 = vpop.f32.mrf.mxu3  ;;  %v1081_v11 = vsel %vm738_vm0, %v977_v56, 0.0  ;;  %v979_v62 = vmul.f32 %v1887_v52, %v1887_v52 }
 0x14d   : > { %801 = vst.msk [vmem:[%s1658_s27 + $0x1f0] sm:$0xff] %vm738_vm0, %v2085_v2 }
 0x14e   : > { %v873_v34 = vadd.f32 %v872_v6, %v871_v17  ;;  %v1068_v47 = vadd.f32 %v1067_v46, %v1066_v45  ;;  %v1083_v17 = vsel %vm738_vm0, %v978_v10, 0.0  ;;  %v980_v45 = vmul.f32 %v1912_v21, %v1912_v21 }
 0x14f   : > { %v1085_v63 = vsel %vm738_vm0, %v979_v62, 0.0  ;;  %v988_v10 = vmul.f32 %v1821_v36, %v1821_v36 }
 0x150   : > { %v875_v50 = vadd.f32 %v874_v49, %v873_v34  ;;  %v1070_v16 = vadd.f32 %v1069_v13, %v1068_v47  ;;  %v890_v34 = vsel %vm738_vm0, %v1912_v21, 0.0  ;;  %v981_v47 = vmul.f32 %v1945_v5, %v1945_v5 }
 0x151   : > { %v1087_v49 = vsel %vm738_vm0, %v980_v45, 0.0  ;;  %v894_v21 = vsel %vm738_vm0, %v1975_v54, 0.0 }
 0x152   : > { %v877_v39 = vadd.f32 %v876_v12, %v875_v50  ;;  %v1072_v58 = vadd.f32 %v1071_v33, %v1070_v16  ;;  %v982_v50 = vmul.f32 %v1975_v54, %v1975_v54  ;;  %v1089_v12 = vsel %vm738_vm0, %v981_v47, 0.0 }
 0x153   : > { %v985_v54 = vmul.f32 %v1770_v24, %v1770_v24 }
 0x154   : > { %v1074_v38 = vadd.f32 %v1073_v60, %v1072_v58  ;;  %v879_v18 = vadd.f32 %v878_v19, %v877_v39  ;;  %v2110_v46 = vpop.f32.mrf.mxu3  ;;  %v984_v60 = vmul.f32 %v1753_v20, %v1753_v20  ;;  %v1091_v5 = vsel %vm738_vm0, %v982_v50, 0.0 }
 0x155   : > { %802 = vst.msk [vmem:[%s1658_s27 + $0x1f8] sm:$0xff] %vm738_vm0, %v2110_v46  ;;  %v896_v19 = vsel %vm738_vm0, %v2005_v40, 0.0  ;;  %v986_v40 = vmul.f32 %v1787_v28, %v1787_v28  ;;  %v1097_v56 = vsel %vm738_vm0, %v985_v54, 0.0  ;;  %v993_v50 = vmul.f32 %v1947_v7, %v1947_v7 }
 0x156   : > { %v881_v42 = vadd.f32 %v880_v23, %v879_v18  ;;  %v1076_v48 = vadd.f32 %v1075_v57, %v1074_v38  ;;  %v898_v18 = vsel %vm738_vm0, %v1753_v20, 0.0  ;;  %v1093_v57 = vsel %vm738_vm0, %v983_v37, 0.0 }
 0x157   : > { %v902_v20 = vsel %vm738_vm0, %v1787_v28, 0.0  ;;  %v906_v28 = vsel %vm738_vm0, %v1821_v36, 0.0  ;;  %v910_v36 = vsel %vm738_vm0, %v1864_v0, 0.0 }
 0x158   : > { %v883_v8 = vadd.f32 %v882_v4, %v881_v42  ;;  %v1078_v31 = vadd.f32 %v1077_v27, %v1076_v48  ;;  %v1095_v42 = vsel %vm738_vm0, %v984_v60, 0.0  ;;  %v900_v48 = vsel %vm738_vm0, %v1770_v24, 0.0 }
 0x159   : > { %v904_v24 = vsel %vm738_vm0, %v1804_v32, 0.0  ;;  %v995_v60 = vmul.f32 %v2007_v44, %v2007_v44 }
 0x15a   : > { %v885_v9 = vadd.f32 %v884_v51, %v883_v8  ;;  %v1080_v59 = vadd.f32 %v1079_v22, %v1078_v31  ;;  %v987_v8 = vmul.f32 %v1804_v32, %v1804_v32  ;;  %v1099_v51 = vsel %vm738_vm0, %v986_v40, 0.0 }
 0x15b   : > { %v908_v32 = vsel %vm738_vm0, %v1838_v43, 0.0  ;;  %v998_v40 = vmul.f32 %v2085_v2, %v2085_v2 }
 0x15c   : > { %v887_v14 = vadd.f32 %v886_v35, %v885_v9  ;;  %v1082_v26 = vadd.f32 %v1081_v11, %v1080_v59  ;;  %v1101_v11 = vsel %vm738_vm0, %v987_v8, 0.0  ;;  %v989_v35 = vmul.f32 %v1838_v43, %v1838_v43 }
 0x15d   : > { %v912_v43 = vsel %vm738_vm0, %v1889_v53, 0.0 }
 0x15e   : > { %v889_v6 = vadd.f32 %v888_v41, %v887_v14  ;;  %v1084_v30 = vadd.f32 %v1083_v17, %v1082_v26  ;;  %v1103_v26 = vsel %vm738_vm0, %v988_v10, 0.0  ;;  %v990_v17 = vmul.f32 %v1864_v0, %v1864_v0 }
 0x15f   : > { %v914_v0 = vsel %vm738_vm0, %v1914_v25, 0.0 }
 0x160   : > { %v1086_v13 = vadd.f32 %v1085_v63, %v1084_v30  ;;  %v891_v52 = vadd.f32 %v890_v34, %v889_v6  ;;  %v1105_v6 = vsel %vm738_vm0, %v989_v35, 0.0  ;;  %v991_v30 = vmul.f32 %v1889_v53, %v1889_v53 }
 0x161   : > { %v1107_v47 = vsel %vm738_vm0, %v990_v17, 0.0  ;;  %v916_v53 = vsel %vm738_vm0, %v1947_v7, 0.0  ;;  %v920_v7 = vsel %vm738_vm0, %v2007_v44, 0.0  ;;  %v924_v44 = vsel %vm738_vm0, %v2060_v3, 0.0 }
 0x162   : > { %v1088_v16 = vadd.f32 %v1087_v49, %v1086_v13  ;;  %v893_v33 = vadd.f32 %v892_v29, %v891_v52  ;;  %v992_v13 = vmul.f32 %v1914_v25, %v1914_v25  ;;  %v1109_v29 = vsel %vm738_vm0, %v991_v30, 0.0 }
 0x163   : > { %v918_v25 = vsel %vm738_vm0, %v1977_v55, 0.0 }
 0x164   : > { %v1090_v39 = vadd.f32 %v1089_v12, %v1088_v16  ;;  %v895_v58 = vadd.f32 %v894_v21, %v893_v33  ;;  %v1111_v12 = vsel %vm738_vm0, %v992_v13, 0.0  ;;  %v994_v21 = vmul.f32 %v1977_v55, %v1977_v55 }
 0x165   : > { %v922_v55 = vsel %vm738_vm0, %v2035_v1, 0.0 }
 0x166   : > { %v1092_v15 = vadd.f32 %v1091_v5, %v1090_v39  ;;  %v897_v38 = vadd.f32 %v896_v19, %v895_v58  ;;  %v1113_v58 = vsel %vm738_vm0, %v993_v50, 0.0 }
 0x168   : > { %v899_v23 = vadd.f32 %v898_v18, %v897_v38  ;;  %v1094_v61 = vadd.f32 %v1093_v57, %v1092_v15  ;;  %v1115_v15 = vsel %vm738_vm0, %v994_v21, 0.0  ;;  %v996_v38 = vmul.f32 %v2035_v1, %v2035_v1 }
 0x169   : > { %v1117_v57 = vsel %vm738_vm0, %v995_v60, 0.0  ;;  %v926_v1 = vsel %vm738_vm0, %v2085_v2, 0.0 }
 0x16a   : > { %v901_v27 = vadd.f32 %v900_v48, %v899_v23  ;;  %v1096_v4 = vadd.f32 %v1095_v42, %v1094_v61  ;;  %v997_v23 = vmul.f32 %v2060_v3, %v2060_v3  ;;  %v1119_v48 = vsel %vm738_vm0, %v996_v38, 0.0 }
 0x16b   : > { %v928_v3 = vsel %vm738_vm0, %v2110_v46, 0.0 }
 0x16c   : > { %v903_v31 = vadd.f32 %v902_v20, %v901_v27  ;;  %v1098_v22 = vadd.f32 %v1097_v56, %v1096_v4  ;;  %v1121_v56 = vsel %vm738_vm0, %v997_v23, 0.0  ;;  %v999_v20 = vmul.f32 %v2110_v46, %v2110_v46 }
 0x16e   : > { %v905_v9 = vadd.f32 %v904_v24, %v903_v31  ;;  %v1100_v59 = vadd.f32 %v1099_v51, %v1098_v22  ;;  %v1123_v22 = vsel %vm738_vm0, %v998_v40, 0.0  ;;  %v1125_v10 = vsel %vm738_vm0, %v999_v20, 0.0 }
 0x170   : > { %v907_v62 = vadd.f32 %v906_v28, %v905_v9  ;;  %v1102_v14 = vadd.f32 %v1101_v11, %v1100_v59 }
 0x172   : > { %v909_v41 = vadd.f32 %v908_v32, %v907_v62  ;;  %v1104_v45 = vadd.f32 %v1103_v26, %v1102_v14 }
 0x174   : > { %v1106_v63 = vadd.f32 %v1105_v6, %v1104_v45  ;;  %v911_v34 = vadd.f32 %v910_v36, %v909_v41 }
 0x176   : > { %v913_v52 = vadd.f32 %v912_v43, %v911_v34  ;;  %v1108_v49 = vadd.f32 %v1107_v47, %v1106_v63 }
 0x178   : > { %v915_v16 = vadd.f32 %v914_v0, %v913_v52  ;;  %v1110_v33 = vadd.f32 %v1109_v29, %v1108_v49 }
 0x17a   : > { %v917_v37 = vadd.f32 %v916_v53, %v915_v16  ;;  %v1112_v39 = vadd.f32 %v1111_v12, %v1110_v33 }
 0x17c   : > { %v919_v5 = vadd.f32 %v918_v25, %v917_v37  ;;  %v1114_v19 = vadd.f32 %v1113_v58, %v1112_v39 }
 0x17e   : > { %v921_v18 = vadd.f32 %v920_v7, %v919_v5  ;;  %v1116_v54 = vadd.f32 %v1115_v15, %v1114_v19 }
 0x180   : > { %v1118_v61 = vadd.f32 %v1117_v57, %v1116_v54  ;;  %v923_v42 = vadd.f32 %v922_v55, %v921_v18 }
 0x182   : > { %v1120_v27 = vadd.f32 %v1119_v48, %v1118_v61  ;;  %v925_v4 = vadd.f32 %v924_v44, %v923_v42 }
 0x184   : > { %v1122_v8 = vadd.f32 %v1121_v56, %v1120_v27  ;;  %v927_v31 = vadd.f32 %v926_v1, %v925_v4 }
 0x186   : > { %v1124_v51 = vadd.f32 %v1123_v22, %v1122_v8  ;;  %v929_v24 = vadd.f32 %v928_v3, %v927_v31 }
 0x188   : > { %v930_v9 = vrot.slane %v929_v24, 4  ;;  %v1126_v59 = vadd.f32 %v1125_v10, %v1124_v51 }
 0x18a   : > { %v931_v11 = vadd.f32 %v930_v9, %v929_v24  ;;  %v1127_v28 = vrot.slane %v1126_v59, 4 }
 0x18c   : > { %v932_v2 = vrot.slane %v931_v11, 2  ;;  %v1128_v35 = vadd.f32 %v1127_v28, %v1126_v59 }
 0x18e   : > { %v933_v62 = vadd.f32 %v932_v2, %v931_v11  ;;  %v1129_v14 = vrot.slane %v1128_v35, 2 }
 0x190   : > { %v934_v26 = vrot.slane %v933_v62, 1  ;;  %v1130_v32 = vadd.f32 %v1129_v14, %v1128_v35 }
 0x192   : > { %v1131_v17 = vrot.slane %v1130_v32, 1  ;;  %v935_v46 = vadd.f32 %v934_v26, %v933_v62 }
 0x194   : > { %v1132_v41 = vadd.f32 %v1131_v17, %v1130_v32 }
 0x196   : > { %v1134_v45 = vsel %vm1133_vm1, %v935_v46, %v1132_v41 }
 0x197   : > { %1136 = vst.msk [vmem:[%s248_s4] sm:$0x3] %vm1135_vm2, %v1134_v45 }
 0x198 PF: > { %s14_s14 = sadd.s32 1, %s1564_s14   ;;  %s2231_s12 = smov %s1560_s13 }
 0x199   : > { %p11_p5 = scmp.ge.s32.totalorder %s14_s14, 6   ;;  %s2232_s13 = smov %s2234_s15 }
 0x19b   :  { %13 = sbr.rel (!%p11_p5) target bundleno = 2 (0x2), region = 73 }

// kernel: generator_forward.16
= control target key start
LH: loop header
LB: loop body
LE: loop exit
PB: predicated region body
PF: predicated region fallthrough
CT: control target
= control target key end

     0   :  { %s1058_s12 = smov 0   ;;  %s1743_s0 = inlined_call_operand.vmem [shape: f32[2048,16], index: 0, kind: input, shape index: {}]   ;;  %s1744_s1 = inlined_call_operand.vmem [shape: f32[1,16], index: 1, kind: input, shape index: {}]   ;;  %s1745_s2 = inlined_call_operand.vmem [shape: f32[1,16], index: 2, kind: input, shape index: {}]   ;;  %s1746_s3 = inlined_call_operand.vmem [shape: bf16[2048,16], index: 3, kind: output, shape index: {}]  }
   0x1 LB: > { %s1007_s13 = sadd.s32 4294967295, %s1036_s12   ;;  %p1011_p0 = scmp.ge.s32.totalorder %s1036_s12, 1  ;;  %s1036_s12 = sphi %s1058_s12, %s13_s12  }
   0x2   : > { %p138_p1 = scmp.lt.s32.totalorder %s1036_s12, 3 }
   0x4   : > { %p139_p2 = pnand %p1011_p0, %p138_p1 }
   0x5   : > { %s1012_s14 = sshll.u32 (!%p139_p2), %s1007_s13, 7 }
   0x6   : > { %142 = sbr.rel (%p139_p2) target bundleno = 151 (0x97), region = 32  ;;  %p163_p3 = scmp.lt.s32.totalorder (!%p139_p2), %s1012_s14, 255 }
   0xb   : > { %s1748_s14 = smov (!%p163_p3, %s1012_s14), 255  ;;  %v1071_v0 = vld [vmem:[%s1744_s1] ss:$0 sm:$0xff]  ;;  %vm822_vm0 = vcmask 125952  }
   0xc   : > { %s1013_s17 = sshll.u32 %s1748_s14, 3  ;;  %v1082_v1 = vld [vmem:[%s1745_s2] ss:$0 sm:$0xff]  ;;  %s1015_s23 = sshll.u32 %s1748_s14, 2 }
   0xd   : > { %s1077_s20 = scalar_lea.vmem %s1743_s0, %s1013_s17  ;;  %s1111_s26 = scalar_lea.vmem %s1746_s3, %s1015_s23 }
   0xe   : > { %v174_v2 = vld [vmem:[%s1077_s20] sm:$0xff]  ;;  %v175_v3 = vld [vmem:[%s1077_s20 + $0x8] sm:$0xff]  ;;  %v176_v4 = vld [vmem:[%s1077_s20 + $0x10] sm:$0xff] }
   0xf   : > { %v306_v5 = vmul.f32 %v1071_v0, %v174_v2  ;;  %v307_v6 = vmul.f32 %v1071_v0, %v175_v3  ;;  %v308_v7 = vmul.f32 %v1071_v0, %v176_v4  ;;  %v177_v8 = vld [vmem:[%s1077_s20 + $0x18] sm:$0xff]  ;;  %v178_v9 = vld [vmem:[%s1077_s20 + $0x20] sm:$0xff]  ;;  %v179_v10 = vld [vmem:[%s1077_s20 + $0x28] sm:$0xff] }
  0x10   : > { %v309_v11 = vmul.f32 %v1071_v0, %v177_v8  ;;  %v310_v12 = vmul.f32 %v1071_v0, %v178_v9  ;;  %v311_v13 = vmul.f32 %v1071_v0, %v179_v10  ;;  %v180_v14 = vld [vmem:[%s1077_s20 + $0x30] sm:$0xff]  ;;  %v181_v15 = vld [vmem:[%s1077_s20 + $0x38] sm:$0xff]  ;;  %v182_v32 = vld [vmem:[%s1077_s20 + $0x40] sm:$0xff] }
  0x11   : > { %v438_v16 = vadd.f32 %v1082_v1, %v306_v5  ;;  %v439_v17 = vadd.f32 %v1082_v1, %v307_v6  ;;  %v440_v18 = vadd.f32 %v1082_v1, %v308_v7  ;;  %v312_v19 = vmul.f32 %v1071_v0, %v180_v14  ;;  %v183_v33 = vld [vmem:[%s1077_s20 + $0x48] sm:$0xff]  ;;  %v184_v34 = vld [vmem:[%s1077_s20 + $0x50] sm:$0xff]  ;;  %v185_v39 = vld [vmem:[%s1077_s20 + $0x58] sm:$0xff] }
  0x12   : > { %v441_v20 = vadd.f32 %v1082_v1, %v309_v11  ;;  %v442_v21 = vadd.f32 %v1082_v1, %v310_v12  ;;  %v443_v22 = vadd.f32 %v1082_v1, %v311_v13  ;;  %v313_v23 = vmul.f32 %v1071_v0, %v181_v15  ;;  %v186_v40 = vld [vmem:[%s1077_s20 + $0x60] sm:$0xff]  ;;  %v187_v41 = vld [vmem:[%s1077_s20 + $0x68] sm:$0xff]  ;;  %v188_v46 = vld [vmem:[%s1077_s20 + $0x70] sm:$0xff] }
  0x13   : > { %v566_v24 = vmax.f32 %v438_v16, 0.0  ;;  %v567_v25 = vmax.f32 %v439_v17, 0.0  ;;  %v568_v26 = vmax.f32 %v440_v18, 0.0  ;;  %v444_v27 = vadd.f32 %v1082_v1, %v312_v19  ;;  %v189_v51 = vld [vmem:[%s1077_s20 + $0x78] sm:$0xff]  ;;  %v190_v2 = vld [vmem:[%s1077_s20 + $0x80] sm:$0xff]  ;;  %v191_v7 = vld [vmem:[%s1077_s20 + $0x88] sm:$0xff] }
  0x14   : > { %v569_v28 = vmax.f32 %v441_v20, 0.0  ;;  %v570_v29 = vmax.f32 %v442_v21, 0.0  ;;  %v571_v30 = vmax.f32 %v443_v22, 0.0  ;;  %v445_v31 = vadd.f32 %v1082_v1, %v313_v23  ;;  %v192_v12 = vld [vmem:[%s1077_s20 + $0x90] sm:$0xff]  ;;  %v193_v17 = vld [vmem:[%s1077_s20 + $0x98] sm:$0xff]  ;;  %v194_v18 = vld [vmem:[%s1077_s20 + $0xa0] sm:$0xff] }
  0x15   : > { %v694_v35 = vpack.c.bf16 %v566_v24, %v566_v24  ;;  %v695_v36 = vpack.c.bf16 %v567_v25, %v567_v25  ;;  %v696_v37 = vpack.c.bf16 %v568_v26, %v568_v26  ;;  %v572_v38 = vmax.f32 %v444_v27, 0.0  ;;  %v195_v19 = vld [vmem:[%s1077_s20 + $0xa8] sm:$0xff]  ;;  %v196_v24 = vld [vmem:[%s1077_s20 + $0xb0] sm:$0xff] }
  0x16   : > { %v697_v42 = vpack.c.bf16 %v569_v28, %v569_v28  ;;  %v698_v43 = vpack.c.bf16 %v570_v29, %v570_v29  ;;  %v699_v44 = vpack.c.bf16 %v571_v30, %v571_v30  ;;  %v573_v45 = vmax.f32 %v445_v31, 0.0  ;;  %v197_v29 = vld [vmem:[%s1077_s20 + $0xb8] sm:$0xff] }
  0x17   : > { %823 = vst.msk [vmem:[%s1111_s26] sm:$0xf] %vm822_vm0, %v694_v35  ;;  %v700_v47 = vpack.c.bf16 %v572_v38, %v572_v38  ;;  %v314_v48 = vmul.f32 %v1071_v0, %v182_v32  ;;  %v315_v49 = vmul.f32 %v1071_v0, %v183_v33  ;;  %v316_v50 = vmul.f32 %v1071_v0, %v184_v34 }
  0x18   : > { %824 = vst.msk [vmem:[%s1111_s26 + $0x4] sm:$0xf] %vm822_vm0, %v695_v36  ;;  %v701_v52 = vpack.c.bf16 %v573_v45, %v573_v45  ;;  %v317_v53 = vmul.f32 %v1071_v0, %v185_v39  ;;  %v318_v54 = vmul.f32 %v1071_v0, %v186_v40  ;;  %v319_v55 = vmul.f32 %v1071_v0, %v187_v41 }
  0x19   : > { %825 = vst.msk [vmem:[%s1111_s26 + $0x8] sm:$0xf] %vm822_vm0, %v696_v37  ;;  %v446_v56 = vadd.f32 %v1082_v1, %v314_v48  ;;  %v447_v57 = vadd.f32 %v1082_v1, %v315_v49  ;;  %v448_v58 = vadd.f32 %v1082_v1, %v316_v50  ;;  %v320_v59 = vmul.f32 %v1071_v0, %v188_v46 }
  0x1a   : > { %826 = vst.msk [vmem:[%s1111_s26 + $0xc] sm:$0xf] %vm822_vm0, %v697_v42  ;;  %v449_v60 = vadd.f32 %v1082_v1, %v317_v53  ;;  %v450_v61 = vadd.f32 %v1082_v1, %v318_v54  ;;  %v451_v62 = vadd.f32 %v1082_v1, %v319_v55  ;;  %v321_v63 = vmul.f32 %v1071_v0, %v189_v51  ;;  %v198_v42 = vld [vmem:[%s1077_s20 + $0xc0] sm:$0xff] }
  0x1b   : > { %827 = vst.msk [vmem:[%s1111_s26 + $0x10] sm:$0xf] %vm822_vm0, %v698_v43  ;;  %v574_v3 = vmax.f32 %v446_v56, 0.0  ;;  %v575_v4 = vmax.f32 %v447_v57, 0.0  ;;  %v576_v5 = vmax.f32 %v448_v58, 0.0  ;;  %v452_v6 = vadd.f32 %v1082_v1, %v320_v59  ;;  %v201_v57 = vld [vmem:[%s1077_s20 + $0xd8] sm:$0xff] }
  0x1c   : > { %828 = vst.msk [vmem:[%s1111_s26 + $0x14] sm:$0xf] %vm822_vm0, %v699_v44  ;;  %v577_v8 = vmax.f32 %v449_v60, 0.0  ;;  %v578_v9 = vmax.f32 %v450_v61, 0.0  ;;  %v579_v10 = vmax.f32 %v451_v62, 0.0  ;;  %v453_v11 = vadd.f32 %v1082_v1, %v321_v63  ;;  %v202_v58 = vld [vmem:[%s1077_s20 + $0xe0] sm:$0xff] }
  0x1d   : > { %829 = vst.msk [vmem:[%s1111_s26 + $0x18] sm:$0xf] %vm822_vm0, %v700_v47  ;;  %v702_v13 = vpack.c.bf16 %v574_v3, %v574_v3  ;;  %v703_v14 = vpack.c.bf16 %v575_v4, %v575_v4  ;;  %v704_v15 = vpack.c.bf16 %v576_v5, %v576_v5  ;;  %v580_v16 = vmax.f32 %v452_v6, 0.0  ;;  %v199_v47 = vld [vmem:[%s1077_s20 + $0xc8] sm:$0xff] }
  0x1e   : > { %830 = vst.msk [vmem:[%s1111_s26 + $0x1c] sm:$0xf] %vm822_vm0, %v701_v52  ;;  %v705_v20 = vpack.c.bf16 %v577_v8, %v577_v8  ;;  %v706_v21 = vpack.c.bf16 %v578_v9, %v578_v9  ;;  %v707_v22 = vpack.c.bf16 %v579_v10, %v579_v10  ;;  %v581_v23 = vmax.f32 %v453_v11, 0.0  ;;  %v200_v52 = vld [vmem:[%s1077_s20 + $0xd0] sm:$0xff]  ;;  %v203_v59 = vld [vmem:[%s1077_s20 + $0xe8] sm:$0xff] }
  0x1f   : > { %831 = vst.msk [vmem:[%s1111_s26 + $0x20] sm:$0xf] %vm822_vm0, %v702_v13  ;;  %v708_v25 = vpack.c.bf16 %v580_v16, %v580_v16  ;;  %v322_v26 = vmul.f32 %v1071_v0, %v190_v2  ;;  %v323_v27 = vmul.f32 %v1071_v0, %v191_v7  ;;  %v324_v28 = vmul.f32 %v1071_v0, %v192_v12  ;;  %v204_v2 = vld [vmem:[%s1077_s20 + $0xf0] sm:$0xff]  ;;  %v205_v7 = vld [vmem:[%s1077_s20 + $0xf8] sm:$0xff] }
  0x20   : > { %832 = vst.msk [vmem:[%s1111_s26 + $0x24] sm:$0xf] %vm822_vm0, %v703_v14  ;;  %v709_v30 = vpack.c.bf16 %v581_v23, %v581_v23  ;;  %v325_v31 = vmul.f32 %v1071_v0, %v193_v17  ;;  %v326_v32 = vmul.f32 %v1071_v0, %v194_v18  ;;  %v327_v33 = vmul.f32 %v1071_v0, %v195_v19 }
  0x21   : > { %833 = vst.msk [vmem:[%s1111_s26 + $0x28] sm:$0xf] %vm822_vm0, %v704_v15  ;;  %v454_v34 = vadd.f32 %v1082_v1, %v322_v26  ;;  %v455_v35 = vadd.f32 %v1082_v1, %v323_v27  ;;  %v456_v36 = vadd.f32 %v1082_v1, %v324_v28  ;;  %v328_v37 = vmul.f32 %v1071_v0, %v196_v24 }
  0x22   : > { %834 = vst.msk [vmem:[%s1111_s26 + $0x2c] sm:$0xf] %vm822_vm0, %v705_v20  ;;  %v457_v38 = vadd.f32 %v1082_v1, %v325_v31  ;;  %v458_v39 = vadd.f32 %v1082_v1, %v326_v32  ;;  %v459_v40 = vadd.f32 %v1082_v1, %v327_v33  ;;  %v329_v41 = vmul.f32 %v1071_v0, %v197_v29  ;;  %v206_v20 = vld [vmem:[%s1077_s20 + $0x100] sm:$0xff] }
  0x23   : > { %835 = vst.msk [vmem:[%s1111_s26 + $0x30] sm:$0xf] %vm822_vm0, %v706_v21  ;;  %v582_v43 = vmax.f32 %v454_v34, 0.0  ;;  %v583_v44 = vmax.f32 %v455_v35, 0.0  ;;  %v584_v45 = vmax.f32 %v456_v36, 0.0  ;;  %v460_v46 = vadd.f32 %v1082_v1, %v328_v37  ;;  %v209_v35 = vld [vmem:[%s1077_s20 + $0x118] sm:$0xff] }
  0x24   : > { %836 = vst.msk [vmem:[%s1111_s26 + $0x34] sm:$0xf] %vm822_vm0, %v707_v22  ;;  %v585_v48 = vmax.f32 %v457_v38, 0.0  ;;  %v586_v49 = vmax.f32 %v458_v39, 0.0  ;;  %v587_v50 = vmax.f32 %v459_v40, 0.0  ;;  %v461_v51 = vadd.f32 %v1082_v1, %v329_v41  ;;  %v210_v36 = vld [vmem:[%s1077_s20 + $0x120] sm:$0xff] }
  0x25   : > { %837 = vst.msk [vmem:[%s1111_s26 + $0x38] sm:$0xf] %vm822_vm0, %v708_v25  ;;  %v710_v53 = vpack.c.bf16 %v582_v43, %v582_v43  ;;  %v711_v54 = vpack.c.bf16 %v583_v44, %v583_v44  ;;  %v712_v55 = vpack.c.bf16 %v584_v45, %v584_v45  ;;  %v588_v56 = vmax.f32 %v460_v46, 0.0  ;;  %v207_v25 = vld [vmem:[%s1077_s20 + $0x108] sm:$0xff] }
  0x26   : > { %838 = vst.msk [vmem:[%s1111_s26 + $0x3c] sm:$0xf] %vm822_vm0, %v709_v30  ;;  %v713_v60 = vpack.c.bf16 %v585_v48, %v585_v48  ;;  %v714_v61 = vpack.c.bf16 %v586_v49, %v586_v49  ;;  %v715_v62 = vpack.c.bf16 %v587_v50, %v587_v50  ;;  %v589_v63 = vmax.f32 %v461_v51, 0.0  ;;  %v208_v30 = vld [vmem:[%s1077_s20 + $0x110] sm:$0xff]  ;;  %v211_v37 = vld [vmem:[%s1077_s20 + $0x128] sm:$0xff] }
  0x27   : > { %839 = vst.msk [vmem:[%s1111_s26 + $0x40] sm:$0xf] %vm822_vm0, %v710_v53  ;;  %v716_v3 = vpack.c.bf16 %v588_v56, %v588_v56  ;;  %v330_v4 = vmul.f32 %v1071_v0, %v198_v42  ;;  %v331_v5 = vmul.f32 %v1071_v0, %v199_v47  ;;  %v332_v6 = vmul.f32 %v1071_v0, %v200_v52  ;;  %v212_v42 = vld [vmem:[%s1077_s20 + $0x130] sm:$0xff]  ;;  %v213_v47 = vld [vmem:[%s1077_s20 + $0x138] sm:$0xff] }
  0x28   : > { %840 = vst.msk [vmem:[%s1111_s26 + $0x44] sm:$0xf] %vm822_vm0, %v711_v54  ;;  %v717_v8 = vpack.c.bf16 %v589_v63, %v589_v63  ;;  %v333_v9 = vmul.f32 %v1071_v0, %v201_v57  ;;  %v334_v10 = vmul.f32 %v1071_v0, %v202_v58  ;;  %v335_v11 = vmul.f32 %v1071_v0, %v203_v59 }
  0x29   : > { %841 = vst.msk [vmem:[%s1111_s26 + $0x48] sm:$0xf] %vm822_vm0, %v712_v55  ;;  %v462_v12 = vadd.f32 %v1082_v1, %v330_v4  ;;  %v463_v13 = vadd.f32 %v1082_v1, %v331_v5  ;;  %v464_v14 = vadd.f32 %v1082_v1, %v332_v6  ;;  %v336_v15 = vmul.f32 %v1071_v0, %v204_v2 }
  0x2a   : > { %842 = vst.msk [vmem:[%s1111_s26 + $0x4c] sm:$0xf] %vm822_vm0, %v713_v60  ;;  %v465_v16 = vadd.f32 %v1082_v1, %v333_v9  ;;  %v466_v17 = vadd.f32 %v1082_v1, %v334_v10  ;;  %v467_v18 = vadd.f32 %v1082_v1, %v335_v11  ;;  %v337_v19 = vmul.f32 %v1071_v0, %v205_v7  ;;  %v214_v60 = vld [vmem:[%s1077_s20 + $0x140] sm:$0xff] }
  0x2b   : > { %843 = vst.msk [vmem:[%s1111_s26 + $0x50] sm:$0xf] %vm822_vm0, %v714_v61  ;;  %v590_v21 = vmax.f32 %v462_v12, 0.0  ;;  %v591_v22 = vmax.f32 %v463_v13, 0.0  ;;  %v592_v23 = vmax.f32 %v464_v14, 0.0  ;;  %v468_v24 = vadd.f32 %v1082_v1, %v336_v15  ;;  %v217_v13 = vld [vmem:[%s1077_s20 + $0x158] sm:$0xff] }
  0x2c   : > { %844 = vst.msk [vmem:[%s1111_s26 + $0x54] sm:$0xf] %vm822_vm0, %v715_v62  ;;  %v593_v26 = vmax.f32 %v465_v16, 0.0  ;;  %v594_v27 = vmax.f32 %v466_v17, 0.0  ;;  %v595_v28 = vmax.f32 %v467_v18, 0.0  ;;  %v469_v29 = vadd.f32 %v1082_v1, %v337_v19  ;;  %v218_v14 = vld [vmem:[%s1077_s20 + $0x160] sm:$0xff] }
  0x2d   : > { %845 = vst.msk [vmem:[%s1111_s26 + $0x58] sm:$0xf] %vm822_vm0, %v716_v3  ;;  %v718_v31 = vpack.c.bf16 %v590_v21, %v590_v21  ;;  %v719_v32 = vpack.c.bf16 %v591_v22, %v591_v22  ;;  %v720_v33 = vpack.c.bf16 %v592_v23, %v592_v23  ;;  %v596_v34 = vmax.f32 %v468_v24, 0.0  ;;  %v215_v3 = vld [vmem:[%s1077_s20 + $0x148] sm:$0xff] }
  0x2e   : > { %846 = vst.msk [vmem:[%s1111_s26 + $0x5c] sm:$0xf] %vm822_vm0, %v717_v8  ;;  %v721_v38 = vpack.c.bf16 %v593_v26, %v593_v26  ;;  %v722_v39 = vpack.c.bf16 %v594_v27, %v594_v27  ;;  %v723_v40 = vpack.c.bf16 %v595_v28, %v595_v28  ;;  %v597_v41 = vmax.f32 %v469_v29, 0.0  ;;  %v216_v8 = vld [vmem:[%s1077_s20 + $0x150] sm:$0xff]  ;;  %v219_v15 = vld [vmem:[%s1077_s20 + $0x168] sm:$0xff] }
  0x2f   : > { %847 = vst.msk [vmem:[%s1111_s26 + $0x60] sm:$0xf] %vm822_vm0, %v718_v31  ;;  %v724_v43 = vpack.c.bf16 %v596_v34, %v596_v34  ;;  %v338_v44 = vmul.f32 %v1071_v0, %v206_v20  ;;  %v339_v45 = vmul.f32 %v1071_v0, %v207_v25  ;;  %v340_v46 = vmul.f32 %v1071_v0, %v208_v30  ;;  %v220_v20 = vld [vmem:[%s1077_s20 + $0x170] sm:$0xff]  ;;  %v221_v25 = vld [vmem:[%s1077_s20 + $0x178] sm:$0xff] }
  0x30   : > { %848 = vst.msk [vmem:[%s1111_s26 + $0x64] sm:$0xf] %vm822_vm0, %v719_v32  ;;  %v725_v48 = vpack.c.bf16 %v597_v41, %v597_v41  ;;  %v341_v49 = vmul.f32 %v1071_v0, %v209_v35  ;;  %v342_v50 = vmul.f32 %v1071_v0, %v210_v36  ;;  %v343_v51 = vmul.f32 %v1071_v0, %v211_v37 }
  0x31   : > { %849 = vst.msk [vmem:[%s1111_s26 + $0x68] sm:$0xf] %vm822_vm0, %v720_v33  ;;  %v470_v52 = vadd.f32 %v1082_v1, %v338_v44  ;;  %v471_v53 = vadd.f32 %v1082_v1, %v339_v45  ;;  %v472_v54 = vadd.f32 %v1082_v1, %v340_v46  ;;  %v344_v55 = vmul.f32 %v1071_v0, %v212_v42 }
  0x32   : > { %850 = vst.msk [vmem:[%s1111_s26 + $0x6c] sm:$0xf] %vm822_vm0, %v721_v38  ;;  %v473_v56 = vadd.f32 %v1082_v1, %v341_v49  ;;  %v474_v57 = vadd.f32 %v1082_v1, %v342_v50  ;;  %v475_v58 = vadd.f32 %v1082_v1, %v343_v51  ;;  %v345_v59 = vmul.f32 %v1071_v0, %v213_v47  ;;  %v222_v38 = vld [vmem:[%s1077_s20 + $0x180] sm:$0xff] }
  0x33   : > { %851 = vst.msk [vmem:[%s1111_s26 + $0x70] sm:$0xf] %vm822_vm0, %v722_v39  ;;  %v598_v61 = vmax.f32 %v470_v52, 0.0  ;;  %v599_v62 = vmax.f32 %v471_v53, 0.0  ;;  %v600_v63 = vmax.f32 %v472_v54, 0.0  ;;  %v476_v2 = vadd.f32 %v1082_v1, %v344_v55  ;;  %v225_v53 = vld [vmem:[%s1077_s20 + $0x198] sm:$0xff] }
  0x34   : > { %852 = vst.msk [vmem:[%s1111_s26 + $0x74] sm:$0xf] %vm822_vm0, %v723_v40  ;;  %v601_v4 = vmax.f32 %v473_v56, 0.0  ;;  %v602_v5 = vmax.f32 %v474_v57, 0.0  ;;  %v603_v6 = vmax.f32 %v475_v58, 0.0  ;;  %v477_v7 = vadd.f32 %v1082_v1, %v345_v59  ;;  %v226_v54 = vld [vmem:[%s1077_s20 + $0x1a0] sm:$0xff] }
  0x35   : > { %853 = vst.msk [vmem:[%s1111_s26 + $0x78] sm:$0xf] %vm822_vm0, %v724_v43  ;;  %v726_v9 = vpack.c.bf16 %v598_v61, %v598_v61  ;;  %v727_v10 = vpack.c.bf16 %v599_v62, %v599_v62  ;;  %v728_v11 = vpack.c.bf16 %v600_v63, %v600_v63  ;;  %v604_v12 = vmax.f32 %v476_v2, 0.0  ;;  %v223_v43 = vld [vmem:[%s1077_s20 + $0x188] sm:$0xff] }
  0x36   : > { %854 = vst.msk [vmem:[%s1111_s26 + $0x7c] sm:$0xf] %vm822_vm0, %v725_v48  ;;  %v729_v16 = vpack.c.bf16 %v601_v4, %v601_v4  ;;  %v730_v17 = vpack.c.bf16 %v602_v5, %v602_v5  ;;  %v731_v18 = vpack.c.bf16 %v603_v6, %v603_v6  ;;  %v605_v19 = vmax.f32 %v477_v7, 0.0  ;;  %v224_v48 = vld [vmem:[%s1077_s20 + $0x190] sm:$0xff]  ;;  %v227_v55 = vld [vmem:[%s1077_s20 + $0x1a8] sm:$0xff] }
  0x37   : > { %855 = vst.msk [vmem:[%s1111_s26 + $0x80] sm:$0xf] %vm822_vm0, %v726_v9  ;;  %v732_v21 = vpack.c.bf16 %v604_v12, %v604_v12  ;;  %v346_v22 = vmul.f32 %v1071_v0, %v214_v60  ;;  %v347_v23 = vmul.f32 %v1071_v0, %v215_v3  ;;  %v348_v24 = vmul.f32 %v1071_v0, %v216_v8  ;;  %v228_v60 = vld [vmem:[%s1077_s20 + $0x1b0] sm:$0xff]  ;;  %v229_v3 = vld [vmem:[%s1077_s20 + $0x1b8] sm:$0xff] }
  0x38   : > { %856 = vst.msk [vmem:[%s1111_s26 + $0x84] sm:$0xf] %vm822_vm0, %v727_v10  ;;  %v733_v26 = vpack.c.bf16 %v605_v19, %v605_v19  ;;  %v349_v27 = vmul.f32 %v1071_v0, %v217_v13  ;;  %v350_v28 = vmul.f32 %v1071_v0, %v218_v14  ;;  %v351_v29 = vmul.f32 %v1071_v0, %v219_v15 }
  0x39   : > { %857 = vst.msk [vmem:[%s1111_s26 + $0x88] sm:$0xf] %vm822_vm0, %v728_v11  ;;  %v478_v30 = vadd.f32 %v1082_v1, %v346_v22  ;;  %v479_v31 = vadd.f32 %v1082_v1, %v347_v23  ;;  %v480_v32 = vadd.f32 %v1082_v1, %v348_v24  ;;  %v352_v33 = vmul.f32 %v1071_v0, %v220_v20 }
  0x3a   : > { %858 = vst.msk [vmem:[%s1111_s26 + $0x8c] sm:$0xf] %vm822_vm0, %v729_v16  ;;  %v481_v34 = vadd.f32 %v1082_v1, %v349_v27  ;;  %v482_v35 = vadd.f32 %v1082_v1, %v350_v28  ;;  %v483_v36 = vadd.f32 %v1082_v1, %v351_v29  ;;  %v353_v37 = vmul.f32 %v1071_v0, %v221_v25  ;;  %v230_v16 = vld [vmem:[%s1077_s20 + $0x1c0] sm:$0xff] }
  0x3b   : > { %859 = vst.msk [vmem:[%s1111_s26 + $0x90] sm:$0xf] %vm822_vm0, %v730_v17  ;;  %v606_v39 = vmax.f32 %v478_v30, 0.0  ;;  %v607_v40 = vmax.f32 %v479_v31, 0.0  ;;  %v608_v41 = vmax.f32 %v480_v32, 0.0  ;;  %v484_v42 = vadd.f32 %v1082_v1, %v352_v33  ;;  %v233_v31 = vld [vmem:[%s1077_s20 + $0x1d8] sm:$0xff] }
  0x3c   : > { %860 = vst.msk [vmem:[%s1111_s26 + $0x94] sm:$0xf] %vm822_vm0, %v731_v18  ;;  %v609_v44 = vmax.f32 %v481_v34, 0.0  ;;  %v610_v45 = vmax.f32 %v482_v35, 0.0  ;;  %v611_v46 = vmax.f32 %v483_v36, 0.0  ;;  %v485_v47 = vadd.f32 %v1082_v1, %v353_v37  ;;  %v234_v32 = vld [vmem:[%s1077_s20 + $0x1e0] sm:$0xff] }
  0x3d   : > { %861 = vst.msk [vmem:[%s1111_s26 + $0x98] sm:$0xf] %vm822_vm0, %v732_v21  ;;  %v734_v49 = vpack.c.bf16 %v606_v39, %v606_v39  ;;  %v735_v50 = vpack.c.bf16 %v607_v40, %v607_v40  ;;  %v736_v51 = vpack.c.bf16 %v608_v41, %v608_v41  ;;  %v612_v52 = vmax.f32 %v484_v42, 0.0  ;;  %v231_v21 = vld [vmem:[%s1077_s20 + $0x1c8] sm:$0xff] }
  0x3e   : > { %862 = vst.msk [vmem:[%s1111_s26 + $0x9c] sm:$0xf] %vm822_vm0, %v733_v26  ;;  %v737_v56 = vpack.c.bf16 %v609_v44, %v609_v44  ;;  %v738_v57 = vpack.c.bf16 %v610_v45, %v610_v45  ;;  %v739_v58 = vpack.c.bf16 %v611_v46, %v611_v46  ;;  %v613_v59 = vmax.f32 %v485_v47, 0.0  ;;  %v232_v26 = vld [vmem:[%s1077_s20 + $0x1d0] sm:$0xff]  ;;  %v235_v33 = vld [vmem:[%s1077_s20 + $0x1e8] sm:$0xff] }
  0x3f   : > { %863 = vst.msk [vmem:[%s1111_s26 + $0xa0] sm:$0xf] %vm822_vm0, %v734_v49  ;;  %v740_v61 = vpack.c.bf16 %v612_v52, %v612_v52  ;;  %v354_v62 = vmul.f32 %v1071_v0, %v222_v38  ;;  %v355_v63 = vmul.f32 %v1071_v0, %v223_v43  ;;  %v356_v2 = vmul.f32 %v1071_v0, %v224_v48  ;;  %v236_v38 = vld [vmem:[%s1077_s20 + $0x1f0] sm:$0xff]  ;;  %v237_v43 = vld [vmem:[%s1077_s20 + $0x1f8] sm:$0xff] }
  0x40   : > { %864 = vst.msk [vmem:[%s1111_s26 + $0xa4] sm:$0xf] %vm822_vm0, %v735_v50  ;;  %v741_v4 = vpack.c.bf16 %v613_v59, %v613_v59  ;;  %v357_v5 = vmul.f32 %v1071_v0, %v225_v53  ;;  %v358_v6 = vmul.f32 %v1071_v0, %v226_v54  ;;  %v359_v7 = vmul.f32 %v1071_v0, %v227_v55 }
  0x41   : > { %865 = vst.msk [vmem:[%s1111_s26 + $0xa8] sm:$0xf] %vm822_vm0, %v736_v51  ;;  %v486_v8 = vadd.f32 %v1082_v1, %v354_v62  ;;  %v487_v9 = vadd.f32 %v1082_v1, %v355_v63  ;;  %v488_v10 = vadd.f32 %v1082_v1, %v356_v2  ;;  %v360_v11 = vmul.f32 %v1071_v0, %v228_v60 }
  0x42   : > { %866 = vst.msk [vmem:[%s1111_s26 + $0xac] sm:$0xf] %vm822_vm0, %v737_v56  ;;  %v489_v12 = vadd.f32 %v1082_v1, %v357_v5  ;;  %v490_v13 = vadd.f32 %v1082_v1, %v358_v6  ;;  %v491_v14 = vadd.f32 %v1082_v1, %v359_v7  ;;  %v361_v15 = vmul.f32 %v1071_v0, %v229_v3  ;;  %v238_v56 = vld [vmem:[%s1077_s20 + $0x200] sm:$0xff] }
  0x43   : > { %867 = vst.msk [vmem:[%s1111_s26 + $0xb0] sm:$0xf] %vm822_vm0, %v738_v57  ;;  %v614_v17 = vmax.f32 %v486_v8, 0.0  ;;  %v615_v18 = vmax.f32 %v487_v9, 0.0  ;;  %v616_v19 = vmax.f32 %v488_v10, 0.0  ;;  %v492_v20 = vadd.f32 %v1082_v1, %v360_v11  ;;  %v241_v9 = vld [vmem:[%s1077_s20 + $0x218] sm:$0xff] }
  0x44   : > { %868 = vst.msk [vmem:[%s1111_s26 + $0xb4] sm:$0xf] %vm822_vm0, %v739_v58  ;;  %v617_v22 = vmax.f32 %v489_v12, 0.0  ;;  %v618_v23 = vmax.f32 %v490_v13, 0.0  ;;  %v619_v24 = vmax.f32 %v491_v14, 0.0  ;;  %v493_v25 = vadd.f32 %v1082_v1, %v361_v15  ;;  %v242_v10 = vld [vmem:[%s1077_s20 + $0x220] sm:$0xff] }
  0x45   : > { %869 = vst.msk [vmem:[%s1111_s26 + $0xb8] sm:$0xf] %vm822_vm0, %v740_v61  ;;  %v742_v27 = vpack.c.bf16 %v614_v17, %v614_v17  ;;  %v743_v28 = vpack.c.bf16 %v615_v18, %v615_v18  ;;  %v744_v29 = vpack.c.bf16 %v616_v19, %v616_v19  ;;  %v620_v30 = vmax.f32 %v492_v20, 0.0  ;;  %v239_v61 = vld [vmem:[%s1077_s20 + $0x208] sm:$0xff] }
  0x46   : > { %870 = vst.msk [vmem:[%s1111_s26 + $0xbc] sm:$0xf] %vm822_vm0, %v741_v4  ;;  %v745_v34 = vpack.c.bf16 %v617_v22, %v617_v22  ;;  %v746_v35 = vpack.c.bf16 %v618_v23, %v618_v23  ;;  %v747_v36 = vpack.c.bf16 %v619_v24, %v619_v24  ;;  %v621_v37 = vmax.f32 %v493_v25, 0.0  ;;  %v240_v4 = vld [vmem:[%s1077_s20 + $0x210] sm:$0xff]  ;;  %v243_v11 = vld [vmem:[%s1077_s20 + $0x228] sm:$0xff] }
  0x47   : > { %871 = vst.msk [vmem:[%s1111_s26 + $0xc0] sm:$0xf] %vm822_vm0, %v742_v27  ;;  %v748_v39 = vpack.c.bf16 %v620_v30, %v620_v30  ;;  %v362_v40 = vmul.f32 %v1071_v0, %v230_v16  ;;  %v363_v41 = vmul.f32 %v1071_v0, %v231_v21  ;;  %v364_v42 = vmul.f32 %v1071_v0, %v232_v26  ;;  %v244_v16 = vld [vmem:[%s1077_s20 + $0x230] sm:$0xff]  ;;  %v245_v21 = vld [vmem:[%s1077_s20 + $0x238] sm:$0xff] }
  0x48   : > { %872 = vst.msk [vmem:[%s1111_s26 + $0xc4] sm:$0xf] %vm822_vm0, %v743_v28  ;;  %v749_v44 = vpack.c.bf16 %v621_v37, %v621_v37  ;;  %v365_v45 = vmul.f32 %v1071_v0, %v233_v31  ;;  %v366_v46 = vmul.f32 %v1071_v0, %v234_v32  ;;  %v367_v47 = vmul.f32 %v1071_v0, %v235_v33 }
  0x49   : > { %873 = vst.msk [vmem:[%s1111_s26 + $0xc8] sm:$0xf] %vm822_vm0, %v744_v29  ;;  %v494_v48 = vadd.f32 %v1082_v1, %v362_v40  ;;  %v495_v49 = vadd.f32 %v1082_v1, %v363_v41  ;;  %v496_v50 = vadd.f32 %v1082_v1, %v364_v42  ;;  %v368_v51 = vmul.f32 %v1071_v0, %v236_v38 }
  0x4a   : > { %874 = vst.msk [vmem:[%s1111_s26 + $0xcc] sm:$0xf] %vm822_vm0, %v745_v34  ;;  %v497_v52 = vadd.f32 %v1082_v1, %v365_v45  ;;  %v498_v53 = vadd.f32 %v1082_v1, %v366_v46  ;;  %v499_v54 = vadd.f32 %v1082_v1, %v367_v47  ;;  %v369_v55 = vmul.f32 %v1071_v0, %v237_v43  ;;  %v246_v34 = vld [vmem:[%s1077_s20 + $0x240] sm:$0xff] }
  0x4b   : > { %875 = vst.msk [vmem:[%s1111_s26 + $0xd0] sm:$0xf] %vm822_vm0, %v746_v35  ;;  %v622_v57 = vmax.f32 %v494_v48, 0.0  ;;  %v623_v58 = vmax.f32 %v495_v49, 0.0  ;;  %v624_v59 = vmax.f32 %v496_v50, 0.0  ;;  %v500_v60 = vadd.f32 %v1082_v1, %v368_v51  ;;  %v249_v49 = vld [vmem:[%s1077_s20 + $0x258] sm:$0xff] }
  0x4c   : > { %876 = vst.msk [vmem:[%s1111_s26 + $0xd4] sm:$0xf] %vm822_vm0, %v747_v36  ;;  %v625_v62 = vmax.f32 %v497_v52, 0.0  ;;  %v626_v63 = vmax.f32 %v498_v53, 0.0  ;;  %v627_v2 = vmax.f32 %v499_v54, 0.0  ;;  %v501_v3 = vadd.f32 %v1082_v1, %v369_v55  ;;  %v250_v50 = vld [vmem:[%s1077_s20 + $0x260] sm:$0xff] }
  0x4d   : > { %877 = vst.msk [vmem:[%s1111_s26 + $0xd8] sm:$0xf] %vm822_vm0, %v748_v39  ;;  %v750_v5 = vpack.c.bf16 %v622_v57, %v622_v57  ;;  %v751_v6 = vpack.c.bf16 %v623_v58, %v623_v58  ;;  %v752_v7 = vpack.c.bf16 %v624_v59, %v624_v59  ;;  %v628_v8 = vmax.f32 %v500_v60, 0.0  ;;  %v247_v39 = vld [vmem:[%s1077_s20 + $0x248] sm:$0xff] }
  0x4e   : > { %878 = vst.msk [vmem:[%s1111_s26 + $0xdc] sm:$0xf] %vm822_vm0, %v749_v44  ;;  %v753_v12 = vpack.c.bf16 %v625_v62, %v625_v62  ;;  %v754_v13 = vpack.c.bf16 %v626_v63, %v626_v63  ;;  %v755_v14 = vpack.c.bf16 %v627_v2, %v627_v2  ;;  %v629_v15 = vmax.f32 %v501_v3, 0.0  ;;  %v248_v44 = vld [vmem:[%s1077_s20 + $0x250] sm:$0xff]  ;;  %v251_v51 = vld [vmem:[%s1077_s20 + $0x268] sm:$0xff] }
  0x4f   : > { %879 = vst.msk [vmem:[%s1111_s26 + $0xe0] sm:$0xf] %vm822_vm0, %v750_v5  ;;  %v756_v17 = vpack.c.bf16 %v628_v8, %v628_v8  ;;  %v370_v18 = vmul.f32 %v1071_v0, %v238_v56  ;;  %v371_v19 = vmul.f32 %v1071_v0, %v239_v61  ;;  %v372_v20 = vmul.f32 %v1071_v0, %v240_v4  ;;  %v252_v56 = vld [vmem:[%s1077_s20 + $0x270] sm:$0xff]  ;;  %v253_v61 = vld [vmem:[%s1077_s20 + $0x278] sm:$0xff] }
  0x50   : > { %880 = vst.msk [vmem:[%s1111_s26 + $0xe4] sm:$0xf] %vm822_vm0, %v751_v6  ;;  %v757_v22 = vpack.c.bf16 %v629_v15, %v629_v15  ;;  %v373_v23 = vmul.f32 %v1071_v0, %v241_v9  ;;  %v374_v24 = vmul.f32 %v1071_v0, %v242_v10  ;;  %v375_v25 = vmul.f32 %v1071_v0, %v243_v11 }
  0x51   : > { %881 = vst.msk [vmem:[%s1111_s26 + $0xe8] sm:$0xf] %vm822_vm0, %v752_v7  ;;  %v502_v26 = vadd.f32 %v1082_v1, %v370_v18  ;;  %v503_v27 = vadd.f32 %v1082_v1, %v371_v19  ;;  %v504_v28 = vadd.f32 %v1082_v1, %v372_v20  ;;  %v376_v29 = vmul.f32 %v1071_v0, %v244_v16 }
  0x52   : > { %882 = vst.msk [vmem:[%s1111_s26 + $0xec] sm:$0xf] %vm822_vm0, %v753_v12  ;;  %v505_v30 = vadd.f32 %v1082_v1, %v373_v23  ;;  %v506_v31 = vadd.f32 %v1082_v1, %v374_v24  ;;  %v507_v32 = vadd.f32 %v1082_v1, %v375_v25  ;;  %v377_v33 = vmul.f32 %v1071_v0, %v245_v21  ;;  %v254_v12 = vld [vmem:[%s1077_s20 + $0x280] sm:$0xff] }
  0x53   : > { %883 = vst.msk [vmem:[%s1111_s26 + $0xf0] sm:$0xf] %vm822_vm0, %v754_v13  ;;  %v630_v35 = vmax.f32 %v502_v26, 0.0  ;;  %v631_v36 = vmax.f32 %v503_v27, 0.0  ;;  %v632_v37 = vmax.f32 %v504_v28, 0.0  ;;  %v508_v38 = vadd.f32 %v1082_v1, %v376_v29  ;;  %v257_v27 = vld [vmem:[%s1077_s20 + $0x298] sm:$0xff] }
  0x54   : > { %884 = vst.msk [vmem:[%s1111_s26 + $0xf4] sm:$0xf] %vm822_vm0, %v755_v14  ;;  %v633_v40 = vmax.f32 %v505_v30, 0.0  ;;  %v634_v41 = vmax.f32 %v506_v31, 0.0  ;;  %v635_v42 = vmax.f32 %v507_v32, 0.0  ;;  %v509_v43 = vadd.f32 %v1082_v1, %v377_v33  ;;  %v258_v28 = vld [vmem:[%s1077_s20 + $0x2a0] sm:$0xff] }
  0x55   : > { %885 = vst.msk [vmem:[%s1111_s26 + $0xf8] sm:$0xf] %vm822_vm0, %v756_v17  ;;  %v758_v45 = vpack.c.bf16 %v630_v35, %v630_v35  ;;  %v759_v46 = vpack.c.bf16 %v631_v36, %v631_v36  ;;  %v760_v47 = vpack.c.bf16 %v632_v37, %v632_v37  ;;  %v636_v48 = vmax.f32 %v508_v38, 0.0  ;;  %v255_v17 = vld [vmem:[%s1077_s20 + $0x288] sm:$0xff] }
  0x56   : > { %886 = vst.msk [vmem:[%s1111_s26 + $0xfc] sm:$0xf] %vm822_vm0, %v757_v22  ;;  %v761_v52 = vpack.c.bf16 %v633_v40, %v633_v40  ;;  %v762_v53 = vpack.c.bf16 %v634_v41, %v634_v41  ;;  %v763_v54 = vpack.c.bf16 %v635_v42, %v635_v42  ;;  %v637_v55 = vmax.f32 %v509_v43, 0.0  ;;  %v256_v22 = vld [vmem:[%s1077_s20 + $0x290] sm:$0xff]  ;;  %v259_v29 = vld [vmem:[%s1077_s20 + $0x2a8] sm:$0xff] }
  0x57   : > { %887 = vst.msk [vmem:[%s1111_s26 + $0x100] sm:$0xf] %vm822_vm0, %v758_v45  ;;  %v764_v57 = vpack.c.bf16 %v636_v48, %v636_v48  ;;  %v378_v58 = vmul.f32 %v1071_v0, %v246_v34  ;;  %v379_v59 = vmul.f32 %v1071_v0, %v247_v39  ;;  %v380_v60 = vmul.f32 %v1071_v0, %v248_v44  ;;  %v260_v34 = vld [vmem:[%s1077_s20 + $0x2b0] sm:$0xff]  ;;  %v261_v39 = vld [vmem:[%s1077_s20 + $0x2b8] sm:$0xff] }
  0x58   : > { %888 = vst.msk [vmem:[%s1111_s26 + $0x104] sm:$0xf] %vm822_vm0, %v759_v46  ;;  %v765_v62 = vpack.c.bf16 %v637_v55, %v637_v55  ;;  %v381_v63 = vmul.f32 %v1071_v0, %v249_v49  ;;  %v382_v2 = vmul.f32 %v1071_v0, %v250_v50  ;;  %v383_v3 = vmul.f32 %v1071_v0, %v251_v51 }
  0x59   : > { %889 = vst.msk [vmem:[%s1111_s26 + $0x108] sm:$0xf] %vm822_vm0, %v760_v47  ;;  %v510_v4 = vadd.f32 %v1082_v1, %v378_v58  ;;  %v511_v5 = vadd.f32 %v1082_v1, %v379_v59  ;;  %v512_v6 = vadd.f32 %v1082_v1, %v380_v60  ;;  %v384_v7 = vmul.f32 %v1071_v0, %v252_v56 }
  0x5a   : > { %890 = vst.msk [vmem:[%s1111_s26 + $0x10c] sm:$0xf] %vm822_vm0, %v761_v52  ;;  %v513_v8 = vadd.f32 %v1082_v1, %v381_v63  ;;  %v514_v9 = vadd.f32 %v1082_v1, %v382_v2  ;;  %v515_v10 = vadd.f32 %v1082_v1, %v383_v3  ;;  %v385_v11 = vmul.f32 %v1071_v0, %v253_v61  ;;  %v262_v52 = vld [vmem:[%s1077_s20 + $0x2c0] sm:$0xff] }
  0x5b   : > { %891 = vst.msk [vmem:[%s1111_s26 + $0x110] sm:$0xf] %vm822_vm0, %v762_v53  ;;  %v638_v13 = vmax.f32 %v510_v4, 0.0  ;;  %v639_v14 = vmax.f32 %v511_v5, 0.0  ;;  %v640_v15 = vmax.f32 %v512_v6, 0.0  ;;  %v516_v16 = vadd.f32 %v1082_v1, %v384_v7  ;;  %v265_v4 = vld [vmem:[%s1077_s20 + $0x2d8] sm:$0xff] }
  0x5c   : > { %892 = vst.msk [vmem:[%s1111_s26 + $0x114] sm:$0xf] %vm822_vm0, %v763_v54  ;;  %v641_v18 = vmax.f32 %v513_v8, 0.0  ;;  %v642_v19 = vmax.f32 %v514_v9, 0.0  ;;  %v643_v20 = vmax.f32 %v515_v10, 0.0  ;;  %v517_v21 = vadd.f32 %v1082_v1, %v385_v11  ;;  %v266_v5 = vld [vmem:[%s1077_s20 + $0x2e0] sm:$0xff] }
  0x5d   : > { %893 = vst.msk [vmem:[%s1111_s26 + $0x118] sm:$0xf] %vm822_vm0, %v764_v57  ;;  %v766_v23 = vpack.c.bf16 %v638_v13, %v638_v13  ;;  %v767_v24 = vpack.c.bf16 %v639_v14, %v639_v14  ;;  %v768_v25 = vpack.c.bf16 %v640_v15, %v640_v15  ;;  %v644_v26 = vmax.f32 %v516_v16, 0.0  ;;  %v263_v57 = vld [vmem:[%s1077_s20 + $0x2c8] sm:$0xff]  ;;  %v268_v11 = vld [vmem:[%s1077_s20 + $0x2f0] sm:$0xff] }
  0x5e   : > { %894 = vst.msk [vmem:[%s1111_s26 + $0x11c] sm:$0xf] %vm822_vm0, %v765_v62  ;;  %v769_v30 = vpack.c.bf16 %v641_v18, %v641_v18  ;;  %v770_v31 = vpack.c.bf16 %v642_v19, %v642_v19  ;;  %v771_v32 = vpack.c.bf16 %v643_v20, %v643_v20  ;;  %v645_v33 = vmax.f32 %v517_v21, 0.0  ;;  %v264_v62 = vld [vmem:[%s1077_s20 + $0x2d0] sm:$0xff]  ;;  %v267_v6 = vld [vmem:[%s1077_s20 + $0x2e8] sm:$0xff] }
  0x5f   : > { %895 = vst.msk [vmem:[%s1111_s26 + $0x120] sm:$0xf] %vm822_vm0, %v766_v23  ;;  %v772_v35 = vpack.c.bf16 %v644_v26, %v644_v26  ;;  %v386_v36 = vmul.f32 %v1071_v0, %v254_v12  ;;  %v387_v37 = vmul.f32 %v1071_v0, %v255_v17  ;;  %v388_v38 = vmul.f32 %v1071_v0, %v256_v22  ;;  %v1531_v13 = vld [vmem:[%s1744_s1] ss:$0 sm:$0xff]  ;;  %v269_v17 = vld [vmem:[%s1077_s20 + $0x2f8] sm:$0xff] }
  0x60   : > { %896 = vst.msk [vmem:[%s1111_s26 + $0x124] sm:$0xf] %vm822_vm0, %v767_v24  ;;  %v773_v40 = vpack.c.bf16 %v645_v33, %v645_v33  ;;  %v389_v41 = vmul.f32 %v1071_v0, %v257_v27  ;;  %v390_v42 = vmul.f32 %v1071_v0, %v258_v28  ;;  %v391_v43 = vmul.f32 %v1071_v0, %v259_v29 }
  0x61   : > { %897 = vst.msk [vmem:[%s1111_s26 + $0x128] sm:$0xf] %vm822_vm0, %v768_v25  ;;  %v518_v44 = vadd.f32 %v1082_v1, %v386_v36  ;;  %v519_v45 = vadd.f32 %v1082_v1, %v387_v37  ;;  %v520_v46 = vadd.f32 %v1082_v1, %v388_v38  ;;  %v392_v47 = vmul.f32 %v1071_v0, %v260_v34 }
  0x62   : > { %898 = vst.msk [vmem:[%s1111_s26 + $0x12c] sm:$0xf] %vm822_vm0, %v769_v30  ;;  %v521_v48 = vadd.f32 %v1082_v1, %v389_v41  ;;  %v522_v49 = vadd.f32 %v1082_v1, %v390_v42  ;;  %v523_v50 = vadd.f32 %v1082_v1, %v391_v43  ;;  %v393_v51 = vmul.f32 %v1071_v0, %v261_v39  ;;  %v1514_v0 = vld [vmem:[%s1745_s2] ss:$0 sm:$0xff] }
  0x63   : > { %899 = vst.msk [vmem:[%s1111_s26 + $0x130] sm:$0xf] %vm822_vm0, %v770_v31  ;;  %v646_v53 = vmax.f32 %v518_v44, 0.0  ;;  %v647_v54 = vmax.f32 %v519_v45, 0.0  ;;  %v648_v55 = vmax.f32 %v520_v46, 0.0  ;;  %v524_v56 = vadd.f32 %v1082_v1, %v392_v47  ;;  %v270_v30 = vld [vmem:[%s1077_s20 + $0x300] sm:$0xff] }
  0x64   : > { %900 = vst.msk [vmem:[%s1111_s26 + $0x134] sm:$0xf] %vm822_vm0, %v771_v32  ;;  %v649_v58 = vmax.f32 %v521_v48, 0.0  ;;  %v650_v59 = vmax.f32 %v522_v49, 0.0  ;;  %v651_v60 = vmax.f32 %v523_v50, 0.0  ;;  %v525_v61 = vadd.f32 %v1514_v0, %v393_v51  ;;  %v273_v45 = vld [vmem:[%s1077_s20 + $0x318] sm:$0xff] }
  0x65   : > { %901 = vst.msk [vmem:[%s1111_s26 + $0x138] sm:$0xf] %vm822_vm0, %v772_v35  ;;  %v774_v1 = vpack.c.bf16 %v646_v53, %v646_v53  ;;  %v775_v63 = vpack.c.bf16 %v647_v54, %v647_v54  ;;  %v776_v2 = vpack.c.bf16 %v648_v55, %v648_v55  ;;  %v652_v3 = vmax.f32 %v524_v56, 0.0  ;;  %v271_v35 = vld [vmem:[%s1077_s20 + $0x308] sm:$0xff]  ;;  %v274_v46 = vld [vmem:[%s1077_s20 + $0x320] sm:$0xff] }
  0x66   : > { %902 = vst.msk [vmem:[%s1111_s26 + $0x13c] sm:$0xf] %vm822_vm0, %v773_v40  ;;  %v777_v7 = vpack.c.bf16 %v649_v58, %v649_v58  ;;  %v778_v8 = vpack.c.bf16 %v650_v59, %v650_v59  ;;  %v779_v9 = vpack.c.bf16 %v651_v60, %v651_v60  ;;  %v653_v10 = vmax.f32 %v525_v61, 0.0  ;;  %v272_v40 = vld [vmem:[%s1077_s20 + $0x310] sm:$0xff]  ;;  %v275_v47 = vld [vmem:[%s1077_s20 + $0x328] sm:$0xff] }
  0x67   : > { %903 = vst.msk [vmem:[%s1111_s26 + $0x140] sm:$0xf] %vm822_vm0, %v774_v1  ;;  %v780_v12 = vpack.c.bf16 %v652_v3, %v652_v3  ;;  %v394_v14 = vmul.f32 %v1531_v13, %v262_v52  ;;  %v395_v15 = vmul.f32 %v1531_v13, %v263_v57  ;;  %v396_v16 = vmul.f32 %v1531_v13, %v264_v62  ;;  %v276_v52 = vld [vmem:[%s1077_s20 + $0x330] sm:$0xff]  ;;  %v277_v57 = vld [vmem:[%s1077_s20 + $0x338] sm:$0xff] }
  0x68   : > { %904 = vst.msk [vmem:[%s1111_s26 + $0x144] sm:$0xf] %vm822_vm0, %v775_v63  ;;  %v781_v18 = vpack.c.bf16 %v653_v10, %v653_v10  ;;  %v397_v19 = vmul.f32 %v1531_v13, %v265_v4  ;;  %v398_v20 = vmul.f32 %v1531_v13, %v266_v5  ;;  %v399_v21 = vmul.f32 %v1531_v13, %v267_v6 }
  0x69   : > { %905 = vst.msk [vmem:[%s1111_s26 + $0x148] sm:$0xf] %vm822_vm0, %v776_v2  ;;  %v526_v22 = vadd.f32 %v1514_v0, %v394_v14  ;;  %v527_v23 = vadd.f32 %v1514_v0, %v395_v15  ;;  %v528_v24 = vadd.f32 %v1514_v0, %v396_v16  ;;  %v400_v25 = vmul.f32 %v1531_v13, %v268_v11 }
  0x6a   : > { %906 = vst.msk [vmem:[%s1111_s26 + $0x14c] sm:$0xf] %vm822_vm0, %v777_v7  ;;  %v529_v26 = vadd.f32 %v1514_v0, %v397_v19  ;;  %v530_v27 = vadd.f32 %v1514_v0, %v398_v20  ;;  %v531_v28 = vadd.f32 %v1514_v0, %v399_v21  ;;  %v401_v29 = vmul.f32 %v1531_v13, %v269_v17  ;;  %v278_v7 = vld [vmem:[%s1077_s20 + $0x340] sm:$0xff] }
  0x6b   : > { %907 = vst.msk [vmem:[%s1111_s26 + $0x150] sm:$0xf] %vm822_vm0, %v778_v8  ;;  %v654_v31 = vmax.f32 %v526_v22, 0.0  ;;  %v655_v32 = vmax.f32 %v527_v23, 0.0  ;;  %v656_v33 = vmax.f32 %v528_v24, 0.0  ;;  %v532_v34 = vadd.f32 %v1514_v0, %v400_v25  ;;  %v281_v23 = vld [vmem:[%s1077_s20 + $0x358] sm:$0xff] }
  0x6c   : > { %908 = vst.msk [vmem:[%s1111_s26 + $0x154] sm:$0xf] %vm822_vm0, %v779_v9  ;;  %v657_v36 = vmax.f32 %v529_v26, 0.0  ;;  %v658_v37 = vmax.f32 %v530_v27, 0.0  ;;  %v659_v38 = vmax.f32 %v531_v28, 0.0  ;;  %v533_v39 = vadd.f32 %v1514_v0, %v401_v29  ;;  %v282_v24 = vld [vmem:[%s1077_s20 + $0x360] sm:$0xff] }
  0x6d   : > { %909 = vst.msk [vmem:[%s1111_s26 + $0x158] sm:$0xf] %vm822_vm0, %v780_v12  ;;  %v782_v41 = vpack.c.bf16 %v654_v31, %v654_v31  ;;  %v783_v42 = vpack.c.bf16 %v655_v32, %v655_v32  ;;  %v784_v43 = vpack.c.bf16 %v656_v33, %v656_v33  ;;  %v660_v44 = vmax.f32 %v532_v34, 0.0  ;;  %v279_v12 = vld [vmem:[%s1077_s20 + $0x348] sm:$0xff] }
  0x6e   : > { %910 = vst.msk [vmem:[%s1111_s26 + $0x15c] sm:$0xf] %vm822_vm0, %v781_v18  ;;  %v785_v48 = vpack.c.bf16 %v657_v36, %v657_v36  ;;  %v786_v49 = vpack.c.bf16 %v658_v37, %v658_v37  ;;  %v787_v50 = vpack.c.bf16 %v659_v38, %v659_v38  ;;  %v661_v51 = vmax.f32 %v533_v39, 0.0  ;;  %v280_v18 = vld [vmem:[%s1077_s20 + $0x350] sm:$0xff]  ;;  %v283_v25 = vld [vmem:[%s1077_s20 + $0x368] sm:$0xff] }
  0x6f   : > { %911 = vst.msk [vmem:[%s1111_s26 + $0x160] sm:$0xf] %vm822_vm0, %v782_v41  ;;  %v788_v53 = vpack.c.bf16 %v660_v44, %v660_v44  ;;  %v402_v54 = vmul.f32 %v1531_v13, %v270_v30  ;;  %v403_v55 = vmul.f32 %v1531_v13, %v271_v35  ;;  %v404_v56 = vmul.f32 %v1531_v13, %v272_v40  ;;  %v284_v30 = vld [vmem:[%s1077_s20 + $0x370] sm:$0xff]  ;;  %v285_v35 = vld [vmem:[%s1077_s20 + $0x378] sm:$0xff] }
  0x70   : > { %912 = vst.msk [vmem:[%s1111_s26 + $0x164] sm:$0xf] %vm822_vm0, %v783_v42  ;;  %v789_v58 = vpack.c.bf16 %v661_v51, %v661_v51  ;;  %v405_v59 = vmul.f32 %v1531_v13, %v273_v45  ;;  %v406_v60 = vmul.f32 %v1531_v13, %v274_v46  ;;  %v407_v61 = vmul.f32 %v1531_v13, %v275_v47 }
  0x71   : > { %913 = vst.msk [vmem:[%s1111_s26 + $0x168] sm:$0xf] %vm822_vm0, %v784_v43  ;;  %v534_v62 = vadd.f32 %v1514_v0, %v402_v54  ;;  %v535_v1 = vadd.f32 %v1514_v0, %v403_v55  ;;  %v536_v63 = vadd.f32 %v1514_v0, %v404_v56  ;;  %v408_v2 = vmul.f32 %v1531_v13, %v276_v52 }
  0x72   : > { %914 = vst.msk [vmem:[%s1111_s26 + $0x16c] sm:$0xf] %vm822_vm0, %v785_v48  ;;  %v537_v3 = vadd.f32 %v1514_v0, %v405_v59  ;;  %v538_v4 = vadd.f32 %v1514_v0, %v406_v60  ;;  %v539_v5 = vadd.f32 %v1514_v0, %v407_v61  ;;  %v409_v6 = vmul.f32 %v1531_v13, %v277_v57  ;;  %v286_v48 = vld [vmem:[%s1077_s20 + $0x380] sm:$0xff] }
  0x73   : > { %915 = vst.msk [vmem:[%s1111_s26 + $0x170] sm:$0xf] %vm822_vm0, %v786_v49  ;;  %v662_v8 = vmax.f32 %v534_v62, 0.0  ;;  %v663_v9 = vmax.f32 %v535_v1, 0.0  ;;  %v664_v10 = vmax.f32 %v536_v63, 0.0  ;;  %v540_v11 = vadd.f32 %v1514_v0, %v408_v2  ;;  %v289_v1 = vld [vmem:[%s1077_s20 + $0x398] sm:$0xff] }
  0x74   : > { %916 = vst.msk [vmem:[%s1111_s26 + $0x174] sm:$0xf] %vm822_vm0, %v787_v50  ;;  %v665_v14 = vmax.f32 %v537_v3, 0.0  ;;  %v666_v15 = vmax.f32 %v538_v4, 0.0  ;;  %v667_v16 = vmax.f32 %v539_v5, 0.0  ;;  %v541_v17 = vadd.f32 %v1514_v0, %v409_v6  ;;  %v290_v63 = vld [vmem:[%s1077_s20 + $0x3a0] sm:$0xff] }
  0x75   : > { %917 = vst.msk [vmem:[%s1111_s26 + $0x178] sm:$0xf] %vm822_vm0, %v788_v53  ;;  %v790_v19 = vpack.c.bf16 %v662_v8, %v662_v8  ;;  %v791_v20 = vpack.c.bf16 %v663_v9, %v663_v9  ;;  %v792_v21 = vpack.c.bf16 %v664_v10, %v664_v10  ;;  %v668_v22 = vmax.f32 %v540_v11, 0.0  ;;  %v287_v53 = vld [vmem:[%s1077_s20 + $0x388] sm:$0xff] }
  0x76   : > { %918 = vst.msk [vmem:[%s1111_s26 + $0x17c] sm:$0xf] %vm822_vm0, %v789_v58  ;;  %v793_v26 = vpack.c.bf16 %v665_v14, %v665_v14  ;;  %v794_v27 = vpack.c.bf16 %v666_v15, %v666_v15  ;;  %v795_v28 = vpack.c.bf16 %v667_v16, %v667_v16  ;;  %v669_v29 = vmax.f32 %v541_v17, 0.0  ;;  %v288_v58 = vld [vmem:[%s1077_s20 + $0x390] sm:$0xff]  ;;  %v291_v2 = vld [vmem:[%s1077_s20 + $0x3a8] sm:$0xff] }
  0x77   : > { %919 = vst.msk [vmem:[%s1111_s26 + $0x180] sm:$0xf] %vm822_vm0, %v790_v19  ;;  %v796_v31 = vpack.c.bf16 %v668_v22, %v668_v22  ;;  %v410_v32 = vmul.f32 %v1531_v13, %v278_v7  ;;  %v411_v33 = vmul.f32 %v1531_v13, %v279_v12  ;;  %v412_v34 = vmul.f32 %v1531_v13, %v280_v18  ;;  %v292_v7 = vld [vmem:[%s1077_s20 + $0x3b0] sm:$0xff]  ;;  %v293_v12 = vld [vmem:[%s1077_s20 + $0x3b8] sm:$0xff] }
  0x78   : > { %920 = vst.msk [vmem:[%s1111_s26 + $0x184] sm:$0xf] %vm822_vm0, %v791_v20  ;;  %v797_v36 = vpack.c.bf16 %v669_v29, %v669_v29  ;;  %v413_v37 = vmul.f32 %v1531_v13, %v281_v23  ;;  %v414_v38 = vmul.f32 %v1531_v13, %v282_v24  ;;  %v415_v39 = vmul.f32 %v1531_v13, %v283_v25 }
  0x79   : > { %921 = vst.msk [vmem:[%s1111_s26 + $0x188] sm:$0xf] %vm822_vm0, %v792_v21  ;;  %v542_v40 = vadd.f32 %v1514_v0, %v410_v32  ;;  %v543_v41 = vadd.f32 %v1514_v0, %v411_v33  ;;  %v544_v42 = vadd.f32 %v1514_v0, %v412_v34  ;;  %v416_v43 = vmul.f32 %v1531_v13, %v284_v30 }
  0x7a   : > { %922 = vst.msk [vmem:[%s1111_s26 + $0x18c] sm:$0xf] %vm822_vm0, %v793_v26  ;;  %v545_v44 = vadd.f32 %v1514_v0, %v413_v37  ;;  %v546_v45 = vadd.f32 %v1514_v0, %v414_v38  ;;  %v547_v46 = vadd.f32 %v1514_v0, %v415_v39  ;;  %v417_v47 = vmul.f32 %v1531_v13, %v285_v35  ;;  %v294_v26 = vld [vmem:[%s1077_s20 + $0x3c0] sm:$0xff] }
  0x7b   : > { %923 = vst.msk [vmem:[%s1111_s26 + $0x190] sm:$0xf] %vm822_vm0, %v794_v27  ;;  %v670_v49 = vmax.f32 %v542_v40, 0.0  ;;  %v671_v50 = vmax.f32 %v543_v41, 0.0  ;;  %v672_v51 = vmax.f32 %v544_v42, 0.0  ;;  %v548_v52 = vadd.f32 %v1514_v0, %v416_v43  ;;  %v297_v41 = vld [vmem:[%s1077_s20 + $0x3d8] sm:$0xff] }
  0x7c   : > { %924 = vst.msk [vmem:[%s1111_s26 + $0x194] sm:$0xf] %vm822_vm0, %v795_v28  ;;  %v673_v54 = vmax.f32 %v545_v44, 0.0  ;;  %v674_v55 = vmax.f32 %v546_v45, 0.0  ;;  %v675_v56 = vmax.f32 %v547_v46, 0.0  ;;  %v549_v57 = vadd.f32 %v1514_v0, %v417_v47  ;;  %v298_v42 = vld [vmem:[%s1077_s20 + $0x3e0] sm:$0xff] }
  0x7d   : > { %925 = vst.msk [vmem:[%s1111_s26 + $0x198] sm:$0xf] %vm822_vm0, %v796_v31  ;;  %v798_v59 = vpack.c.bf16 %v670_v49, %v670_v49  ;;  %v799_v60 = vpack.c.bf16 %v671_v50, %v671_v50  ;;  %v800_v61 = vpack.c.bf16 %v672_v51, %v672_v51  ;;  %v676_v62 = vmax.f32 %v548_v52, 0.0  ;;  %v295_v31 = vld [vmem:[%s1077_s20 + $0x3c8] sm:$0xff] }
  0x7e   : > { %926 = vst.msk [vmem:[%s1111_s26 + $0x19c] sm:$0xf] %vm822_vm0, %v797_v36  ;;  %v801_v3 = vpack.c.bf16 %v673_v54, %v673_v54  ;;  %v802_v4 = vpack.c.bf16 %v674_v55, %v674_v55  ;;  %v803_v5 = vpack.c.bf16 %v675_v56, %v675_v56  ;;  %v677_v6 = vmax.f32 %v549_v57, 0.0  ;;  %v296_v36 = vld [vmem:[%s1077_s20 + $0x3d0] sm:$0xff]  ;;  %v299_v43 = vld [vmem:[%s1077_s20 + $0x3e8] sm:$0xff] }
  0x7f   : > { %927 = vst.msk [vmem:[%s1111_s26 + $0x1a0] sm:$0xf] %vm822_vm0, %v798_v59  ;;  %v804_v8 = vpack.c.bf16 %v676_v62, %v676_v62  ;;  %v418_v9 = vmul.f32 %v1531_v13, %v286_v48  ;;  %v419_v10 = vmul.f32 %v1531_v13, %v287_v53  ;;  %v420_v11 = vmul.f32 %v1531_v13, %v288_v58  ;;  %v300_v48 = vld [vmem:[%s1077_s20 + $0x3f0] sm:$0xff]  ;;  %v301_v53 = vld [vmem:[%s1077_s20 + $0x3f8] sm:$0xff] }
  0x80   : > { %928 = vst.msk [vmem:[%s1111_s26 + $0x1a4] sm:$0xf] %vm822_vm0, %v799_v60  ;;  %v805_v14 = vpack.c.bf16 %v677_v6, %v677_v6  ;;  %v421_v15 = vmul.f32 %v1531_v13, %v289_v1  ;;  %v422_v16 = vmul.f32 %v1531_v13, %v290_v63  ;;  %v423_v17 = vmul.f32 %v1531_v13, %v291_v2 }
  0x81   : > { %929 = vst.msk [vmem:[%s1111_s26 + $0x1a8] sm:$0xf] %vm822_vm0, %v800_v61  ;;  %v550_v18 = vadd.f32 %v1514_v0, %v418_v9  ;;  %v551_v19 = vadd.f32 %v1514_v0, %v419_v10  ;;  %v552_v20 = vadd.f32 %v1514_v0, %v420_v11  ;;  %v424_v21 = vmul.f32 %v1531_v13, %v292_v7 }
  0x82   : > { %930 = vst.msk [vmem:[%s1111_s26 + $0x1ac] sm:$0xf] %vm822_vm0, %v801_v3  ;;  %v553_v22 = vadd.f32 %v1514_v0, %v421_v15  ;;  %v554_v23 = vadd.f32 %v1514_v0, %v422_v16  ;;  %v555_v24 = vadd.f32 %v1514_v0, %v423_v17  ;;  %v425_v25 = vmul.f32 %v1531_v13, %v293_v12 }
  0x83   : > { %931 = vst.msk [vmem:[%s1111_s26 + $0x1b0] sm:$0xf] %vm822_vm0, %v802_v4  ;;  %v678_v27 = vmax.f32 %v550_v18, 0.0  ;;  %v679_v28 = vmax.f32 %v551_v19, 0.0  ;;  %v680_v29 = vmax.f32 %v552_v20, 0.0  ;;  %v556_v30 = vadd.f32 %v1514_v0, %v424_v21 }
  0x84   : > { %932 = vst.msk [vmem:[%s1111_s26 + $0x1b4] sm:$0xf] %vm822_vm0, %v803_v5  ;;  %v681_v32 = vmax.f32 %v553_v22, 0.0  ;;  %v682_v33 = vmax.f32 %v554_v23, 0.0  ;;  %v683_v34 = vmax.f32 %v555_v24, 0.0  ;;  %v557_v35 = vadd.f32 %v1514_v0, %v425_v25 }
  0x85   : > { %933 = vst.msk [vmem:[%s1111_s26 + $0x1b8] sm:$0xf] %vm822_vm0, %v804_v8  ;;  %v806_v37 = vpack.c.bf16 %v678_v27, %v678_v27  ;;  %v807_v38 = vpack.c.bf16 %v679_v28, %v679_v28  ;;  %v808_v39 = vpack.c.bf16 %v680_v29, %v680_v29  ;;  %v684_v40 = vmax.f32 %v556_v30, 0.0 }
  0x86   : > { %934 = vst.msk [vmem:[%s1111_s26 + $0x1bc] sm:$0xf] %vm822_vm0, %v805_v14  ;;  %v809_v44 = vpack.c.bf16 %v681_v32, %v681_v32  ;;  %v810_v45 = vpack.c.bf16 %v682_v33, %v682_v33  ;;  %v811_v46 = vpack.c.bf16 %v683_v34, %v683_v34  ;;  %v685_v47 = vmax.f32 %v557_v35, 0.0 }
  0x87   : > { %935 = vst.msk [vmem:[%s1111_s26 + $0x1c0] sm:$0xf] %vm822_vm0, %v806_v37  ;;  %v812_v49 = vpack.c.bf16 %v684_v40, %v684_v40  ;;  %v426_v50 = vmul.f32 %v1531_v13, %v294_v26  ;;  %v427_v51 = vmul.f32 %v1531_v13, %v295_v31  ;;  %v428_v52 = vmul.f32 %v1531_v13, %v296_v36 }
  0x88   : > { %936 = vst.msk [vmem:[%s1111_s26 + $0x1c4] sm:$0xf] %vm822_vm0, %v807_v38  ;;  %v813_v54 = vpack.c.bf16 %v685_v47, %v685_v47  ;;  %v429_v55 = vmul.f32 %v1531_v13, %v297_v41  ;;  %v430_v56 = vmul.f32 %v1531_v13, %v298_v42  ;;  %v431_v57 = vmul.f32 %v1531_v13, %v299_v43 }
  0x89   : > { %937 = vst.msk [vmem:[%s1111_s26 + $0x1c8] sm:$0xf] %vm822_vm0, %v808_v39  ;;  %v558_v58 = vadd.f32 %v1514_v0, %v426_v50  ;;  %v559_v59 = vadd.f32 %v1514_v0, %v427_v51  ;;  %v560_v60 = vadd.f32 %v1514_v0, %v428_v52  ;;  %v432_v61 = vmul.f32 %v1531_v13, %v300_v48 }
  0x8a   : > { %938 = vst.msk [vmem:[%s1111_s26 + $0x1cc] sm:$0xf] %vm822_vm0, %v809_v44  ;;  %v561_v62 = vadd.f32 %v1514_v0, %v429_v55  ;;  %v562_v1 = vadd.f32 %v1514_v0, %v430_v56  ;;  %v563_v63 = vadd.f32 %v1514_v0, %v431_v57  ;;  %v433_v2 = vmul.f32 %v1531_v13, %v301_v53 }
  0x8b   : > { %939 = vst.msk [vmem:[%s1111_s26 + $0x1d0] sm:$0xf] %vm822_vm0, %v810_v45  ;;  %v686_v3 = vmax.f32 %v558_v58, 0.0  ;;  %v687_v4 = vmax.f32 %v559_v59, 0.0  ;;  %v688_v5 = vmax.f32 %v560_v60, 0.0  ;;  %v564_v6 = vadd.f32 %v1514_v0, %v432_v61 }
  0x8c   : > { %940 = vst.msk [vmem:[%s1111_s26 + $0x1d4] sm:$0xf] %vm822_vm0, %v811_v46  ;;  %v689_v7 = vmax.f32 %v561_v62, 0.0  ;;  %v690_v8 = vmax.f32 %v562_v1, 0.0  ;;  %v691_v9 = vmax.f32 %v563_v63, 0.0  ;;  %v565_v10 = vadd.f32 %v1514_v0, %v433_v2 }
  0x8d   : > { %941 = vst.msk [vmem:[%s1111_s26 + $0x1d8] sm:$0xf] %vm822_vm0, %v812_v49  ;;  %v814_v13 = vpack.c.bf16 %v686_v3, %v686_v3  ;;  %v815_v11 = vpack.c.bf16 %v687_v4, %v687_v4  ;;  %v816_v12 = vpack.c.bf16 %v688_v5, %v688_v5  ;;  %v692_v14 = vmax.f32 %v564_v6, 0.0 }
  0x8e   : > { %942 = vst.msk [vmem:[%s1111_s26 + $0x1dc] sm:$0xf] %vm822_vm0, %v813_v54  ;;  %v817_v15 = vpack.c.bf16 %v689_v7, %v689_v7  ;;  %v693_v16 = vmax.f32 %v565_v10, 0.0  ;;  %v818_v17 = vpack.c.bf16 %v690_v8, %v690_v8  ;;  %v819_v0 = vpack.c.bf16 %v691_v9, %v691_v9 }
  0x8f   : > { %943 = vst.msk [vmem:[%s1111_s26 + $0x1e0] sm:$0xf] %vm822_vm0, %v814_v13  ;;  %v820_v18 = vpack.c.bf16 %v692_v14, %v692_v14 }
  0x90   : > { %944 = vst.msk [vmem:[%s1111_s26 + $0x1e4] sm:$0xf] %vm822_vm0, %v815_v11  ;;  %v821_v19 = vpack.c.bf16 %v693_v16, %v693_v16 }
  0x91   : > { %945 = vst.msk [vmem:[%s1111_s26 + $0x1e8] sm:$0xf] %vm822_vm0, %v816_v12 }
  0x92   : > { %946 = vst.msk [vmem:[%s1111_s26 + $0x1ec] sm:$0xf] %vm822_vm0, %v817_v15 }
  0x93   : > { %947 = vst.msk [vmem:[%s1111_s26 + $0x1f0] sm:$0xf] %vm822_vm0, %v818_v17 }
  0x94   : > { %948 = vst.msk [vmem:[%s1111_s26 + $0x1f4] sm:$0xf] %vm822_vm0, %v819_v0 }
  0x95   : > { %949 = vst.msk [vmem:[%s1111_s26 + $0x1f8] sm:$0xf] %vm822_vm0, %v820_v18 }
  0x96   : > { %950 = vst.msk [vmem:[%s1111_s26 + $0x1fc] sm:$0xf] %vm822_vm0, %v821_v19 }
  0x97 PF: > { %s13_s12 = sadd.s32 1, %s1036_s12  }
  0x98   : > { %p10_p4 = scmp.ge.s32.totalorder %s13_s12, 4  }
  0x9a   :  { %12 = sbr.rel (!%p10_p4) target bundleno = 1 (0x1), region = 62 }

// kernel: generator_forward.17
= control target key start
LH: loop header
LB: loop body
LE: loop exit
PB: predicated region body
PF: predicated region fallthrough
CT: control target
= control target key end

     0   :  { %s990_s12 = smov 0   ;;  %s992_s13 = smov 0   ;;  %s1226_s0 = inlined_call_operand.vmem [shape: bf16[4,128,2048], index: 0, kind: input, shape index: {}]   ;;  %s1227_s1 = inlined_call_operand.vmem [shape: bf16[4,3,128], index: 1, kind: input, shape index: {}]   ;;  %s1228_s2 = inlined_call_operand.vmem [shape: f32[1,3,1], index: 2, kind: input, shape index: {}]   ;;  %s1229_s3 = inlined_call_operand.vmem [shape: f32[4,3,2048], index: 3, kind: output, shape index: {}]  }
   0x1   :  { %s994_s14 = smov 0   ;;  %s996_s15 = smov 0  }
   0x2   :  { %s998_s16 = smov 0   ;;  %s1000_s17 = smov 0  }
   0x3   :  { %s1002_s18 = smov 0  }
   0x4 LB: > { %s22_s19 = sadd.s32 1, %s959_s16  ;;  %s25_s20 = sadd.s32 1, %s963_s17  ;;  %s967_s18 = sphi %s1002_s18, %s13_s18   ;;  %s963_s17 = sphi %s1000_s17, %s1235_s17   ;;  %s959_s16 = sphi %s998_s16, %s1234_s16   ;;  %s955_s15 = sphi %s996_s15, %s1233_s15   ;;  %s951_s14 = sphi %s994_s14, %s1232_s14   ;;  %s947_s13 = sphi %s992_s13, %s1231_s13   ;;  %s943_s12 = sphi %s990_s12, %s1230_s12  }
   0x5   : > { %p23_p0 = scmp.ge.s32.totalorder %s22_s19, 4  ;;  %p41_p1 = scmp.ne.s32.totalorder %s947_s13, %s943_s12 }
   0x6   : > { %p42_p2 = scmp.eq.s32.totalorder %s967_s18, 0  ;;  %s34_s24 = sadd.s32 1, %s947_s13 }
   0x7   : > { %s1237_s19 = smov (%p23_p0, %s22_s19), 0  ;;  %s1239_s20 = smov (!%p23_p0, %s25_s20), %s963_s17 }
   0x8   : > { %p43_p3 = por %p42_p2, %p41_p1  ;;  %p27_p4 = scmp.ge.s32.totalorder %s1239_s20, 4 }
   0x9   : > { %s30_s21 = ssub.s32 %s959_s16, %s1237_s19  ;;  %p674_p6 = scmp.ge.s32.totalorder %s967_s18, 16 }
   0xa   : > { %s1241_s20 = smov (%p27_p4, %s1239_s20), 0 }
   0xb   : > { %s29_s22 = ssub.s32 %s963_s17, %s1241_s20  ;;  %145 = sbr.rel (%p674_p6) target bundleno = 55 (0x37), region = 20 }
   0xc   : > { %s31_s23 = sor.u32 %s30_s21, %s29_s22 }
   0xd   : > { %p32_p5 = scmp.eq.s32.totalorder %s31_s23, 0 }
   0xf   : > { %s1041_s25 = scalar_select %p32_p5, %s947_s13, %s34_s24  }
  0x10   : > { %148 = sbr.rel (!%p43_p3) target bundleno = 55 (0x37), region = 24  ;;  %s150_s26 = sand.u32 (%p43_p3), 1, %s947_s13  }
  0x11   : > { %s676_s27 = sshll.u32 (%p43_p3), %s959_s16, 2  ;;  %s675_s28 = sshll.u32 (%p43_p3), %s150_s26, 8 }
  0x12   : > { %s677_s29 = sshll.u32 (%p43_p3), %s963_s17, 8  ;;  %s1055_s8 = scalar_lea.vmem (%p43_p3), [#allocation2], %s675_s28 }
  0x13   : > { %s155_s30 = sadd.s32 (%p43_p3), %s677_s29, %s676_s27 }
  0x14   : > { %s678_s4 = sshll.u32 (%p43_p3), %s155_s30, 2 }
  0x15   : > { %s1050_s7 = scalar_lea.vmem %s1226_s0, %s678_s4 }
  0x16   : > { %v170_v0 = vld [vmem:[%s1050_s7] sm:$0xff]  ;;  %v172_v1 = vld [vmem:[%s1050_s7 + $0x8] sm:$0xff] }
  0x17   : > { %v174_v2 = vld [vmem:[%s1050_s7 + $0x40] sm:$0xff]  ;;  %171 = vst [vmem:[%s1055_s8] sm:$0xff] %v170_v0  ;;  %v176_v3 = vld [vmem:[%s1050_s7 + $0x48] sm:$0xff] }
  0x18   : > { %173 = vst [vmem:[%s1055_s8 + $0x8] sm:$0xff] %v172_v1  ;;  %v178_v4 = vld [vmem:[%s1050_s7 + $0x80] sm:$0xff]  ;;  %v180_v5 = vld [vmem:[%s1050_s7 + $0x88] sm:$0xff] }
  0x19   : > { %175 = vst [vmem:[%s1055_s8 + $0x10] sm:$0xff] %v174_v2  ;;  %v182_v6 = vld [vmem:[%s1050_s7 + $0xc0] sm:$0xff]  ;;  %v184_v7 = vld [vmem:[%s1050_s7 + $0xc8] sm:$0xff] }
  0x1a   : > { %177 = vst [vmem:[%s1055_s8 + $0x18] sm:$0xff] %v176_v3  ;;  %v186_v8 = vld [vmem:[%s1050_s7 + $0x100] sm:$0xff]  ;;  %v188_v9 = vld [vmem:[%s1050_s7 + $0x108] sm:$0xff] }
  0x1b   : > { %179 = vst [vmem:[%s1055_s8 + $0x20] sm:$0xff] %v178_v4  ;;  %v190_v10 = vld [vmem:[%s1050_s7 + $0x140] sm:$0xff]  ;;  %v192_v11 = vld [vmem:[%s1050_s7 + $0x148] sm:$0xff] }
  0x1c   : > { %181 = vst [vmem:[%s1055_s8 + $0x28] sm:$0xff] %v180_v5  ;;  %v194_v12 = vld [vmem:[%s1050_s7 + $0x180] sm:$0xff]  ;;  %v196_v13 = vld [vmem:[%s1050_s7 + $0x188] sm:$0xff] }
  0x1d   : > { %183 = vst [vmem:[%s1055_s8 + $0x30] sm:$0xff] %v182_v6  ;;  %v198_v14 = vld [vmem:[%s1050_s7 + $0x1c0] sm:$0xff]  ;;  %v200_v15 = vld [vmem:[%s1050_s7 + $0x1c8] sm:$0xff] }
  0x1e   : > { %185 = vst [vmem:[%s1055_s8 + $0x38] sm:$0xff] %v184_v7  ;;  %v202_v16 = vld [vmem:[%s1050_s7 + $0x200] sm:$0xff]  ;;  %v204_v17 = vld [vmem:[%s1050_s7 + $0x208] sm:$0xff] }
  0x1f   : > { %187 = vst [vmem:[%s1055_s8 + $0x40] sm:$0xff] %v186_v8  ;;  %v206_v18 = vld [vmem:[%s1050_s7 + $0x240] sm:$0xff]  ;;  %v208_v19 = vld [vmem:[%s1050_s7 + $0x248] sm:$0xff] }
  0x20   : > { %189 = vst [vmem:[%s1055_s8 + $0x48] sm:$0xff] %v188_v9  ;;  %v210_v20 = vld [vmem:[%s1050_s7 + $0x280] sm:$0xff]  ;;  %v212_v21 = vld [vmem:[%s1050_s7 + $0x288] sm:$0xff] }
  0x21   : > { %191 = vst [vmem:[%s1055_s8 + $0x50] sm:$0xff] %v190_v10  ;;  %v214_v22 = vld [vmem:[%s1050_s7 + $0x2c0] sm:$0xff]  ;;  %v216_v23 = vld [vmem:[%s1050_s7 + $0x2c8] sm:$0xff] }
  0x22   : > { %193 = vst [vmem:[%s1055_s8 + $0x58] sm:$0xff] %v192_v11  ;;  %v218_v24 = vld [vmem:[%s1050_s7 + $0x300] sm:$0xff]  ;;  %v220_v25 = vld [vmem:[%s1050_s7 + $0x308] sm:$0xff] }
  0x23   : > { %195 = vst [vmem:[%s1055_s8 + $0x60] sm:$0xff] %v194_v12  ;;  %v222_v26 = vld [vmem:[%s1050_s7 + $0x340] sm:$0xff]  ;;  %v224_v27 = vld [vmem:[%s1050_s7 + $0x348] sm:$0xff] }
  0x24   : > { %197 = vst [vmem:[%s1055_s8 + $0x68] sm:$0xff] %v196_v13  ;;  %v226_v28 = vld [vmem:[%s1050_s7 + $0x380] sm:$0xff]  ;;  %v228_v29 = vld [vmem:[%s1050_s7 + $0x388] sm:$0xff] }
  0x25   : > { %199 = vst [vmem:[%s1055_s8 + $0x70] sm:$0xff] %v198_v14  ;;  %v230_v30 = vld [vmem:[%s1050_s7 + $0x3c0] sm:$0xff]  ;;  %v232_v31 = vld [vmem:[%s1050_s7 + $0x3c8] sm:$0xff] }
  0x26   : > { %201 = vst [vmem:[%s1055_s8 + $0x78] sm:$0xff] %v200_v15 }
  0x27   : > { %203 = vst [vmem:[%s1055_s8 + $0x80] sm:$0xff] %v202_v16 }
  0x28   : > { %205 = vst [vmem:[%s1055_s8 + $0x88] sm:$0xff] %v204_v17 }
  0x29   : > { %207 = vst [vmem:[%s1055_s8 + $0x90] sm:$0xff] %v206_v18 }
  0x2a   : > { %209 = vst [vmem:[%s1055_s8 + $0x98] sm:$0xff] %v208_v19 }
  0x2b   : > { %211 = vst [vmem:[%s1055_s8 + $0xa0] sm:$0xff] %v210_v20 }
  0x2c   : > { %213 = vst [vmem:[%s1055_s8 + $0xa8] sm:$0xff] %v212_v21 }
  0x2d   : > { %215 = vst [vmem:[%s1055_s8 + $0xb0] sm:$0xff] %v214_v22 }
  0x2e   : > { %217 = vst [vmem:[%s1055_s8 + $0xb8] sm:$0xff] %v216_v23 }
  0x2f   : > { %219 = vst [vmem:[%s1055_s8 + $0xc0] sm:$0xff] %v218_v24 }
  0x30   : > { %221 = vst [vmem:[%s1055_s8 + $0xc8] sm:$0xff] %v220_v25 }
  0x31   : > { %223 = vst [vmem:[%s1055_s8 + $0xd0] sm:$0xff] %v222_v26 }
  0x32   : > { %225 = vst [vmem:[%s1055_s8 + $0xd8] sm:$0xff] %v224_v27 }
  0x33   : > { %227 = vst [vmem:[%s1055_s8 + $0xe0] sm:$0xff] %v226_v28 }
  0x34   : > { %229 = vst [vmem:[%s1055_s8 + $0xe8] sm:$0xff] %v228_v29 }
  0x35   : > { %231 = vst [vmem:[%s1055_s8 + $0xf0] sm:$0xff] %v230_v30 }
  0x36   : > { %233 = vst [vmem:[%s1055_s8 + $0xf8] sm:$0xff] %v232_v31 }
  0x37 PF: > { %p679_p7 = scmp.ge.s32.totalorder %s967_s18, 1  ;;  %p245_p8 = scmp.lt.s32.totalorder %s967_s18, 17 }
  0x39   : > { %p246_p9 = pnand %p679_p7, %p245_p8 }
  0x3a   : > { %s252_s9 = sand.u32 (!%p246_p9), 1, %s943_s12   ;;  %p284_p10 = scmp.lt.s32.totalorder (!%p246_p9), %s955_s15, 3 }
  0x3b   : > { %249 = sbr.rel (%p246_p9) target bundleno = 245 (0xf5), region = 51  ;;  %s680_s10 = sshll.u32 (!%p246_p9), %s252_s9, 8 }
  0x3c   : > { %s1121_s11 = scalar_lea.vmem (!%p246_p9), [#allocation2], %s680_s10  ;;  %s682_s27 = sshll.u32 (!%p246_p9), %s951_s14, 2 }
  0x3d   : > { %p291_p11 = scmp.lt.s32.totalorder (!%p246_p9), %s682_s27, 15 }
  0x40   : > { %v799_v32 = vld [vmem:[%s1121_s11 + $0xe0] sm:$0xf]  ;;  %v845_v33 = vld [vmem:[%s1121_s11 + $0xec] sm:$0xf0]  ;;  %v843_v34 = vld [vmem:[%s1121_s11 + $0xe4] sm:$0xf] }
  0x41   : > { %v800_v35 = vor.u32 %v845_v33, %v799_v32  ;;  %v801_v36 = vld [vmem:[%s1121_s11 + $0xf0] sm:$0xf0]  ;;  %v807_v37 = vld [vmem:[%s1121_s11 + $0xe8] sm:$0xf]  ;;  %v846_v38 = vld [vmem:[%s1121_s11 + $0xf4] sm:$0xf0] }
  0x42   : > { %v804_v39 = vor.u32 %v843_v34, %v801_v36  ;;  %v808_v40 = vor.u32 %v846_v38, %v807_v37  ;;  %v844_v41 = vld [vmem:[%s1121_s11 + $0xec] sm:$0xf]  ;;  %v809_v42 = vld [vmem:[%s1121_s11 + $0xf8] sm:$0xf0]  ;;  %v783_v43 = vld [vmem:[%s1121_s11 + $0xc0] sm:$0xf] }
  0x43   : > { %497 = vmatpush.bf16.msra.mxu0 %v800_v35  ;;  %v812_v44 = vor.u32 %v844_v41, %v809_v42  ;;  %v841_v45 = vld [vmem:[%s1121_s11 + $0xcc] sm:$0xf0]  ;;  %v839_v46 = vld [vmem:[%s1121_s11 + $0xc4] sm:$0xf]  ;;  %v785_v47 = vld [vmem:[%s1121_s11 + $0xd0] sm:$0xf0] }
  0x44   : > { %510 = vmatpush.bf16.msra.mxu1 %v804_v39  ;;  %523 = vmatpush.bf16.msra.mxu2 %v808_v40  ;;  %v784_v48 = vor.u32 %v841_v45, %v783_v43  ;;  %v788_v49 = vor.u32 %v839_v46, %v785_v47  ;;  %v791_v50 = vld [vmem:[%s1121_s11 + $0xc8] sm:$0xf]  ;;  %v842_v51 = vld [vmem:[%s1121_s11 + $0xd4] sm:$0xf0]  ;;  %v840_v52 = vld [vmem:[%s1121_s11 + $0xcc] sm:$0xf] }
  0x45   : > { %536 = vmatpush.bf16.msra.mxu3 %v812_v44  ;;  %v792_v53 = vor.u32 %v842_v51, %v791_v50  ;;  %v793_v54 = vld [vmem:[%s1121_s11 + $0xd8] sm:$0xf0]  ;;  %v767_v55 = vld [vmem:[%s1121_s11 + $0xa0] sm:$0xf]  ;;  %v837_v56 = vld [vmem:[%s1121_s11 + $0xac] sm:$0xf0] }
  0x46   : > { %v796_v57 = vor.u32 %v840_v52, %v793_v54  ;;  %v835_v58 = vld [vmem:[%s1121_s11 + $0xa4] sm:$0xf]  ;;  %v769_v59 = vld [vmem:[%s1121_s11 + $0xb0] sm:$0xf0]  ;;  %v775_v60 = vld [vmem:[%s1121_s11 + $0xa8] sm:$0xf]  ;;  %v768_v61 = vor.u32 %v837_v56, %v767_v55 }
  0x47   : > { %498 = vmatpush.bf16.msra.mxu0 %v784_v48  ;;  %v838_v62 = vld [vmem:[%s1121_s11 + $0xb4] sm:$0xf0]  ;;  %v836_v63 = vld [vmem:[%s1121_s11 + $0xac] sm:$0xf]  ;;  %v777_v0 = vld [vmem:[%s1121_s11 + $0xb8] sm:$0xf0]  ;;  %v772_v1 = vor.u32 %v835_v58, %v769_v59 }
  0x48   : > { %511 = vmatpush.bf16.msra.mxu1 %v788_v49  ;;  %524 = vmatpush.bf16.msra.mxu2 %v792_v53  ;;  %v776_v2 = vor.u32 %v838_v62, %v775_v60  ;;  %v751_v3 = vld [vmem:[%s1121_s11 + $0x80] sm:$0xf]  ;;  %v833_v4 = vld [vmem:[%s1121_s11 + $0x8c] sm:$0xf0]  ;;  %v831_v5 = vld [vmem:[%s1121_s11 + $0x84] sm:$0xf]  ;;  %v780_v6 = vor.u32 %v836_v63, %v777_v0 }
  0x49   : > { %537 = vmatpush.bf16.msra.mxu3 %v796_v57  ;;  %v753_v7 = vld [vmem:[%s1121_s11 + $0x90] sm:$0xf0]  ;;  %v759_v8 = vld [vmem:[%s1121_s11 + $0x88] sm:$0xf]  ;;  %v834_v9 = vld [vmem:[%s1121_s11 + $0x94] sm:$0xf0]  ;;  %v752_v12 = vor.u32 %v833_v4, %v751_v3 }
  0x4a   : > { %v832_v10 = vld [vmem:[%s1121_s11 + $0x8c] sm:$0xf]  ;;  %v761_v11 = vld [vmem:[%s1121_s11 + $0x98] sm:$0xf0]  ;;  %v756_v13 = vor.u32 %v831_v5, %v753_v7  ;;  %v760_v14 = vor.u32 %v834_v9, %v759_v8  ;;  %v735_v15 = vld [vmem:[%s1121_s11 + $0x60] sm:$0xf] }
  0x4b   : > { %499 = vmatpush.bf16.msra.mxu0 %v768_v61  ;;  %v829_v16 = vld [vmem:[%s1121_s11 + $0x6c] sm:$0xf0]  ;;  %v827_v17 = vld [vmem:[%s1121_s11 + $0x64] sm:$0xf]  ;;  %v764_v18 = vor.u32 %v832_v10, %v761_v11  ;;  %v737_v19 = vld [vmem:[%s1121_s11 + $0x70] sm:$0xf0] }
  0x4c   : > { %512 = vmatpush.bf16.msra.mxu1 %v772_v1  ;;  %525 = vmatpush.bf16.msra.mxu2 %v776_v2  ;;  %v743_v20 = vld [vmem:[%s1121_s11 + $0x68] sm:$0xf]  ;;  %v830_v21 = vld [vmem:[%s1121_s11 + $0x74] sm:$0xf0]  ;;  %v828_v22 = vld [vmem:[%s1121_s11 + $0x6c] sm:$0xf]  ;;  %v736_v24 = vor.u32 %v829_v16, %v735_v15  ;;  %v740_v25 = vor.u32 %v827_v17, %v737_v19 }
  0x4d   : > { %538 = vmatpush.bf16.msra.mxu3 %v780_v6  ;;  %v745_v23 = vld [vmem:[%s1121_s11 + $0x78] sm:$0xf0]  ;;  %v744_v26 = vor.u32 %v830_v21, %v743_v20  ;;  %v719_v27 = vld [vmem:[%s1121_s11 + $0x40] sm:$0xf]  ;;  %v825_v28 = vld [vmem:[%s1121_s11 + $0x4c] sm:$0xf0] }
  0x4e   : > { %v823_v29 = vld [vmem:[%s1121_s11 + $0x44] sm:$0xf]  ;;  %v748_v30 = vor.u32 %v828_v22, %v745_v23  ;;  %v721_v31 = vld [vmem:[%s1121_s11 + $0x50] sm:$0xf0]  ;;  %v727_v32 = vld [vmem:[%s1121_s11 + $0x48] sm:$0xf]  ;;  %v720_v36 = vor.u32 %v825_v28, %v719_v27 }
  0x4f   : > { %500 = vmatpush.bf16.msra.mxu0 %v752_v12  ;;  %v826_v33 = vld [vmem:[%s1121_s11 + $0x54] sm:$0xf0]  ;;  %v824_v34 = vld [vmem:[%s1121_s11 + $0x4c] sm:$0xf]  ;;  %v729_v35 = vld [vmem:[%s1121_s11 + $0x58] sm:$0xf0]  ;;  %v724_v39 = vor.u32 %v823_v29, %v721_v31 }
  0x50   : > { %513 = vmatpush.bf16.msra.mxu1 %v756_v13  ;;  %526 = vmatpush.bf16.msra.mxu2 %v760_v14  ;;  %v703_v37 = vld [vmem:[%s1121_s11 + $0x20] sm:$0xf]  ;;  %v821_v38 = vld [vmem:[%s1121_s11 + $0x2c] sm:$0xf0]  ;;  %v728_v40 = vor.u32 %v826_v33, %v727_v32  ;;  %v819_v41 = vld [vmem:[%s1121_s11 + $0x24] sm:$0xf]  ;;  %v732_v44 = vor.u32 %v824_v34, %v729_v35 }
  0x51   : > { %539 = vmatpush.bf16.msra.mxu3 %v764_v18  ;;  %v705_v42 = vld [vmem:[%s1121_s11 + $0x30] sm:$0xf0]  ;;  %v711_v43 = vld [vmem:[%s1121_s11 + $0x28] sm:$0xf]  ;;  %v822_v45 = vld [vmem:[%s1121_s11 + $0x34] sm:$0xf0]  ;;  %v704_v50 = vor.u32 %v821_v38, %v703_v37 }
  0x52   : > { %s1243_s15 = smov (!%p284_p10, %s955_s15), 3  ;;  %v331_v46 = vld [vmem:[%s1228_s2] sm:$0x7]  ;;  %v820_v47 = vld [vmem:[%s1121_s11 + $0x2c] sm:$0xf]  ;;  %v969_v49 = vmov 0   ;;  %v708_v52 = vor.u32 %v819_v41, %v705_v42  ;;  %v712_v53 = vor.u32 %v822_v45, %v711_v43 }
  0x53   : > { %501 = vmatpush.bf16.msra.mxu0 %v736_v24  ;;  %v713_v48 = vld [vmem:[%s1121_s11 + $0x38] sm:$0xf0]  ;;  %904 = vset.pattern.permute.xlu0 %v969_v49  ;;  %v687_v51 = vld [vmem:[%s1121_s11] sm:$0xf]  ;;  %v817_v54 = vld [vmem:[%s1121_s11 + $0xc] sm:$0xf0] }
  0x54   : > { %514 = vmatpush.bf16.msra.mxu1 %v740_v25  ;;  %527 = vmatpush.bf16.msra.mxu2 %v744_v26  ;;  %v815_v55 = vld [vmem:[%s1121_s11 + $0x4] sm:$0xf]  ;;  %v689_v56 = vld [vmem:[%s1121_s11 + $0x10] sm:$0xf0]  ;;  %v716_v57 = vor.u32 %v820_v47, %v713_v48  ;;  %v695_v58 = vld [vmem:[%s1121_s11 + $0x8] sm:$0xf]  ;;  %v688_v62 = vor.u32 %v817_v54, %v687_v51 }
  0x55   : > { %540 = vmatpush.bf16.msra.mxu3 %v748_v30  ;;  %334 = vperm.xlu0 %904, %v331_v46   ;;  %v818_v59 = vld [vmem:[%s1121_s11 + $0x14] sm:$0xf0]  ;;  %s681_s22 = sshll.u32 %s1243_s15, 1  ;;  %v816_v60 = vld [vmem:[%s1121_s11 + $0xc] sm:$0xf]  ;;  %v692_v63 = vor.u32 %v815_v55, %v689_v56  ;;  %s1245_s27 = smov (!%p291_p11, %s682_s27), 15 }
  0x56   : > { %v697_v61 = vld [vmem:[%s1121_s11 + $0x18] sm:$0xf0]  ;;  %v696_v0 = vor.u32 %v818_v59, %v695_v58  ;;  %s287_s26 = scalar_lea.vmem %s1227_s1, %s681_s22  ;;  %s683_s28 = sshll.u32 %s1243_s15, 4  ;;  %vm559_vm0 = vcmask 1043456  }
  0x57   : > { %502 = vmatpush.bf16.msra.mxu0 %v720_v36  ;;  %v700_v1 = vor.u32 %v816_v60, %v697_v61  ;;  %v298_v2 = vld [vmem:[%s287_s26] sm:$0x3]  ;;  %s294_s29 = sadd.s32 %s683_s28, %s1245_s27 }
  0x58   : > { %515 = vmatpush.bf16.msra.mxu1 %v724_v39  ;;  %528 = vmatpush.bf16.msra.mxu2 %v728_v40  ;;  %s684_s30 = sshll.u32 %s294_s29, 2 }
  0x59   : > { %541 = vmatpush.bf16.msra.mxu3 %v732_v44  ;;  %s296_s5 = scalar_lea.vmem %s1229_s3, %s684_s30 }
  0x5b   : > { %503 = vmatpush.bf16.msra.mxu0 %v704_v50 }
  0x5c   : > { %516 = vmatpush.bf16.msra.mxu1 %v708_v52  ;;  %529 = vmatpush.bf16.msra.mxu2 %v712_v53 }
  0x5d   : > { %542 = vmatpush.bf16.msra.mxu3 %v716_v57 }
  0x5f   : > { %504 = vmatpush.bf16.msra.mxu0 %v688_v62 }
  0x60   : > { %517 = vmatpush.bf16.msra.mxu1 %v692_v63  ;;  %530 = vmatpush.bf16.msra.mxu2 %v696_v0 }
  0x61   : > { %543 = vmatpush.bf16.msra.mxu3 %v700_v1 }
  0x62   : > { %505 = vmatmul.bf16.vlgmr.msra.gmra.mxu0 %v298_v2 }
  0x63   : > { %518 = vmatmul.bf16.vlgmr.msra.gmra.mxu1 %v298_v2  ;;  %531 = vmatmul.bf16.vlgmr.msra.gmra.mxu2 %v298_v2 }
  0x64   : > { %544 = vmatmul.bf16.vlgmr.msra.gmra.mxu3 %v298_v2 }
  0xc7   : > { %v335_v3 = vpop.permute.xlu0 %334 }
  0xdf   : > { %v506_v4 = vpop.f32.mrf.mxu0 }
  0xe0   : > { %v519_v5 = vpop.f32.mrf.mxu1  ;;  %v507_v6 = vadd.f32 %v506_v4, %v335_v3 }
  0xe1   : > { %v520_v7 = vadd.f32 %v519_v5, %v335_v3 }
  0xe2   : > { %905 = vtanh.f32 %v507_v6 }
  0xe3   : > { %907 = vtanh.f32 %v520_v7 }
  0xe6   : > { %v532_v8 = vpop.f32.mrf.mxu2 }
  0xe7   : > { %v545_v9 = vpop.f32.mrf.mxu3  ;;  %v508_v10 = vpop.f32.mrf.mxu0  ;;  %v533_v12 = vadd.f32 %v532_v8, %v335_v3 }
  0xe8   : > { %v906_v11 = vpop.eup %905  ;;  %v546_v13 = vadd.f32 %v545_v9, %v335_v3  ;;  %v521_v14 = vpop.f32.mrf.mxu1 }
  0xe9   : > { %v908_v15 = vpop.eup %907 }
  0xea   : > { %v557_v16 = vrot.slane %v908_v15, 4  ;;  %909 = vtanh.f32 %v546_v13 }
  0xeb   : > { %911 = vtanh.f32 %v533_v12 }
  0xec   : > { %v560_v17 = vsel %vm559_vm0, %v906_v11, %v557_v16 }
  0xed   : > { %564 = vst [vmem:[%s296_s5] sm:$0x77] %v560_v17 }
  0xee   : > { %v534_v18 = vpop.f32.mrf.mxu2 }
  0xef   : > { %v547_v19 = vpop.f32.mrf.mxu3 }
  0xf0   : > { %v910_v20 = vpop.eup %909 }
  0xf1   : > { %v558_v21 = vrot.slane %v910_v20, 4  ;;  %v912_v22 = vpop.eup %911 }
  0xf3   : > { %v561_v23 = vsel %vm559_vm0, %v912_v22, %v558_v21 }
  0xf4   : > { %565 = vst [vmem:[%s296_s5 + $0x8] sm:$0x77] %v561_v23 }
  0xf5 PF: > { %s13_s18 = sadd.s32 1, %s967_s18   ;;  %s1230_s12 = smov %s947_s13 }
  0xf6   : > { %p10_p12 = scmp.ge.s32.totalorder %s13_s18, 18   ;;  %s1231_s13 = smov %s1041_s25 }
  0xf7   : > { %s1232_s14 = smov %s959_s16  ;;  %s1233_s15 = smov %s963_s17 }
  0xf8   : > { %s1234_s16 = smov %s1237_s19  ;;  %s1235_s17 = smov %s1241_s20 }
  0xf9   :  { %12 = sbr.rel (!%p10_p12) target bundleno = 4 (0x4), region = 93 }

</bundles_post_ra>
